<compile_context>
chip_gen: v7x
topology: tpu7x:2x2x1
jax: 0.10.0
libtpu: 0.0.40
codegen_flags: <defaults>
</compile_context>

<pallas_src>
import functools

import jax
import jax.numpy as jnp
import numpy as np
from jax.experimental import pallas as pl
from jax.experimental.pallas import tpu as pltpu

EPS = 1e-5
LANES = 128


def _round_up(x, m):
    return (x + m - 1) // m * m


def _physical_vmem_bytes():
    try:
        info = pltpu.get_tpu_info()
        for attr in ("vmem_capacity_bytes", "vmem_bytes"):
            v = getattr(info, attr, None)
            if v:
                return int(v)
    except Exception:
        pass
    return 64 * 1024 * 1024  # conservative: v7x has 64 MiB per TensorCore


def _vmem_limit(resident_bytes):
    # 2x for the double-buffered pipeline + slack; stay well below physical.
    need = 2 * resident_bytes + (4 << 20)
    cap = (_physical_vmem_bytes() * 3) // 4
    return int(max(8 << 20, min(need, cap)))


def _interior_mask(S, Cp, H, W):
    """(S, Cp) f32 mask: 1 on interior pixels of the (H+2)x(W+2) padded image."""
    r = jax.lax.broadcasted_iota(jnp.int32, (S, Cp), 0).astype(jnp.float32)
    # Row / column of the flat padded layout via exact float math (small
    # integers; the +0.5 keeps floor() away from rounding boundaries).
    rr = jnp.floor((r + 0.5) / float(W + 2))
    cc = r - rr * float(W + 2)
    inside = (rr >= 1.0) & (rr <= float(H)) & (cc >= 1.0) & (cc <= float(W))
    return inside.astype(jnp.float32)


def _conv3x3(slab_ref, w_ref, *, S, W, margin):
    """3x3 conv over a flat padded per-image slab.

    slab_ref: (S + 2*margin, Cp) bf16; margins and spatial halo are zero.
    w_ref:    (3, 3*Cp, Cp) bf16 laid out [ky][kx-major, Ci][Co].
    Returns (S, Cp) f32: three accumulating MXU matmuls, each with K = 3*Cp.
    """
    Wp2 = W + 2
    acc = None
    for ky in range(3):
        base = margin + (ky - 1) * Wp2 - 1
        patch = jnp.concatenate(
            [slab_ref[base + kx:base + kx + S, :] for kx in range(3)], axis=-1)
        part = jnp.dot(patch, w_ref[ky], preferred_element_type=jnp.float32)
        acc = part if acc is None else acc + part
    return acc


# ---------------------------- kernels ----------------------------------------
def _conv1_kernel(x_ref, w_ref, y_ref, st_ref, *, H, W, margin):
    """conv1 on one image + per-image BN1 partial sums (single pass)."""
    S, Cp = y_ref.shape
    y = _conv3x3(x_ref, w_ref, S=S, W=W, margin=margin)          # (S, Cp) f32
    y_ref[...] = y
    m = _interior_mask(S, Cp, H, W)                              # halo rows are garbage
    ym = y * m
    st_ref[0:1, :] = jnp.sum(ym, axis=0, keepdims=True)          # sum(y)
    st_ref[1:2, :] = jnp.sum(ym * y, axis=0, keepdims=True)      # sum(y^2)


def _bn_relu_conv2_kernel(y1_ref, sc_ref, sh_ref, w_ref, y_ref, st_ref, buf_ref,
                          *, H, W, margin):
    """bn1 (folded affine) -> relu -> conv2 + per-image BN2 partial sums."""
    S, Cp = y_ref.shape
    m = _interior_mask(S, Cp, H, W)
    # Folded BN affine (1 FMA/elem), relu, and zero the halo ring so conv2
    # sees exact zero padding.  Intermediate stored bf16 for the MXU.
    a = jnp.maximum(y1_ref[...] * sc_ref[...] + sh_ref[...], 0.0) * m
    zeros = jnp.zeros((margin, Cp), buf_ref.dtype)
    buf_ref[0:margin, :] = zeros                   # re-zeroed every step: stays
    buf_ref[margin + S:margin + S + margin, :] = zeros   # correct under megacore
    buf_ref[margin:margin + S, :] = a.astype(buf_ref.dtype)
    y = _conv3x3(buf_ref, w_ref, S=S, W=W, margin=margin)
    y_ref[...] = y
    ym = y * m
    st_ref[0:1, :] = jnp.sum(ym, axis=0, keepdims=True)
    st_ref[1:2, :] = jnp.sum(ym * y, axis=0, keepdims=True)


def _bn_add_relu_kernel(y2_ref, sc_ref, sh_ref, x_ref, o_ref, *, margin):
    """bn2 (folded affine) -> +residual -> relu."""
    S = o_ref.shape[0]
    z = y2_ref[...] * sc_ref[...] + sh_ref[...]
    res = x_ref[margin:margin + S, :].astype(jnp.float32)
    o_ref[...] = jnp.maximum(z + res, 0.0)


# ---------------------------- wrapper -----------------------------------------
def _bn_fold(stats, g, b, count):
    """Per-image (N, 2, Cp) partial sums -> folded BN scale/shift (all f32)."""
    s = jnp.sum(stats, axis=0)                                    # (2, Cp)
    mean = s[0:1, :] / count
    var = jnp.maximum(s[1:2, :] / count - mean * mean, 0.0)       # clamp >= 0
    scale = g * jax.lax.rsqrt(var + EPS)       # padded channels: g == 0 -> 0
    shift = b - mean * scale
    return scale, shift


def basic_block_forward(x_nchw, params):
    """x_nchw: (N, C, H, W) f32; stride=1, downsample=None (so C == planes)."""
    N, C, H, W = x_nchw.shape
    P = params["w1"].shape[0]
    assert P == C, "stride=1 / downsample=None requires inplanes == planes"

    Cp = _round_up(C, LANES)                 # lane-dense channel padding
    S = (H + 2) * (W + 2)                    # padded spatial positions / image
    margin = _round_up(W + 3, 8)             # >= largest |tap offset|
    Sm = S + 2 * margin
    count = float(N * H * W)
    f32, bf16 = jnp.float32, jnp.bfloat16

    # ---- layout glue (XLA): NCHW -> per-image flat padded bf16 slabs --------
    x = jnp.transpose(x_nchw, (0, 2, 3, 1)).astype(f32)           # NHWC
    xp = jnp.pad(x, ((0, 0), (1, 1), (1, 1), (0, Cp - C)))        # spatial+chan
    xpad = jnp.pad(xp.reshape(N, S, Cp),
                   ((0, 0), (margin, margin), (0, 0))).astype(bf16)  # (N,Sm,Cp)

    def prep_w(w):   # OIHW -> (3, 3*Cp, Cp) bf16, ky-grouped (K = 3*Cp per dot)
        w = jnp.transpose(w, (2, 3, 1, 0)).astype(f32)            # ky,kx,Ci,Co
        w = jnp.pad(w, ((0, 0), (0, 0),
                        (0, Cp - w.shape[2]), (0, Cp - w.shape[3])))
        return w.reshape(3, 3 * Cp, Cp).astype(bf16)

    def prep_v(v):                          # (P,) -> (1, Cp) f32, zero padded
        return jnp.pad(v.astype(f32), (0, Cp - v.shape[0])).reshape(1, Cp)

    w1, w2 = prep_w(params["w1"]), prep_w(params["w2"])
    g1, b1 = prep_v(params["g1"]), prep_v(params["b1"])
    g2, b2 = prep_v(params["g2"]), prep_v(params["b2"])

    img_in = pl.BlockSpec((None, Sm, Cp), lambda n: (n, 0, 0))
    img_out = pl.BlockSpec((None, S, Cp), lambda n: (n, 0, 0))
    st_out = pl.BlockSpec((None, 2, Cp), lambda n: (n, 0, 0))
    w_in = pl.BlockSpec((3, 3 * Cp, Cp), lambda n: (0, 0, 0))
    vec_in = pl.BlockSpec((1, Cp), lambda n: (0, 0))
    par = ("parallel",)       # batch axis shards across TCs on megacore parts

    b_w = 3 * 3 * Cp * Cp * 2
    b_x = Sm * Cp * 2
    b_y = S * Cp * 4
    b_st = 2 * Cp * 4
    b_v = Cp * 4

    # ---- pass 1: conv1 + per-image BN1 partial sums --------------------------
    y1, st1 = pl.pallas_call(
        functools.partial(_conv1_kernel, H=H, W=W, margin=margin),
        grid=(N,),
        in_specs=[img_in, w_in],
        out_specs=[img_out, st_out],
        out_shape=[jax.ShapeDtypeStruct((N, S, Cp), f32),
                   jax.ShapeDtypeStruct((N, 2, Cp), f32)],
        compiler_params=pltpu.CompilerParams(
            dimension_semantics=par,
            vmem_limit_bytes=_vmem_limit(b_x + b_w + b_y + b_st)),
    )(xpad, w1)

    sc1, sh1 = _bn_fold(st1, g1, b1, count)

    # ---- pass 2: bn1 -> relu -> conv2 + per-image BN2 partial sums -----------
    y2, st2 = pl.pallas_call(
        functools.partial(_bn_relu_conv2_kernel, H=H, W=W, margin=margin),
        grid=(N,),
        in_specs=[img_out, vec_in, vec_in, w_in],
        out_specs=[img_out, st_out],
        out_shape=[jax.ShapeDtypeStruct((N, S, Cp), f32),
                   jax.ShapeDtypeStruct((N, 2, Cp), f32)],
        scratch_shapes=[pltpu.VMEM((Sm, Cp), bf16)],
        compiler_params=pltpu.CompilerParams(
            dimension_semantics=par,
            vmem_limit_bytes=_vmem_limit(2 * b_y + 2 * b_v + b_w + b_st + b_x)),
    )(y1, sc1, sh1, w2)

    sc2, sh2 = _bn_fold(st2, g2, b2, count)

    # ---- pass 3: bn2 -> +residual -> relu -------------------------------------
    out_flat = pl.pallas_call(
        functools.partial(_bn_add_relu_kernel, margin=margin),
        grid=(N,),
        in_specs=[img_out, vec_in, vec_in, img_in],
        out_specs=img_out,
        out_shape=jax.ShapeDtypeStruct((N, S, Cp), f32),
        compiler_params=pltpu.CompilerParams(
            dimension_semantics=par,
            vmem_limit_bytes=_vmem_limit(2 * b_y + 2 * b_v + b_x)),
    )(y2, sc2, sh2, xpad)

    out = out_flat.reshape(N, H + 2, W + 2, Cp)[:, 1:H + 1, 1:W + 1, :P]
    return jnp.transpose(out, (0, 3, 1, 2))                       # NCHW


# ---------------- pure-JAX reference (mirrors the PyTorch forward) -------------
def reference_forward(x, params):
    def conv(z, w):
        return jax.lax.conv_general_dilated(
            z, w, window_strides=(1, 1), padding=((1, 1), (1, 1)),
            dimension_numbers=("NCHW", "OIHW", "NCHW"),
            precision=jax.lax.Precision.HIGHEST)

    def bn(z, g, b):
        mean = jnp.mean(z, axis=(0, 2, 3), keepdims=True)
        var = jnp.mean((z - mean) ** 2, axis=(0, 2, 3), keepdims=True)
        return ((z - mean) * jax.lax.rsqrt(var + EPS)
                * g.reshape(1, -1, 1, 1) + b.reshape(1, -1, 1, 1))

    out = jax.nn.relu(bn(conv(x, params["w1"]), params["g1"], params["b1"]))
    out = bn(conv(out, params["w2"]), params["g2"], params["b2"]) + x
    return jax.nn.relu(out)


if __name__ == "__main__":
    # small shapes: batch=2, inplanes=planes=4, spatial=16x16
    N, C, H, W = 2, 4, 16, 16
    planes = C

    key = jax.random.PRNGKey(0)
    k_x, k_w1, k_w2, k_g1, k_b1, k_g2, k_b2 = jax.random.split(key, 7)

    x = jax.random.normal(k_x, (N, C, H, W), jnp.float32)
    params = {
        "w1": jax.random.normal(k_w1, (planes, C, 3, 3), jnp.float32) * 0.1,
        "w2": jax.random.normal(k_w2, (planes, planes, 3, 3), jnp.float32) * 0.1,
        # PyTorch BN init is weight=1, bias=0; perturb slightly so the affine
        # path is exercised.
        "g1": 1.0 + 0.1 * jax.random.normal(k_g1, (planes,), jnp.float32),
        "b1": 0.1 * jax.random.normal(k_b1, (planes,), jnp.float32),
        "g2": 1.0 + 0.1 * jax.random.normal(k_g2, (planes,), jnp.float32),
        "b2": 0.1 * jax.random.normal(k_b2, (planes,), jnp.float32),
    }

    out = jax.block_until_ready(basic_block_forward(x, params))
    ref = jax.block_until_ready(reference_forward(x, params))

    # Tolerance reflects bf16 MXU operands (per perf review) vs. the f32
    # HIGHEST-precision reference; accumulation and BN statistics stay f32.
    np.testing.assert_allclose(np.asarray(out), np.asarray(ref),
                               rtol=2e-2, atol=2e-2)
    print("KERNEL_OK")
</pallas_src>

<mosaic_0001>
module attributes {stable_mosaic.version = 11 : i64} {
  func.func @_conv1_kernel(%arg0: i32, %arg1: memref<1x372x128xbf16, #tpu.memory_space<vmem>>, %arg2: memref<3x384x128xbf16, #tpu.memory_space<vmem>>, %arg3: memref<1x324x128xf32, #tpu.memory_space<vmem>>, %arg4: memref<1x2x128xf32, #tpu.memory_space<vmem>>) attributes {dimension_semantics = [#tpu.dimension_semantics<parallel>], iteration_bounds = array<i64: 2>, scalar_prefetch = 0 : i64, scratch_operands = 0 : i64, tpu.core_type = #tpu.core_type<tc>, window_params = [{transform_indices = @transform_0, window_bounds = array<i64: 1, 372, 128>}, {pipeline_mode = #tpu.pipeline_mode<synchronous>, transform_indices = @transform_1, window_bounds = array<i64: 3, 384, 128>}, {transform_indices = @transform_2, window_bounds = array<i64: 1, 324, 128>}, {transform_indices = @transform_3, window_bounds = array<i64: 1, 2, 128>}]} {
    %c0 = arith.constant 0 : index
    %c5 = arith.constant 5 : index
    %c0_0 = arith.constant 0 : index
    %0 = vector.load %arg1[%c0, %c5, %c0_0] : memref<1x372x128xbf16, #tpu.memory_space<vmem>>, vector<1x324x128xbf16>
    %1 = vector.shape_cast %0 : vector<1x324x128xbf16> to vector<324x128xbf16>
    %c0_1 = arith.constant 0 : index
    %c6 = arith.constant 6 : index
    %c0_2 = arith.constant 0 : index
    %2 = vector.load %arg1[%c0_1, %c6, %c0_2] : memref<1x372x128xbf16, #tpu.memory_space<vmem>>, vector<1x324x128xbf16>
    %3 = vector.shape_cast %2 : vector<1x324x128xbf16> to vector<324x128xbf16>
    %c0_3 = arith.constant 0 : index
    %c7 = arith.constant 7 : index
    %c0_4 = arith.constant 0 : index
    %4 = vector.load %arg1[%c0_3, %c7, %c0_4] : memref<1x372x128xbf16, #tpu.memory_space<vmem>>, vector<1x324x128xbf16>
    %5 = vector.shape_cast %4 : vector<1x324x128xbf16> to vector<324x128xbf16>
    %6 = tpu.concatenate %1, %3, %5 in 1 : vector<324x128xbf16>, vector<324x128xbf16>, vector<324x128xbf16> -> vector<324x384xbf16>
    %c0_5 = arith.constant 0 : index
    %c0_6 = arith.constant 0 : index
    %c0_7 = arith.constant 0 : index
    %7 = vector.load %arg2[%c0_5, %c0_6, %c0_7] : memref<3x384x128xbf16, #tpu.memory_space<vmem>>, vector<1x384x128xbf16>
    %8 = vector.shape_cast %7 : vector<1x384x128xbf16> to vector<384x128xbf16>
    %cst = arith.constant dense<0.000000e+00> : vector<324x128xf32>
    %9 = tpu.matmul %6, %8, %cst {dimension_numbers = #tpu.dot_dimension_numbers<[1], [0], [0], [1], [0, 0, 1, 1], [], []>} : vector<324x384xbf16>, vector<384x128xbf16>, vector<324x128xf32> -> vector<324x128xf32>
    %c0_8 = arith.constant 0 : index
    %c23 = arith.constant 23 : index
    %c0_9 = arith.constant 0 : index
    %10 = vector.load %arg1[%c0_8, %c23, %c0_9] : memref<1x372x128xbf16, #tpu.memory_space<vmem>>, vector<1x324x128xbf16>
    %11 = vector.shape_cast %10 : vector<1x324x128xbf16> to vector<324x128xbf16>
    %c0_10 = arith.constant 0 : index
    %c24 = arith.constant 24 : index
    %c0_11 = arith.constant 0 : index
    %12 = vector.load %arg1[%c0_10, %c24, %c0_11] : memref<1x372x128xbf16, #tpu.memory_space<vmem>>, vector<1x324x128xbf16>
    %13 = vector.shape_cast %12 : vector<1x324x128xbf16> to vector<324x128xbf16>
    %c0_12 = arith.constant 0 : index
    %c25 = arith.constant 25 : index
    %c0_13 = arith.constant 0 : index
    %14 = vector.load %arg1[%c0_12, %c25, %c0_13] : memref<1x372x128xbf16, #tpu.memory_space<vmem>>, vector<1x324x128xbf16>
    %15 = vector.shape_cast %14 : vector<1x324x128xbf16> to vector<324x128xbf16>
    %16 = tpu.concatenate %11, %13, %15 in 1 : vector<324x128xbf16>, vector<324x128xbf16>, vector<324x128xbf16> -> vector<324x384xbf16>
    %c1 = arith.constant 1 : index
    %c0_14 = arith.constant 0 : index
    %c0_15 = arith.constant 0 : index
    %17 = vector.load %arg2[%c1, %c0_14, %c0_15] : memref<3x384x128xbf16, #tpu.memory_space<vmem>>, vector<1x384x128xbf16>
    %18 = vector.shape_cast %17 : vector<1x384x128xbf16> to vector<384x128xbf16>
    %cst_16 = arith.constant dense<0.000000e+00> : vector<324x128xf32>
    %19 = tpu.matmul %16, %18, %cst_16 {dimension_numbers = #tpu.dot_dimension_numbers<[1], [0], [0], [1], [0, 0, 1, 1], [], []>} : vector<324x384xbf16>, vector<384x128xbf16>, vector<324x128xf32> -> vector<324x128xf32>
    %20 = arith.addf %9, %19 : vector<324x128xf32>
    %c0_17 = arith.constant 0 : index
    %c41 = arith.constant 41 : index
    %c0_18 = arith.constant 0 : index
    %21 = vector.load %arg1[%c0_17, %c41, %c0_18] : memref<1x372x128xbf16, #tpu.memory_space<vmem>>, vector<1x324x128xbf16>
    %22 = vector.shape_cast %21 : vector<1x324x128xbf16> to vector<324x128xbf16>
    %c0_19 = arith.constant 0 : index
    %c42 = arith.constant 42 : index
    %c0_20 = arith.constant 0 : index
    %23 = vector.load %arg1[%c0_19, %c42, %c0_20] : memref<1x372x128xbf16, #tpu.memory_space<vmem>>, vector<1x324x128xbf16>
    %24 = vector.shape_cast %23 : vector<1x324x128xbf16> to vector<324x128xbf16>
    %c0_21 = arith.constant 0 : index
    %c43 = arith.constant 43 : index
    %c0_22 = arith.constant 0 : index
    %25 = vector.load %arg1[%c0_21, %c43, %c0_22] : memref<1x372x128xbf16, #tpu.memory_space<vmem>>, vector<1x324x128xbf16>
    %26 = vector.shape_cast %25 : vector<1x324x128xbf16> to vector<324x128xbf16>
    %27 = tpu.concatenate %22, %24, %26 in 1 : vector<324x128xbf16>, vector<324x128xbf16>, vector<324x128xbf16> -> vector<324x384xbf16>
    %c2 = arith.constant 2 : index
    %c0_23 = arith.constant 0 : index
    %c0_24 = arith.constant 0 : index
    %28 = vector.load %arg2[%c2, %c0_23, %c0_24] : memref<3x384x128xbf16, #tpu.memory_space<vmem>>, vector<1x384x128xbf16>
    %29 = vector.shape_cast %28 : vector<1x384x128xbf16> to vector<384x128xbf16>
    %cst_25 = arith.constant dense<0.000000e+00> : vector<324x128xf32>
    %30 = tpu.matmul %27, %29, %cst_25 {dimension_numbers = #tpu.dot_dimension_numbers<[1], [0], [0], [1], [0, 0, 1, 1], [], []>} : vector<324x384xbf16>, vector<384x128xbf16>, vector<324x128xf32> -> vector<324x128xf32>
    %31 = arith.addf %20, %30 : vector<324x128xf32>
    %c0_26 = arith.constant 0 : index
    %c0_27 = arith.constant 0 : index
    %c0_28 = arith.constant 0 : index
    %32 = vector.load %arg3[%c0_26, %c0_27, %c0_28] : memref<1x324x128xf32, #tpu.memory_space<vmem>>, vector<1x324x128xf32>
    %33 = vector.shape_cast %32 : vector<1x324x128xf32> to vector<324x128xf32>
    %34 = vector.shape_cast %31 : vector<324x128xf32> to vector<1x324x128xf32>
    tpu.vector_store %arg3[%c0_26, %c0_27, %c0_28], %34 {strides = array<i32>} : memref<1x324x128xf32, #tpu.memory_space<vmem>>, vector<1x324x128xf32>,
    %35 = tpu.iota {dimensions = array<i32: 0>} : vector<324x128xi32>
    %36 = arith.sitofp %35 : vector<324x128xi32> to vector<324x128xf32>
    %cst_29 = arith.constant 5.000000e-01 : f32
    %37 = vector.broadcast %cst_29 : f32 to vector<324x128xf32>
    %38 = arith.addf %36, %37 : vector<324x128xf32>
    %cst_30 = arith.constant 1.800000e+01 : f32
    %39 = vector.broadcast %cst_30 : f32 to vector<324x128xf32>
    %40 = arith.divf %38, %39 : vector<324x128xf32>
    %41 = math.floor %40 : vector<324x128xf32>
    %cst_31 = arith.constant 1.800000e+01 : f32
    %42 = vector.broadcast %cst_31 : f32 to vector<324x128xf32>
    %43 = arith.mulf %41, %42 : vector<324x128xf32>
    %44 = arith.subf %36, %43 : vector<324x128xf32>
    %cst_32 = arith.constant 1.000000e+00 : f32
    %45 = vector.broadcast %cst_32 : f32 to vector<324x128xf32>
    %46 = arith.cmpf oge, %41, %45 : vector<324x128xf32>
    %cst_33 = arith.constant 1.600000e+01 : f32
    %47 = vector.broadcast %cst_33 : f32 to vector<324x128xf32>
    %48 = arith.cmpf ole, %41, %47 : vector<324x128xf32>
    %49 = arith.andi %46, %48 : vector<324x128xi1>
    %cst_34 = arith.constant 1.000000e+00 : f32
    %50 = vector.broadcast %cst_34 : f32 to vector<324x128xf32>
    %51 = arith.cmpf oge, %44, %50 : vector<324x128xf32>
    %52 = arith.andi %49, %51 : vector<324x128xi1>
    %cst_35 = arith.constant 1.600000e+01 : f32
    %53 = vector.broadcast %cst_35 : f32 to vector<324x128xf32>
    %54 = arith.cmpf ole, %44, %53 : vector<324x128xf32>
    %55 = arith.andi %52, %54 : vector<324x128xi1>
    %56 = arith.extui %55 : vector<324x128xi1> to vector<324x128xi32>
    %57 = arith.sitofp %56 : vector<324x128xi32> to vector<324x128xf32>
    %58 = arith.mulf %31, %57 : vector<324x128xf32>
    %cst_36 = arith.constant dense<0.000000e+00> : vector<128xf32>
    %59 = vector.multi_reduction <add>, %58, %cst_36 [0] : vector<324x128xf32> to vector<128xf32>
    %60 = vector.shape_cast %59 : vector<128xf32> to vector<1x128xf32>
    %c0_37 = arith.constant 0 : index
    %c0_38 = arith.constant 0 : index
    %c0_39 = arith.constant 0 : index
    %61 = vector.load %arg4[%c0_37, %c0_38, %c0_39] : memref<1x2x128xf32, #tpu.memory_space<vmem>>, vector<1x1x128xf32>
    %62 = vector.shape_cast %61 : vector<1x1x128xf32> to vector<1x128xf32>
    %63 = vector.shape_cast %60 : vector<1x128xf32> to vector<1x1x128xf32>
    tpu.vector_store %arg4[%c0_37, %c0_38, %c0_39], %63 {strides = array<i32>} : memref<1x2x128xf32, #tpu.memory_space<vmem>>, vector<1x1x128xf32>,
    %64 = arith.mulf %58, %31 : vector<324x128xf32>
    %cst_40 = arith.constant dense<0.000000e+00> : vector<128xf32>
    %65 = vector.multi_reduction <add>, %64, %cst_40 [0] : vector<324x128xf32> to vector<128xf32>
    %66 = vector.shape_cast %65 : vector<128xf32> to vector<1x128xf32>
    %c0_41 = arith.constant 0 : index
    %c1_42 = arith.constant 1 : index
    %c0_43 = arith.constant 0 : index
    %67 = vector.load %arg4[%c0_41, %c1_42, %c0_43] : memref<1x2x128xf32, #tpu.memory_space<vmem>>, vector<1x1x128xf32>
    %68 = vector.shape_cast %67 : vector<1x1x128xf32> to vector<1x128xf32>
    %69 = vector.shape_cast %66 : vector<1x128xf32> to vector<1x1x128xf32>
    tpu.vector_store %arg4[%c0_41, %c1_42, %c0_43], %69 {strides = array<i32>} : memref<1x2x128xf32, #tpu.memory_space<vmem>>, vector<1x1x128xf32>,
    return
  }
  func.func @transform_0(%arg0: i32) -> (i32, i32, i32) {
    %c0_i32 = arith.constant 0 : i32
    %c0_i32_0 = arith.constant 0 : i32
    %c0_i32_1 = arith.constant 0 : i32
    return %arg0, %c0_i32, %c0_i32_0 : i32, i32, i32
  }
  func.func @transform_1(%arg0: i32) -> (i32, i32, i32) {
    %c0_i32 = arith.constant 0 : i32
    %c0_i32_0 = arith.constant 0 : i32
    %c0_i32_1 = arith.constant 0 : i32
    %c0_i32_2 = arith.constant 0 : i32
    return %c0_i32, %c0_i32_0, %c0_i32_1 : i32, i32, i32
  }
  func.func @transform_2(%arg0: i32) -> (i32, i32, i32) {
    %c0_i32 = arith.constant 0 : i32
    %c0_i32_0 = arith.constant 0 : i32
    %c0_i32_1 = arith.constant 0 : i32
    return %arg0, %c0_i32, %c0_i32_0 : i32, i32, i32
  }
  func.func @transform_3(%arg0: i32) -> (i32, i32, i32) {
    %c0_i32 = arith.constant 0 : i32
    %c0_i32_0 = arith.constant 0 : i32
    %c0_i32_1 = arith.constant 0 : i32
    return %arg0, %c0_i32, %c0_i32_0 : i32, i32, i32
  }
}

</mosaic_0001>

<bundles_post_ra>
// kernel: tpu_custom_call.1
= control target key start
LH: loop header
LB: loop body
LE: loop exit
PB: predicated region body
PF: predicated region fallthrough
CT: control target
= control target key end

     0   :  { %9 = vsyncpa [#allocation3], 0  ;;  %s10776_s0 = inlined_call_operand.vmem [shape: bf16[2,372,128], index: 0, kind: input, shape index: {}]   ;;  %s10777_s1 = inlined_call_operand.vmem [shape: bf16[3,384,128], index: 1, kind: input, shape index: {}]   ;;  %s10778_s2 = inlined_call_operand.vmem [shape: f32[2,324,128], index: 2, kind: output, shape index: {0}]   ;;  %s10779_s3 = inlined_call_operand.hbm [shape: f32[2,2,128], index: 3, kind: output, shape index: {1}]  }
   0x1   :  { %11 = vsyncpa [#allocation3 + $0x1], 0  ;;  %s6714_s12 = smov 0   ;;  %s6716_s13 = smov 0  }
   0x2   :  { %s6718_s14 = smov 0   ;;  %s6720_s15 = smov 0  }
   0x3 LB: > { %s6735_s16 = sadd.s32 4294967295, %s6688_s15   ;;  %s5453_s17 = sadd.s32 4294967294, %s6688_s15   ;;  %s6688_s15 = sphi %s6720_s15, %s11273_s15   ;;  %s6684_s14 = sphi %s6718_s14, %s11272_s14   ;;  %s6680_s13 = sphi %s6716_s13, %s11271_s13   ;;  %s6676_s12 = sphi %s6714_s12, %s11270_s12  }
   0x4   : > { %s6739_s18 = sadd.s32 1, %s6688_s15   ;;  %s97_s19 = sadd.s32 1, %s6684_s14 }
   0x5   : > { %s94_s20 = ssub.s32 %s6688_s15, %s6739_s18  ;;  %p107_p0 = scmp.ne.s32.totalorder %s6684_s14, %s6680_s13 }
   0x6   : > { %p95_p1 = scmp.eq.s32.totalorder %s94_s20, 0  ;;  %p108_p2 = scmp.eq.s32.totalorder %s6735_s16, 1 }
   0x7   : > { %p113_p3 = scmp.ne.s32.totalorder %s6680_s13, %s6676_s12  ;;  %p114_p4 = scmp.eq.s32.totalorder %s5453_s17, 1 }
   0x8   : > { %s6750_s21 = scalar_select %p95_p1, %s6684_s14, %s97_s19  }
   0x9   : > { %p6752_p5 = por %p108_p2, %p107_p0  ;;  %p6756_p6 = por %p114_p4, %p113_p3 }
   0xa   : > { %p5456_p7 = scmp.ge.s32.totalorder %s6688_s15, 1  ;;  %p143_p8 = scmp.lt.s32.totalorder %s6688_s15, 3 }
   0xc   : > { %p144_p9 = pnand %p5456_p7, %p143_p8 }
   0xe   : > { %147 = sbr.rel (%p144_p9) target bundleno = 910 (0x38e), region = 28 }
  0x15   : > { %v10782_v0 = vmov 0   ;;  %v10780_v1 = vmov 0.0   ;;  %v6443_v2 = vld [vmem:[%s10777_s1 + $0xc0] sm:$0xff]   ;;  %vm6692_vm0 = vmmov 0   ;;  %p172_p10 = scmp.lt.s32.totalorder %s6735_s16, 1  ;;  %v6445_v4 = vld [vmem:[%s10777_s1 + $0xc8] sm:$0xff]  }
  0x16   : > { %1598 = vmatprep.subr.bf16.mxu1 %v10782_v0  ;;  %5831 = vmatprep.subr.bf16.mxu0 %v10780_v1  ;;  %v6444_v3 = vld [vmem:[%s10777_s1 + $0x140] sm:$0xff]   ;;  %v6446_v5 = vld [vmem:[%s10777_s1 + $0x148] sm:$0xff]   ;;  %v6447_v6 = vld [vmem:[%s10777_s1 + $0xd0] sm:$0xff]   ;;  %vm825_vm1 = vcmask 1042432   ;;  %vm916_vm2 = vsmask.f32 4352 }
  0x17   : > { %5847 = vmatprep.mubr.msk.bf16.mxu0 %vm6692_vm0, %v10780_v1  ;;  %1599 = vmatpush1.bf16.msra.mxu1 %v6443_v2  ;;  %s6782_s5 = scalar_select %p172_p10, %s6735_s16, 1  ;;  %v6448_v7 = vld [vmem:[%s10777_s1 + $0x150] sm:$0xff]   ;;  %v6449_v8 = vld [vmem:[%s10777_s1 + $0xd8] sm:$0xff]   ;;  %v6451_v10 = vld [vmem:[%s10777_s1 + $0xe0] sm:$0xff]   ;;  %vm633_vm3 = vsmask.f32 3328 }
  0x18   : > { %5832 = vmatpush3.bf16.msra.mxu0 %v6444_v3  ;;  %1600 = vmatprep.subr.bf16.mxu1 %v10782_v0  ;;  %v6450_v9 = vld [vmem:[%s10777_s1 + $0x158] sm:$0xff]   ;;  %v6452_v11 = vld [vmem:[%s10777_s1 + $0x160] sm:$0xff]   ;;  %v6453_v18 = vld [vmem:[%s10777_s1 + $0xe8] sm:$0xff]   ;;  %vm506_vm4 = vcmask 1046528   ;;  %vm1998_vm5 = vsmask.f32 5376 }
  0x19   : > { %5833 = vmatprep.subr.bf16.mxu0 %v10780_v1  ;;  %s6399_s10 = smul.u32 188, %s6782_s5  ;;  %v6454_v19 = vld [vmem:[%s10777_s1 + $0x168] sm:$0xff]   ;;  %v6455_v28 = vld [vmem:[%s10777_s1 + $0xf0] sm:$0xff]   ;;  %v6457_v41 = vld [vmem:[%s10777_s1 + $0xf8] sm:$0xff]   ;;  %vm335_vm6 = vsmask.f32 7424 }
  0x1a   : > { %v6456_v31 = vld [vmem:[%s10777_s1 + $0x170] sm:$0xff]   ;;  %v6458_v44 = vld [vmem:[%s10777_s1 + $0x178] sm:$0xff]   ;;  %v6462_v50 = vld [vmem:[%s10777_s1 + $0x100] sm:$0xff]   ;;  %s5741_s4 = sshll.u32 %s6735_s16, 5  ;;  %s6693_s16 = smov [#allocation2]  }
  0x1b   : > { %1601 = vmatpush1.bf16.msra.mxu1 %v6445_v4  ;;  %s6804_s26 = scalar_lea.vmem %s10776_s0, %s6399_s10  ;;  %v6463_v56 = vld [vmem:[%s10777_s1 + $0x80] sm:$0xff]   ;;  %v6464_v2 = vld [vmem:[%s10777_s1 + $0x108] sm:$0xff]   ;;  %s10734_s10 = scalar_lea.hbm %s10779_s3, %s5741_s4 }
  0x1c   : > { %5834 = vmatpush3.bf16.msra.mxu0 %v6446_v5  ;;  %1602 = vmatprep.subr.bf16.mxu1 %v10782_v0  ;;  %v6814_v12 = vld [vmem:[%s6804_s26 + $0xc] sm:$0xf]  ;;  %v6818_v13 = vld [vmem:[%s6804_s26 + $0x10] sm:$0xf]  ;;  %v6821_v14 = vld [vmem:[%s6804_s26 + $0x14] sm:$0xf] }
  0x1d   : > { %5835 = vmatprep.subr.bf16.mxu0 %v10780_v1  ;;  %v6824_v15 = vld [vmem:[%s6804_s26 + $0x18] sm:$0xf]  ;;  %v6828_v16 = vcombine.low %v6814_v12, %v6818_v13  ;;  %v6845_v22 = vld [vmem:[%s6804_s26 + $0x1c] sm:$0xf]  ;;  %v6848_v23 = vld [vmem:[%s6804_s26 + $0x20] sm:$0xf] }
  0x1e   : > { %v6832_v17 = vcombine.low %v6821_v14, %v6824_v15  ;;  %v6853_v27 = vcombine.low %v6845_v22, %v6848_v23  ;;  %v6865_v37 = vld [vmem:[%s6804_s26 + $0x24] sm:$0xf]  ;;  %v6868_v38 = vld [vmem:[%s6804_s26 + $0x28] sm:$0xf]  ;;  %v6885_v48 = vld [vmem:[%s6804_s26 + $0x2c] sm:$0xf] }
  0x1f   : > { %1603 = vmatpush1.bf16.msra.mxu1 %v6447_v6  ;;  %v826_v20 = vrot.slane %v6828_v16, 5  ;;  %v6873_v40 = vcombine.low %v6865_v37, %v6868_v38  ;;  %v6888_v49 = vld [vmem:[%s6804_s26 + $0x30] sm:$0xf]  ;;  %v635_v54 = vshrl.u32 %v6828_v16, 16  ;;  %v638_v58 = vshll.u32 %v6828_v16, 16  ;;  %v6471_v5 = vld [vmem:[%s10777_s1 + $0x88] sm:$0xff]  }
  0x20   : > { %5836 = vmatpush3.bf16.msra.mxu0 %v6448_v7  ;;  %1604 = vmatprep.subr.bf16.mxu1 %v10782_v0  ;;  %v827_v21 = vrot.slane %v6832_v17, 5  ;;  %v829_v34 = vrot.slane %v6853_v27, 5  ;;  %v6895_v53 = vcombine.low %v6885_v48, %v6888_v49  ;;  %v643_v59 = vshrl.u32 %v6832_v17, 16  ;;  %s6630_s19 = sshll.u32 %s6693_s16, 4  ;;  %s6631_s19 = int_to_ptr.vmem [resolvable:$false] %s6630_s19 }
  0x21   : > { %5837 = vmatprep.subr.bf16.mxu0 %v10780_v1  ;;  %v947_v25 = vshrl.u32 %v826_v20, 16  ;;  %v950_v26 = vshll.u32 %v826_v20, 16  ;;  %v831_v47 = vrot.slane %v6873_v40, 5  ;;  %v637_v60 = vrot.slane %v635_v54, 4  ;;  %s6632_s20 = scalar_lea.vmem %s6631_s19, 64 }
  0x22   : > { %v828_v24 = vsel %vm825_vm1, %v826_v20, %v827_v21  ;;  %v830_v39 = vsel %vm825_vm1, %v827_v21, %v829_v34  ;;  %v640_v61 = vrot.slane %v638_v58, 5  ;;  %v645_v62 = vrot.slane %v643_v59, 4  ;;  %v6466_v20 = vld [vmem:[%s10777_s1 + $0x110] sm:$0xff]  }
  0x23   : > { %1605 = vmatpush1.bf16.msra.mxu1 %v6449_v8  ;;  %v955_v29 = vshrl.u32 %v828_v24, 16  ;;  %v958_v30 = vshll.u32 %v828_v24, 16  ;;  %v949_v32 = vrot.slane %v947_v25, 3  ;;  %v952_v33 = vrot.slane %v950_v26, 4 }
  0x24   : > { %5838 = vmatpush3.bf16.msra.mxu0 %v6450_v9  ;;  %1606 = vmatprep.subr.bf16.mxu1 %v10782_v0  ;;  %v977_v42 = vshrl.u32 %v830_v39, 16  ;;  %v980_v43 = vshll.u32 %v830_v39, 16  ;;  %v832_v57 = vsel %vm825_vm1, %v829_v34, %v831_v47  ;;  %v646_v63 = vshll.u32 %v6832_v17, 16  ;;  %v6480_v34 = vld [vmem:[%s10777_s1 + $0x90] sm:$0xff]  }
  0x25   : > { %5839 = vmatprep.subr.bf16.mxu0 %v10780_v1  ;;  %v957_v35 = vrot.slane %v955_v29, 3  ;;  %v960_v36 = vrot.slane %v958_v30, 4  ;;  %v953_v45 = vor.u32 %v952_v33, %v949_v32  ;;  %v999_v4 = vshrl.u32 %v832_v57, 16  ;;  %v596_v33 = vld [vmem:[%s6804_s26 + $0x8] sm:$0x8] }
  0x26   : > { %v979_v51 = vrot.slane %v977_v42, 3  ;;  %v982_v52 = vrot.slane %v980_v43, 4  ;;  %v833_v6 = vrot.slane %v6895_v53, 5  ;;  %v1002_v7 = vshll.u32 %v832_v57, 16  ;;  %v6954_v42 = vld [vmem:[%s6804_s26 + $0x3c] sm:$0xf] }
  0x27   : > { %1607 = vmatpush1.bf16.msra.mxu1 %v6451_v10  ;;  %v961_v46 = vor.u32 %v960_v36, %v957_v35  ;;  %v641_v8 = vor.u32 %v640_v61, %v637_v60  ;;  %v648_v9 = vrot.slane %v646_v63, 5  ;;  %v6919_v10 = vld [vmem:[%s6804_s26 + $0x34] sm:$0xf]  ;;  %v1001_v21 = vrot.slane %v999_v4, 3  ;;  %v6467_v43 = vld [vmem:[%s10777_s1 + $0x118] sm:$0xff]  }
  0x28   : > { %5840 = vmatpush3.bf16.msra.mxu0 %v6452_v11  ;;  %1608 = vmatprep.subr.bf16.mxu1 %v10782_v0  ;;  %v6911_v3 = vor.u32 %v982_v52, %v979_v51  ;;  %v6922_v11 = vld [vmem:[%s6804_s26 + $0x38] sm:$0xf]  ;;  %v834_v24 = vsel %vm825_vm1, %v831_v47, %v833_v6  ;;  %v1004_v26 = vrot.slane %v1002_v7, 4  ;;  %v6949_v36 = vcombine.low %v6818_v13, %v6821_v14  ;;  %v6966_v51 = vld [vmem:[%s6804_s26 + $0x40] sm:$0xf] }
  0x29   : > { %5841 = vmatprep.subr.bf16.mxu0 %v10780_v1  ;;  %v962_v55 = vsel %vm916_vm2, %v953_v45, %v961_v46  ;;  %v6927_v16 = vor.u32 %v648_v9, %v645_v62  ;;  %v930_v17 = vshrl.u32 %v641_v8, 16  ;;  %v6937_v25 = vcombine.low %v6919_v10, %v6922_v11 }
  0x2a   : > { %v1021_v35 = vshrl.u32 %v834_v24, 16  ;;  %v655_v47 = vshll.u32 %v6853_v27, 16  ;;  %v6963_v13 = vor.u32 %v1004_v26, %v1001_v21  ;;  %v1024_v14 = vshll.u32 %v834_v24, 16 }
  0x2b   : > { %1609 = vmatpush1.bf16.msra.mxu1 %v6453_v18  ;;  %v933_v18 = vshll.u32 %v641_v8, 16  ;;  %v932_v29 = vrot.slane %v930_v17, 3  ;;  %v835_v39 = vrot.slane %v6937_v25, 5  ;;  %v5483_v54 = vcombine.low %v596_v33, %v6814_v12  ;;  %v6469_v12 = vld [vmem:[%s10777_s1 + $0x120] sm:$0xff]  }
  0x2c   : > { %5842 = vmatpush3.bf16.msra.mxu0 %v6454_v19  ;;  %1610 = vmatprep.subr.bf16.mxu1 %v10782_v0  ;;  %v984_v19 = vsel %vm916_vm2, %v961_v46, %v6911_v3  ;;  %v657_v58 = vrot.slane %v655_v47, 5  ;;  %v1023_v59 = vrot.slane %v1021_v35, 3  ;;  %v6991_v61 = vcombine.low %v6954_v42, %v6966_v51  ;;  %v6492_v17 = vld [vmem:[%s10777_s1 + $0xa0] sm:$0xff]  }
  0x2d   : > { %5843 = vmatprep.subr.bf16.mxu0 %v10780_v1  ;;  %v935_v30 = vrot.slane %v933_v18, 4  ;;  %v836_v57 = vsel %vm825_vm1, %v833_v6, %v835_v39  ;;  %v661_v62 = vshrl.u32 %v6873_v40, 16  ;;  %v1006_v63 = vsel %vm916_vm2, %v6911_v3, %v6963_v13 }
  0x2e   : > { %v918_v6 = vshrl.u32 %v5483_v54, 16  ;;  %v921_v7 = vshll.u32 %v5483_v54, 16  ;;  %v1046_v18 = vshll.u32 %v836_v57, 16  ;;  %v837_v24 = vrot.slane %v6991_v61, 5 }
  0x2f   : > { %1611 = vmatpush1.bf16.msra.mxu1 %v6455_v28  ;;  %v650_v28 = vsel %vm633_vm3, %v641_v8, %v6927_v16  ;;  %v1043_v8 = vshrl.u32 %v836_v57, 16  ;;  %v663_v9 = vrot.slane %v661_v62, 4 }
  0x30   : > { %5844 = vmatpush3.bf16.msra.mxu0 %v6456_v31  ;;  %1612 = vmatprep.subr.bf16.mxu1 %v10782_v0  ;;  %v938_v31 = vshrl.u32 %v650_v28, 16  ;;  %v941_v32 = vshll.u32 %v650_v28, 16  ;;  %v7015_v28 = vcombine.low %v6824_v15, %v6845_v22  ;;  %v923_v33 = vrot.slane %v921_v7, 4  ;;  %v6473_v22 = vld [vmem:[%s10777_s1 + $0x130] sm:$0xff]  }
  0x31   : > { %5845 = vmatprep.subr.bf16.mxu0 %v10780_v1  ;;  %v1045_v35 = vrot.slane %v1043_v8, 3  ;;  %v670_v15 = vshrl.u32 %v6895_v53, 16 }
  0x32   : > { %v940_v45 = vrot.slane %v938_v31, 3  ;;  %v943_v46 = vrot.slane %v941_v32, 4  ;;  %v7023_v31 = vld [vmem:[%s6804_s26 + $0x48] sm:$0xf]  ;;  %v920_v32 = vrot.slane %v918_v6, 3 }
  0x33   : > { %1613 = vmatpush1.bf16.msra.mxu1 %v6457_v41  ;;  %v652_v41 = vshrl.u32 %v6853_v27, 16  ;;  %v6487_v27 = vld [vmem:[%s10777_s1 + $0x98] sm:$0xff]   ;;  %v672_v54 = vrot.slane %v670_v15, 4  ;;  %v7070_v6 = vld [vmem:[%s6804_s26 + $0x4c] sm:$0xf] }
  0x34   : > { %5846 = vmatpush3.bf16.msra.mxu0 %v6458_v44  ;;  %1614 = vmatprep.subr.bf16.mxu1 %v10782_v0  ;;  %v936_v44 = vor.u32 %v935_v30, %v932_v29  ;;  %v6968_v52 = vor.u32 %v943_v46, %v940_v45  ;;  %v7020_v30 = vld [vmem:[%s6804_s26 + $0x44] sm:$0xf]  ;;  %v838_v46 = vsel %vm825_vm1, %v835_v39, %v837_v24  ;;  %v7052_v39 = vshll.u32 %v7015_v28, 16 }
  0x35   : > { %5931 = vmatprep.subr.bf16.mxu0 %v10780_v1  ;;  %v7041_v47 = vcombine.low %v7020_v30, %v7023_v31  ;;  %v924_v57 = vor.u32 %v923_v33, %v920_v32  ;;  %v682_v33 = vshll.u32 %v6937_v25, 16 }
  0x36   : > { %v945_v60 = vsel %vm916_vm2, %v936_v44, %v6968_v52 }
  0x37   : > { %5848 = vmatmul.mubr.bf16.vlgmr.msra.gmra.mrb[0].mxu0 %v962_v55  ;;  %1615 = vmatpush1.bf16.msra.mxu1 %v6462_v50  ;;  %v654_v50 = vrot.slane %v652_v41, 4  ;;  %v6975_v55 = vshll.u32 %v6949_v36, 16  ;;  %v6499_v41 = vld [vmem:[%s10777_s1 + $0xa8] sm:$0xff]  }
  0x38   : > { %5932 = vmatpush3.bf16.msra.mxu0 %v6463_v56  ;;  %1616 = vmatprep.subr.bf16.mxu1 %v10782_v0  ;;  %v6978_v56 = vshrl.u32 %v6949_v36, 16 }
  0x39   : > { %5851 = vmatprep.mubr.msk.bf16.mxu0 %vm6692_vm0, %v10780_v1  ;;  %5933 = vmatprep.subr.bf16.mxu0 %v10780_v1  ;;  %v658_v4 = vor.u32 %v657_v58, %v654_v50  ;;  %v926_v26 = vrot.slane %v6975_v55, 4 }
  0x3a   : > { %1630 = vmatprep.mubr.bf16.mxu1 %v945_v60  ;;  %v1065_v60 = vshrl.u32 %v838_v46, 16 }
  0x3b   : > { %1617 = vmatpush1.bf16.msra.mxu1 %v6464_v2  ;;  %v1026_v2 = vrot.slane %v1024_v14, 4 }
  0x3c   : > { %1618 = vmatprep.subr.bf16.mxu1 %v10782_v0  ;;  %5934 = vmatpush3.bf16.msra.mxu0 %v6471_v5  ;;  %v664_v5 = vshll.u32 %v6873_v40, 16  ;;  %v6470_v40 = vld [vmem:[%s10777_s1 + $0x128] sm:$0xff]  }
  0x3d   : > { %5935 = vmatprep.subr.bf16.mxu0 %v10780_v1 }
  0x3e   : > { %v666_v3 = vrot.slane %v664_v5, 5  ;;  %v839_v5 = vrot.slane %v7041_v47, 5 }
  0x3f   : > { %5852 = vmatmul.mubr.bf16.gmra.mrb[4].mxu0 %v984_v19  ;;  %1619 = vmatpush1.bf16.msra.mxu1 %v6466_v20  ;;  %v659_v19 = vsel %vm633_vm3, %v6927_v16, %v658_v4  ;;  %v1027_v16 = vor.u32 %v1026_v2, %v1023_v59 }
  0x40   : > { %1620 = vmatprep.subr.bf16.mxu1 %v10782_v0  ;;  %5855 = vmatprep.mubr.msk.bf16.mxu0 %vm6692_vm0, %v10780_v1  ;;  %v968_v20 = vshrl.u32 %v659_v19, 16  ;;  %v971_v21 = vshll.u32 %v659_v19, 16  ;;  %v7017_v29 = vor.u32 %v666_v3, %v663_v9  ;;  %v7076_v9 = vld [vmem:[%s6804_s26 + $0x50] sm:$0xf]  ;;  %v964_v3 = vrot.slane %v7052_v39, 4 }
  0x41   : > { %5936 = vmatpush3.bf16.msra.mxu0 %v6480_v34  ;;  %v925_v34 = vrot.slane %v6978_v56, 3  ;;  %v1028_v14 = vsel %vm916_vm2, %v6963_v13, %v1027_v16  ;;  %v6506_v13 = vld [vmem:[%s10777_s1 + $0xb0] sm:$0xff]  }
  0x42   : > { %5937 = vmatprep.subr.bf16.mxu0 %v10780_v1  ;;  %v970_v44 = vrot.slane %v968_v20, 3  ;;  %v973_v45 = vrot.slane %v971_v21, 4  ;;  %v668_v50 = vsel %vm633_vm3, %v658_v4, %v7017_v29  ;;  %v6515_v20 = vld [vmem:[%s10777_s1 + $0xb8] sm:$0xff]  }
  0x43   : > { %1621 = vmatpush1.bf16.msra.mxu1 %v6467_v43  ;;  %v1048_v43 = vrot.slane %v1046_v18, 4  ;;  %v7049_v58 = vor.u32 %v926_v26, %v925_v34  ;;  %v990_v4 = vshrl.u32 %v668_v50, 16  ;;  %v993_v7 = vshll.u32 %v668_v50, 16 }
  0x44   : > { %1622 = vmatprep.subr.bf16.mxu1 %v10782_v0  ;;  %v7066_v2 = vor.u32 %v973_v45, %v970_v44  ;;  %v1067_v26 = vrot.slane %v1065_v60, 3  ;;  %v840_v34 = vsel %vm825_vm1, %v837_v24, %v839_v5 }
  0x45   : > { %5938 = vmatpush3.bf16.msra.mxu0 %v6487_v27  ;;  %v673_v27 = vshll.u32 %v6895_v53, 16  ;;  %v7060_v59 = vor.u32 %v1048_v43, %v1045_v35  ;;  %v1068_v53 = vshll.u32 %v838_v46, 16  ;;  %v928_v18 = vsel %vm916_vm2, %v924_v57, %v7049_v58  ;;  %v7123_v46 = vld [vmem:[%s6804_s26 + $0x54] sm:$0xf]  ;;  %v6503_v57 = vld [vmem:[%s10777_s1 + $0x8] sm:$0xff]  }
  0x46   : > { %5939 = vmatprep.subr.bf16.mxu0 %v10780_v1  ;;  %v684_v43 = vrot.slane %v682_v33, 5  ;;  %v1087_v44 = vshrl.u32 %v840_v34, 16  ;;  %v1090_v45 = vshll.u32 %v840_v34, 16 }
  0x47   : > { %5856 = vmatmul.mubr.bf16.gmra.mrb[8].mxu0 %v1006_v63  ;;  %1623 = vmatpush1.bf16.msra.mxu1 %v6469_v12  ;;  %v7055_v12 = vshrl.u32 %v7015_v28, 16  ;;  %v675_v62 = vrot.slane %v673_v27, 5  ;;  %v6474_v63 = vld [vmem:[%s10777_s1 + $0x138] sm:$0xff]   ;;  %v1050_v21 = vsel %vm916_vm2, %v1027_v16, %v7060_v59  ;;  %v1070_v32 = vrot.slane %v1068_v53, 4 }
  0x48   : > { %1624 = vmatprep.subr.bf16.mxu1 %v10782_v0  ;;  %5859 = vmatprep.mubr.msk.bf16.mxu0 %vm6692_vm0, %v10780_v1  ;;  %v7104_v16 = vcombine.low %v7070_v6, %v7076_v9  ;;  %v7128_v27 = vld [vmem:[%s6804_s26 + $0x58] sm:$0xf]  ;;  %v688_v53 = vshrl.u32 %v6991_v61, 16 }
  0x49   : > { %5940 = vmatpush3.bf16.msra.mxu0 %v6492_v17  ;;  %v676_v8 = vor.u32 %v675_v62, %v672_v54  ;;  %v679_v17 = vshrl.u32 %v6937_v25, 16  ;;  %v963_v19 = vrot.slane %v7055_v12, 3  ;;  %v995_v25 = vrot.slane %v993_v7, 4 }
  0x4a   : > { %5941 = vmatprep.subr.bf16.mxu0 %v10780_v1  ;;  %v841_v54 = vrot.slane %v7104_v16, 5  ;;  %v691_v62 = vshll.u32 %v6991_v61, 16  ;;  %v7141_v7 = vcombine.low %v6868_v38, %v6885_v48  ;;  %v1089_v61 = vrot.slane %v1087_v44, 3  ;;  %v7179_v44 = vld [vmem:[%s6804_s26 + $0x60] sm:$0xf] }
  0x4b   : > { %1625 = vmatpush1.bf16.msra.mxu1 %v6470_v40  ;;  %v7085_v40 = vcombine.low %v6848_v23, %v6865_v37  ;;  %v975_v23 = vsel %vm916_vm2, %v6968_v52, %v7066_v2  ;;  %v992_v37 = vrot.slane %v990_v4, 3  ;;  %v677_v35 = vsel %vm633_vm3, %v7017_v29, %v676_v8  ;;  %v6500_v52 = vld [vmem:[%s10777_s1] sm:$0xff]  }
  0x4c   : > { %1626 = vmatprep.subr.bf16.mxu1 %v10782_v0  ;;  %v7120_v29 = vor.u32 %v1070_v32, %v1067_v26  ;;  %v1015_v50 = vshll.u32 %v677_v35, 16  ;;  %v7155_v38 = vcombine.low %v7123_v46, %v7128_v27  ;;  %v690_v26 = vrot.slane %v688_v53, 4 }
  0x4d   : > { %5942 = vmatpush3.bf16.msra.mxu0 %v6499_v41  ;;  %v681_v41 = vrot.slane %v679_v17, 4  ;;  %v7113_v24 = vshll.u32 %v7085_v40, 16  ;;  %v7116_v15 = vshrl.u32 %v7085_v40, 16  ;;  %v693_v32 = vrot.slane %v691_v62, 5 }
  0x4e   : > { %5943 = vmatprep.subr.bf16.mxu0 %v10780_v1  ;;  %v7164_v33 = vshll.u32 %v7141_v7, 16  ;;  %v7190_v62 = vcombine.low %v6888_v49, %v6919_v10 }
  0x4f   : > { %5860 = vmatmul.mubr.bf16.gmra.mrb[12].mxu0 %v1028_v14  ;;  %1627 = vmatpush1.bf16.msra.mxu1 %v6473_v22  ;;  %v7118_v22 = vor.u32 %v964_v3, %v963_v19  ;;  %v1012_v14 = vshrl.u32 %v677_v35, 16  ;;  %v685_v60 = vor.u32 %v684_v43, %v681_v41  ;;  %v986_v4 = vrot.slane %v7113_v24, 4  ;;  %v7174_v41 = vld [vmem:[%s6804_s26 + $0x5c] sm:$0xf] }
  0x50   : > { %1628 = vmatprep.subr.bf16.mxu1 %v10782_v0  ;;  %5863 = vmatprep.mubr.msk.bf16.mxu0 %vm6692_vm0, %v10780_v1  ;;  %v1092_v19 = vrot.slane %v1090_v45, 4  ;;  %v843_v35 = vrot.slane %v7155_v38, 5  ;;  %v697_v45 = vshrl.u32 %v7041_v47, 16  ;;  %v1008_v53 = vrot.slane %v7164_v33, 4 }
  0x51   : > { %5944 = vmatpush3.bf16.msra.mxu0 %v6506_v13  ;;  %v996_v13 = vor.u32 %v995_v25, %v992_v37  ;;  %v966_v17 = vsel %vm916_vm2, %v7049_v58, %v7118_v22  ;;  %v1014_v3 = vrot.slane %v1012_v14, 3  ;;  %v686_v58 = vsel %vm633_vm3, %v676_v8, %v685_v60 }
  0x52   : > { %5945 = vmatprep.subr.bf16.mxu0 %v10780_v1  ;;  %v1093_v8 = vor.u32 %v1092_v19, %v1089_v61  ;;  %v1034_v25 = vshrl.u32 %v686_v58, 16  ;;  %v1037_v43 = vshll.u32 %v686_v58, 16  ;;  %v700_v14 = vshll.u32 %v7041_v47, 16 }
  0x53   : > { %1629 = vmatpush1.bf16.msra.mxu1 %v6474_v63  ;;  %v985_v63 = vrot.slane %v7116_v15, 3  ;;  %v997_v48 = vsel %vm916_vm2, %v7066_v2, %v996_v13  ;;  %v844_v19 = vsel %vm825_vm1, %v841_v54, %v843_v35  ;;  %v7202_v49 = vcombine.low %v7174_v41, %v7179_v44 }
  0x54   : > { %2670 = vmatprep.subr.bf16.mxu1 %v10782_v0  ;;  %v1094_v47 = vsel %vm916_vm2, %v7120_v29, %v1093_v8  ;;  %v1036_v61 = vrot.slane %v1034_v25, 3  ;;  %v1039_v10 = vrot.slane %v1037_v43, 4  ;;  %v1134_v58 = vshll.u32 %v844_v19, 16  ;;  %v6519_v25 = vld [vmem:[%s10777_s1 + $0x28] sm:$0xff]  }
  0x55   : > { %5946 = vmatpush3.bf16.msra.mxu0 %v6515_v20  ;;  %v1017_v20 = vrot.slane %v1015_v50, 4  ;;  %v987_v2 = vor.u32 %v986_v4, %v985_v63  ;;  %v6512_v50 = vld [vmem:[%s10777_s1 + $0x18] sm:$0xff]  }
  0x56   : > { %1631 = vmatmul.mubr.bf16.vlgmr.msra.gmra.mrb[0].mxu1 %v928_v18  ;;  %4028 = vmatprep.subr.bf16.mxu0 %v10782_v0  ;;  %v1072_v18 = vsel %vm916_vm2, %v7060_v59, %v7120_v29  ;;  %v6509_v59 = vld [vmem:[%s10777_s1 + $0x10] sm:$0xff]   ;;  %v6516_v29 = vld [vmem:[%s10777_s1 + $0x20] sm:$0xff]   ;;  %v1040_v43 = vor.u32 %v1039_v10, %v1036_v61 }
  0x57   : > { %5864 = vmatmul.mubr.bf16.gmra.mrb[16].mxu0 %v1050_v21  ;;  %1638 = vmatprep.mubr.bf16.mxu1 %v975_v23  ;;  %v842_v21 = vsel %vm825_vm1, %v839_v5, %v841_v54  ;;  %v7167_v5 = vshrl.u32 %v7141_v7, 16  ;;  %v7170_v34 = vor.u32 %v1017_v20, %v1014_v3  ;;  %v988_v63 = vsel %vm916_vm2, %v7118_v22, %v987_v2 }
  0x58   : > { %5867 = vmatprep.mubr.msk.bf16.mxu0 %vm6692_vm0, %v10780_v1  ;;  %2671 = vmatpush1.bf16.msra.mxu1 %v6500_v52  ;;  %v1109_v23 = vshrl.u32 %v842_v21, 16  ;;  %v1112_v37 = vshll.u32 %v842_v21, 16  ;;  %v694_v52 = vor.u32 %v693_v32, %v690_v26  ;;  %v699_v3 = vrot.slane %v697_v45, 4  ;;  %v7220_v26 = vld [vmem:[%s6804_s26 + $0x64] sm:$0xf] }
  0x59   : > { %2672 = vmatprep.subr.bf16.mxu1 %v10782_v0  ;;  %10860 = vst [vmem:[#allocation5_spill] sm:$0xff] %v7167_v5  ;;  %v702_v20 = vrot.slane %v700_v14, 5  ;;  %v7211_v54 = vshrl.u32 %v7190_v62, 16  ;;  %v7223_v32 = vld [vmem:[%s6804_s26 + $0x68] sm:$0xf]  ;;  %v706_v14 = vshrl.u32 %v7104_v16, 16 }
  0x5a   : > { %v1111_v4 = vrot.slane %v1109_v23, 3  ;;  %v695_v22 = vsel %vm633_vm3, %v685_v60, %v694_v52  ;;  %v1131_v60 = vshrl.u32 %v844_v19, 16 }
  0x5b   : > { %10861 = vst [vmem:[#allocation6_spill] sm:$0xff] %v7211_v54  ;;  %v1059_v23 = vshll.u32 %v695_v22, 16  ;;  %v703_v45 = vor.u32 %v702_v20, %v699_v3  ;;  %v708_v10 = vrot.slane %v706_v14, 4 }
  0x5c   : > { %2673 = vmatpush1.bf16.msra.mxu1 %v6503_v57  ;;  %v1007_v57 = vrot.slane %v7167_v5, 3 }
  0x5d   : > { %2674 = vmatprep.subr.bf16.mxu1 %v10782_v0  ;;  %v1061_v61 = vrot.slane %v1059_v23, 4 }
  0x5e   : > { %1639 = vmatmul.mubr.bf16.gmra.mrb[4].mxu1 %v966_v17  ;;  %v1114_v17 = vrot.slane %v1112_v37, 4  ;;  %v845_v37 = vrot.slane %v7202_v49, 5 }
  0x5f   : > { %5868 = vmatmul.mubr.bf16.gmra.mrb[20].mxu0 %v1072_v18  ;;  %1646 = vmatprep.mubr.bf16.mxu1 %v997_v48  ;;  %v1019_v18 = vsel %vm916_vm2, %v996_v13, %v7170_v34  ;;  %v7208_v13 = vor.u32 %v1008_v53, %v1007_v57  ;;  %v7217_v48 = vshll.u32 %v7190_v62, 16  ;;  %v1029_v53 = vrot.slane %v7211_v54, 3 }
  0x60   : > { %5871 = vmatprep.mubr.msk.bf16.mxu0 %vm6692_vm0, %v10780_v1  ;;  %2675 = vmatpush1.bf16.msra.mxu1 %v6509_v59  ;;  %v7214_v21 = vor.u32 %v1114_v17, %v1111_v4  ;;  %v1056_v59 = vshrl.u32 %v695_v22, 16  ;;  %v1133_v17 = vrot.slane %v1131_v60, 3  ;;  %v846_v19 = vsel %vm825_vm1, %v843_v35, %v845_v37 }
  0x61   : > { %2676 = vmatprep.subr.bf16.mxu1 %v10782_v0  ;;  %10862 = vst [vmem:[#allocation7_spill] sm:$0xff] %v7217_v48  ;;  %v1010_v57 = vsel %vm916_vm2, %v987_v2, %v7208_v13  ;;  %v1030_v4 = vrot.slane %v7217_v48, 4  ;;  %v7247_v2 = vcombine.low %v7220_v26, %v7223_v32  ;;  %v1153_v60 = vshrl.u32 %v846_v19, 16 }
  0x62   : > { %v10870_v54 = vmov 0.0  }
  0x63   : > { %v1031_v20 = vor.u32 %v1030_v4, %v1029_v53  ;;  %v718_v53 = vshll.u32 %v7155_v38, 16  ;;  %v6522_v4 = vld [vmem:[%s10777_s1 + $0x38] sm:$0xff]  }
  0x64   : > { %2677 = vmatpush1.bf16.msra.mxu1 %v6512_v50  ;;  %v709_v50 = vshll.u32 %v7104_v16, 16  ;;  %v1058_v16 = vrot.slane %v1056_v59, 3  ;;  %v7263_v59 = vld [vmem:[%s6804_s26 + $0x6c] sm:$0xf] }
  0x65   : > { %2678 = vmatprep.subr.bf16.mxu1 %v10782_v0 }
  0x66   : > { %1647 = vmatmul.mubr.bf16.gmra.mrb[8].mxu1 %v988_v63  ;;  %v7238_v63 = vcombine.low %v6922_v11, %v6954_v42  ;;  %v6521_v11 = vld [vmem:[%s10777_s1 + $0x30] sm:$0xff]   ;;  %v1041_v42 = vsel %vm916_vm2, %v7170_v34, %v1040_v43  ;;  %v711_v22 = vrot.slane %v709_v50, 5  ;;  %v1062_v14 = vor.u32 %v1061_v61, %v1058_v16 }
  0x67   : > { %5872 = vmatmul.mubr.bf16.gmra.mrb[24].mxu0 %v1094_v47  ;;  %1654 = vmatprep.mubr.bf16.mxu1 %v1019_v18  ;;  %v1116_v47 = vsel %vm916_vm2, %v1093_v8, %v7214_v21  ;;  %v1136_v18 = vrot.slane %v1134_v58, 4  ;;  %v704_v8 = vsel %vm633_vm3, %v694_v52, %v703_v45  ;;  %v1156_v58 = vshll.u32 %v846_v19, 16  ;;  %v7266_v34 = vld [vmem:[%s6804_s26 + $0x70] sm:$0xf] }
  0x68   : > { %5875 = vmatprep.mubr.msk.bf16.mxu0 %vm6692_vm0, %v10780_v1  ;;  %2679 = vmatpush1.bf16.msra.mxu1 %v6516_v29  ;;  %v7256_v35 = vshll.u32 %v7238_v63, 16  ;;  %v7259_v3 = vshrl.u32 %v7238_v63, 16  ;;  %v1078_v52 = vshrl.u32 %v704_v8, 16  ;;  %v1081_v23 = vshll.u32 %v704_v8, 16 }
  0x69   : > { %2680 = vmatprep.subr.bf16.mxu1 %v10782_v0  ;;  %v1137_v29 = vor.u32 %v1136_v18, %v1133_v17  ;;  %v712_v50 = vor.u32 %v711_v22, %v708_v10  ;;  %v7280_v18 = vcombine.low %v6966_v51, %v7020_v30  ;;  %v1032_v16 = vsel %vm916_vm2, %v7208_v13, %v1031_v20  ;;  %v6525_v51 = vld [vmem:[%s10777_s1 + $0x40] sm:$0xff]  }
  0x6a   : > { %10863 = vst [vmem:[#allocation8_spill] sm:$0xff] %v7256_v35  ;;  %10864 = vst [vmem:[#allocation9_spill] sm:$0xff] %v7259_v3  ;;  %v1052_v17 = vrot.slane %v7256_v35, 4  ;;  %v1155_v61 = vrot.slane %v1153_v60, 3  ;;  %v1158_v19 = vrot.slane %v1156_v58, 4  ;;  %v7290_v10 = vcombine.low %v7263_v59, %v7266_v34  ;;  %v6531_v35 = vld [vmem:[%s10777_s1 + $0x58] sm:$0xff]  }
  0x6b   : > { %v1063_v30 = vsel %vm916_vm2, %v1040_v43, %v1062_v14  ;;  %v713_v13 = vsel %vm633_vm3, %v703_v45, %v712_v50  ;;  %v7303_v58 = vld [vmem:[%s6804_s26 + $0x74] sm:$0xf]  ;;  %v7309_v43 = vshll.u32 %v7280_v18, 16 }
  0x6c   : > { %2681 = vmatpush1.bf16.msra.mxu1 %v6519_v25  ;;  %v847_v25 = vrot.slane %v7247_v2, 5 }
  0x6d   : > { %2682 = vmatprep.subr.bf16.mxu1 %v10782_v0  ;;  %10866 = vst [vmem:[#allocation11_spill] sm:$0xff] %v7309_v43 }
  0x6e   : > { %1655 = vmatmul.mubr.bf16.gmra.mrb[12].mxu1 %v1010_v57  ;;  %v715_v57 = vshrl.u32 %v7155_v38, 16  ;;  %v1138_v38 = vsel %vm916_vm2, %v7214_v21, %v1137_v29  ;;  %v848_v8 = vsel %vm825_vm1, %v845_v37, %v847_v25  ;;  %v720_v21 = vrot.slane %v718_v53, 5 }
  0x6f   : > { %5876 = vmatmul.mubr.bf16.gmra.mrb[28].mxu0 %v1116_v47  ;;  %1662 = vmatprep.mubr.bf16.mxu1 %v1041_v42  ;;  %v1051_v47 = vrot.slane %v7259_v3, 3  ;;  %v1083_v42 = vrot.slane %v1081_v23, 4  ;;  %v7300_v37 = vshrl.u32 %v7280_v18, 16  ;;  %v1175_v45 = vshrl.u32 %v848_v8, 16 }
  0x70   : > { %5879 = vmatprep.mubr.msk.bf16.mxu0 %vm6692_vm0, %v10780_v1  ;;  %2683 = vmatpush1.bf16.msra.mxu1 %v6521_v11  ;;  %v1080_v11 = vrot.slane %v1078_v52, 3  ;;  %v717_v22 = vrot.slane %v715_v57, 4  ;;  %v7306_v52 = vor.u32 %v1158_v19, %v1155_v61  ;;  %v1178_v23 = vshll.u32 %v848_v8, 16 }
  0x71   : > { %2684 = vmatprep.subr.bf16.mxu1 %v10782_v0  ;;  %v7297_v60 = vor.u32 %v1052_v17, %v1051_v47  ;;  %10865 = vst [vmem:[#allocation10_spill] sm:$0xff] %v7300_v37  ;;  %v1100_v53 = vshrl.u32 %v713_v13, 16  ;;  %v849_v47 = vrot.slane %v7290_v10, 5  ;;  %v7315_v17 = vld [vmem:[%s6804_s26 + $0x78] sm:$0xf]  ;;  %v724_v19 = vshrl.u32 %v7202_v49, 16 }
  0x72   : > { %v7311_v57 = vor.u32 %v1083_v42, %v1080_v11  ;;  %v721_v61 = vor.u32 %v720_v21, %v717_v22  ;;  %v1073_v42 = vrot.slane %v7300_v37, 3  ;;  %v7329_v8 = vcombine.low %v7023_v31, %v7070_v6 }
  0x73   : > { %v1054_v11 = vsel %vm916_vm2, %v1031_v20, %v7297_v60  ;;  %v1180_v22 = vrot.slane %v1178_v23, 4  ;;  %v1102_v31 = vrot.slane %v1100_v53, 3  ;;  %v850_v6 = vsel %vm825_vm1, %v847_v25, %v849_v47  ;;  %v7356_v23 = vld [vmem:[%s6804_s26 + $0x80] sm:$0xf] }
  0x74   : > { %2685 = vmatpush1.bf16.msra.mxu1 %v6522_v4  ;;  %v1103_v4 = vshll.u32 %v713_v13, 16  ;;  %v1074_v13 = vrot.slane %v7309_v43, 4  ;;  %v1085_v20 = vsel %vm916_vm2, %v1062_v14, %v7311_v57  ;;  %v7347_v37 = vshll.u32 %v7329_v8, 16  ;;  %v7353_v14 = vld [vmem:[%s6804_s26 + $0x7c] sm:$0xf] }
  0x75   : > { %2686 = vmatprep.subr.bf16.mxu1 %v10782_v0  ;;  %v7350_v43 = vshrl.u32 %v7329_v8, 16  ;;  %v10869_v25 = vmov 0   ;;  %v1200_v53 = vshll.u32 %v850_v6, 16 }
  0x76   : > { %1663 = vmatmul.mubr.bf16.gmra.mrb[16].mxu1 %v1032_v16  ;;  %v6527_v16 = vld [vmem:[%s10777_s1 + $0x48] sm:$0xff]   ;;  %v1105_v21 = vrot.slane %v1103_v4, 4  ;;  %10867 = vst [vmem:[#allocation12_spill] sm:$0xff] %v7347_v37 }
  0x77   : > { %5880 = vmatmul.mubr.bf16.gmra.mrb[32].mxu0 %v1138_v38  ;;  %1670 = vmatprep.mubr.bf16.mxu1 %v1063_v30  ;;  %v727_v38 = vshll.u32 %v7202_v49, 16  ;;  %v1160_v30 = vsel %vm916_vm2, %v1137_v29, %v7306_v52  ;;  %v1177_v49 = vrot.slane %v1175_v45, 3  ;;  %v726_v29 = vrot.slane %v724_v19, 4  ;;  %v6529_v45 = vld [vmem:[%s10777_s1 + $0x50] sm:$0xff]   ;;  %10868 = vst [vmem:[#allocation13_spill] sm:$0xff] %v7350_v43 }
  0x78   : > { %5883 = vmatprep.mubr.msk.bf16.mxu0 %vm6692_vm0, %v10780_v1  ;;  %2687 = vmatpush1.bf16.msra.mxu1 %v6525_v51  ;;  %v7337_v51 = vcombine.low %v7303_v58, %v7315_v17  ;;  %v722_v1 = vsel %vm633_vm3, %v712_v50, %v721_v61  ;;  %v1197_v50 = vshrl.u32 %v850_v6, 16  ;;  %v1106_v48 = vor.u32 %v1105_v21, %v1102_v31  ;;  %v6534_v31 = vld [vmem:[%s10777_s1 + $0x60] sm:$0xff]  }
  0x79   : > { %2688 = vmatprep.subr.bf16.mxu1 %v10782_v0  ;;  %v729_v0 = vrot.slane %v727_v38, 5  ;;  %v1181_v19 = vor.u32 %v1180_v22, %v1177_v49  ;;  %v1122_v38 = vshrl.u32 %v722_v1, 16  ;;  %v1125_v3 = vshll.u32 %v722_v1, 16 }
  0x7a   : > { %v851_v4 = vrot.slane %v7337_v51, 5  ;;  %v736_v6 = vshll.u32 %v7247_v2, 16  ;;  %v7371_v1 = vcombine.low %v7076_v9, %v7123_v46  ;;  %v1202_v49 = vrot.slane %v1200_v53, 4  ;;  %v7398_v53 = vld [vmem:[%s6804_s26 + $0x84] sm:$0xf] }
  0x7b   : > { %v730_v5 = vor.u32 %v729_v0, %v726_v29  ;;  %v7377_v0 = vcombine.low %v7353_v14, %v7356_v23  ;;  %v1182_v22 = vsel %vm916_vm2, %v7306_v52, %v1181_v19  ;;  %v1124_v9 = vrot.slane %v1122_v38, 3  ;;  %v7401_v38 = vld [vmem:[%s6804_s26 + $0x88] sm:$0xf] }
  0x7c   : > { %2689 = vmatpush1.bf16.msra.mxu1 %v6527_v16  ;;  %v1075_v16 = vor.u32 %v1074_v13, %v1073_v42  ;;  %v1096_v42 = vrot.slane %v7347_v37, 4  ;;  %10871 = vst [vmem:[#allocation14_spill] sm:$0xff] %v7371_v1  ;;  %v1199_v13 = vrot.slane %v1197_v50, 3  ;;  %v1127_v46 = vrot.slane %v1125_v3, 4  ;;  %v6538_v37 = vld [vmem:[%s10777_s1 + $0x78] sm:$0xff]  }
  0x7d   : > { %2690 = vmatprep.subr.bf16.mxu1 %v10869_v25  ;;  %v731_v21 = vsel %vm633_vm3, %v721_v61, %v730_v5  ;;  %v7395_v52 = vshrl.u32 %v7371_v1, 16 }
  0x7e   : > { %1671 = vmatmul.mubr.bf16.gmra.mrb[20].mxu1 %v1054_v11  ;;  %v733_v11 = vshrl.u32 %v7247_v2, 16  ;;  %v1076_v2 = vsel %vm916_vm2, %v7297_v60, %v1075_v16  ;;  %v7392_v60 = vshll.u32 %v7371_v1, 16 }
  0x7f   : > { %5884 = vmatmul.mubr.bf16.gmra.mrb[36].mxu0 %v1160_v30  ;;  %1678 = vmatprep.mubr.bf16.mxu1 %v1085_v20  ;;  %v1095_v30 = vrot.slane %v7350_v43, 3  ;;  %v852_v20 = vsel %vm825_vm1, %v849_v47, %v851_v4  ;;  %v1107_v47 = vsel %vm916_vm2, %v7311_v57, %v1106_v48  ;;  %10873 = vst [vmem:[#allocation16_spill] sm:$0xff] %v7395_v52  ;;  %v6535_v43 = vld [vmem:[%s10777_s1 + $0x68] sm:$0xff]  }
  0x80   : > { %5887 = vmatprep.mubr.msk.bf16.mxu0 %vm6692_vm0, %v10870_v54  ;;  %2691 = vmatpush1.bf16.msra.mxu1 %v6529_v45  ;;  %v735_v29 = vrot.slane %v733_v11, 4  ;;  %v738_v45 = vrot.slane %v736_v6, 5  ;;  %10872 = vst [vmem:[#allocation15_spill] sm:$0xff] %v7392_v60  ;;  %v1219_v3 = vshrl.u32 %v852_v20, 16  ;;  %v7404_v57 = vor.u32 %v1202_v49, %v1199_v13 }
  0x81   : > { %2692 = vmatprep.subr.bf16.mxu1 %v10869_v25  ;;  %v7389_v50 = vor.u32 %v1096_v42, %v1095_v30  ;;  %v1222_v61 = vshll.u32 %v852_v20, 16  ;;  %v1128_v11 = vor.u32 %v1127_v46, %v1124_v9  ;;  %v1144_v6 = vshrl.u32 %v731_v21, 16 }
  0x82   : > { %v1147_v30 = vshll.u32 %v731_v21, 16  ;;  %v7409_v42 = vcombine.low %v7128_v27, %v7174_v41  ;;  %v739_v13 = vor.u32 %v738_v45, %v735_v29  ;;  %v742_v49 = vshrl.u32 %v7290_v10, 16 }
  0x83   : > { %v745_v20 = vshll.u32 %v7290_v10, 16  ;;  %v1118_v27 = vrot.slane %v7392_v60, 4  ;;  %v1221_v41 = vrot.slane %v1219_v3, 3  ;;  %v1224_v9 = vrot.slane %v1222_v61, 4  ;;  %v7442_v60 = vld [vmem:[%s6804_s26 + $0x8c] sm:$0xf] }
  0x84   : > { %2693 = vmatpush1.bf16.msra.mxu1 %v6531_v35  ;;  %v853_v35 = vrot.slane %v7377_v0, 5  ;;  %10874 = vst [vmem:[#allocation17_spill] sm:$0xff] %v7409_v42  ;;  %v1204_v10 = vsel %vm916_vm2, %v1181_v19, %v7404_v57  ;;  %v7432_v21 = vshll.u32 %v7409_v42, 16  ;;  %v1149_v29 = vrot.slane %v1147_v30, 4 }
  0x85   : > { %2694 = vmatprep.subr.bf16.mxu1 %v10869_v25  ;;  %v740_v45 = vsel %vm633_vm3, %v730_v5, %v739_v13  ;;  %v744_v3 = vrot.slane %v742_v49, 4  ;;  %v747_v61 = vrot.slane %v745_v20, 5  ;;  %v1225_v30 = vor.u32 %v1224_v9, %v1221_v41 }
  0x86   : > { %1679 = vmatmul.mubr.bf16.gmra.mrb[24].mxu1 %v1076_v2  ;;  %v1098_v2 = vsel %vm916_vm2, %v1075_v16, %v7389_v50  ;;  %v854_v46 = vsel %vm825_vm1, %v851_v4, %v853_v35  ;;  %v1129_v16 = vsel %vm916_vm2, %v1106_v48, %v1128_v11  ;;  %10875 = vst [vmem:[#allocation18_spill] sm:$0xff] %v7432_v21  ;;  %v6537_v4 = vld [vmem:[%s10777_s1 + $0x70] sm:$0xff]   ;;  %v1166_v49 = vshrl.u32 %v740_v45, 16 }
  0x87   : > { %5888 = vmatmul.mubr.bf16.gmra.mrb[40].mxu0 %v1182_v22  ;;  %1686 = vmatprep.mubr.bf16.mxu1 %v1107_v47  ;;  %v1117_v22 = vrot.slane %v7395_v52, 3  ;;  %v7426_v47 = vcombine.low %v7398_v53, %v7401_v38  ;;  %v7439_v52 = vshrl.u32 %v7409_v42, 16  ;;  %v1241_v19 = vshrl.u32 %v854_v46, 16  ;;  %v7445_v48 = vld [vmem:[%s6804_s26 + $0x90] sm:$0xf] }
  0x88   : > { %5891 = vmatprep.mubr.msk.bf16.mxu0 %vm6692_vm0, %v10870_v54  ;;  %2695 = vmatpush1.bf16.msra.mxu1 %v6534_v31  ;;  %v1146_v31 = vrot.slane %v1144_v6, 3  ;;  %v1244_v6 = vshll.u32 %v854_v46, 16  ;;  %v1169_v20 = vshll.u32 %v740_v45, 16  ;;  %v748_v1 = vor.u32 %v747_v61, %v744_v3 }
  0x89   : > { %2696 = vmatprep.subr.bf16.mxu1 %v10869_v25  ;;  %10876 = vst [vmem:[#allocation19_spill] sm:$0xff] %v7439_v52  ;;  %v855_v5 = vrot.slane %v7426_v47, 5  ;;  %v754_v46 = vshll.u32 %v7337_v51, 16  ;;  %v1243_v41 = vrot.slane %v1241_v19, 3  ;;  %v1168_v45 = vrot.slane %v1166_v49, 3 }
  0x8a   : > { %v1150_v42 = vor.u32 %v1149_v29, %v1146_v31  ;;  %v1246_v9 = vrot.slane %v1244_v6, 4  ;;  %v7466_v31 = vcombine.low %v7442_v60, %v7445_v48  ;;  %v1226_v29 = vsel %vm916_vm2, %v7404_v57, %v1225_v30 }
  0x8b   : > { %v749_v3 = vsel %vm633_vm3, %v739_v13, %v748_v1  ;;  %v7483_v13 = vld [vmem:[%s6804_s26 + $0x94] sm:$0xf] }
  0x8c   : > { %2697 = vmatpush1.bf16.msra.mxu1 %v6535_v43  ;;  %v1119_v43 = vor.u32 %v1118_v27, %v1117_v22  ;;  %v1140_v22 = vrot.slane %v7432_v21, 4  ;;  %v7460_v27 = vcombine.low %v7179_v44, %v7220_v26  ;;  %v1171_v44 = vrot.slane %v1169_v20, 4 }
  0x8d   : > { %2698 = vmatprep.subr.bf16.mxu1 %v10869_v25  ;;  %v1151_v26 = vsel %vm916_vm2, %v1128_v11, %v1150_v42  ;;  %v1247_v57 = vor.u32 %v1246_v9, %v1243_v41  ;;  %v857_v11 = vrot.slane %v7466_v31, 5  ;;  %v1191_v20 = vshll.u32 %v749_v3, 16 }
  0x8e   : > { %1687 = vmatmul.mubr.bf16.gmra.mrb[28].mxu1 %v1098_v2  ;;  %v751_v2 = vshrl.u32 %v7337_v51, 16  ;;  %v1120_v51 = vsel %vm916_vm2, %v7389_v50, %v1119_v43  ;;  %v7475_v19 = vshll.u32 %v7460_v27, 16  ;;  %v7478_v50 = vshrl.u32 %v7460_v27, 16 }
  0x8f   : > { %5892 = vmatmul.mubr.bf16.gmra.mrb[44].mxu0 %v1204_v10  ;;  %1694 = vmatprep.mubr.bf16.mxu1 %v1129_v16  ;;  %v1139_v10 = vrot.slane %v7439_v52, 3  ;;  %v856_v16 = vsel %vm825_vm1, %v853_v35, %v855_v5  ;;  %v763_v41 = vshll.u32 %v7377_v0, 16  ;;  %v7517_v52 = vld [vmem:[%s6804_s26 + $0xa0] sm:$0xf] }
  0x90   : > { %5895 = vmatprep.mubr.msk.bf16.mxu0 %vm6692_vm0, %v10870_v54  ;;  %2699 = vmatpush1.bf16.msra.mxu1 %v6537_v4  ;;  %v753_v61 = vrot.slane %v751_v2, 4  ;;  %v756_v4 = vrot.slane %v754_v46, 5  ;;  %10877 = vst [vmem:[#allocation20_spill] sm:$0xff] %v7475_v19  ;;  %10878 = vst [vmem:[#allocation21_spill] sm:$0xff] %v7478_v50  ;;  %v1263_v6 = vshrl.u32 %v856_v16, 16  ;;  %v1266_v49 = vshll.u32 %v856_v16, 16 }
  0x91   : > { %2700 = vmatprep.subr.bf16.mxu1 %v10869_v25  ;;  %v1141_v35 = vor.u32 %v1140_v22, %v1139_v10  ;;  %v1172_v2 = vor.u32 %v1171_v44, %v1168_v45  ;;  %v7488_v10 = vld [vmem:[%s6804_s26 + $0x98] sm:$0xf]  ;;  %v760_v22 = vshrl.u32 %v7377_v0, 16  ;;  %v1161_v16 = vrot.slane %v7478_v50, 3 }
  0x92   : > { %v757_v46 = vor.u32 %v756_v4, %v753_v61  ;;  %v1265_v45 = vrot.slane %v1263_v6, 3  ;;  %v1268_v44 = vrot.slane %v1266_v49, 4  ;;  %v1193_v61 = vrot.slane %v1191_v20, 4 }
  0x93   : > { %v1142_v9 = vsel %vm916_vm2, %v1119_v43, %v1141_v35  ;;  %v858_v0 = vsel %vm825_vm1, %v855_v5, %v857_v11  ;;  %v7503_v43 = vcombine.low %v7483_v13, %v7488_v10  ;;  %v1173_v4 = vsel %vm916_vm2, %v1150_v42, %v1172_v2 }
  0x94   : > { %2701 = vmatpush1.bf16.msra.mxu1 %v6538_v37  ;;  %v1188_v37 = vshrl.u32 %v749_v3, 16  ;;  %v1285_v5 = vshrl.u32 %v858_v0, 16  ;;  %v1288_v20 = vshll.u32 %v858_v0, 16 }
  0x95   : > { %6131 = vmatprep.subr.bf16.mxu1 %v10870_v54 }
  0x96   : > { %1695 = vmatmul.mubr.bf16.gmra.mrb[32].mxu1 %v1120_v51  ;;  %v7496_v51 = vcombine.low %v7223_v32, %v7263_v59  ;;  %v1190_v3 = vrot.slane %v1188_v37, 3  ;;  %v758_v32 = vsel %vm633_vm3, %v748_v1, %v757_v46  ;;  %v762_v59 = vrot.slane %v760_v22, 4 }
  0x97   : > { %5896 = vmatmul.mubr.bf16.gmra.mrb[48].mxu0 %v1226_v29  ;;  %1702 = vmatprep.mubr.bf16.mxu1 %v1151_v26  ;;  %v1248_v29 = vsel %vm916_vm2, %v1225_v30, %v1247_v57  ;;  %v1162_v26 = vrot.slane %v7475_v19, 4  ;;  %v765_v30 = vrot.slane %v763_v41, 5  ;;  %v1269_v37 = vor.u32 %v1268_v44, %v1265_v45  ;;  %v7514_v19 = vld [vmem:[%s6804_s26 + $0x9c] sm:$0xf] }
  0x98   : > { %5899 = vmatprep.mubr.msk.bf16.mxu0 %vm6692_vm0, %v10870_v54  ;;  %v7508_v50 = vshll.u32 %v7496_v51, 16  ;;  %v7511_v6 = vshrl.u32 %v7496_v51, 16  ;;  %v1210_v1 = vshrl.u32 %v758_v32, 16  ;;  %v1213_v42 = vshll.u32 %v758_v32, 16 }
  0x99   : > { %v1163_v49 = vor.u32 %v1162_v26, %v1161_v16  ;;  %v859_v22 = vrot.slane %v7503_v43, 5  ;;  %v1194_v41 = vor.u32 %v1193_v61, %v1190_v3  ;;  %v766_v21 = vor.u32 %v765_v30, %v762_v59 }
  0x9a   : > { %10879 = vst [vmem:[#allocation22_spill] sm:$0xff] %v7508_v50  ;;  %10880 = vst [vmem:[#allocation23_spill] sm:$0xff] %v7511_v6  ;;  %v772_v16 = vshll.u32 %v7426_v47, 16  ;;  %v1183_v26 = vrot.slane %v7511_v6, 3  ;;  %v1184_v45 = vrot.slane %v7508_v50, 4  ;;  %v1270_v0 = vsel %vm916_vm2, %v1247_v57, %v1269_v37 }
  0x9b   : > { %v1164_v44 = vsel %vm916_vm2, %v1141_v35, %v1163_v49  ;;  %v1290_v32 = vrot.slane %v1288_v20, 4  ;;  %v1212_v3 = vrot.slane %v1210_v1, 3  ;;  %v1215_v61 = vrot.slane %v1213_v42, 4  ;;  %v7546_v42 = vld [vmem:[%s6804_s26 + $0xa4] sm:$0xf] }
  0x9c   : > { %v860_v59 = vsel %vm825_vm1, %v857_v11, %v859_v22  ;;  %v1195_v30 = vsel %vm916_vm2, %v1172_v2, %v1194_v41  ;;  %v774_v6 = vrot.slane %v772_v16, 5  ;;  %v1185_v35 = vor.u32 %v1184_v45, %v1183_v26  ;;  %v7552_v45 = vld [vmem:[%s6804_s26 + $0xa8] sm:$0xf] }
  0x9d   : > { %v1307_v11 = vshrl.u32 %v860_v59, 16  ;;  %v1310_v1 = vshll.u32 %v860_v59, 16  ;;  %v1216_v16 = vor.u32 %v1215_v61, %v1212_v3  ;;  %v7560_v59 = vcombine.low %v7315_v17, %v7353_v14 }
  0x9e   : > { %1703 = vmatmul.mubr.bf16.gmra.mrb[36].mxu1 %v1142_v9  ;;  %v769_v9 = vshrl.u32 %v7426_v47, 16  ;;  %v7535_v47 = vcombine.low %v7514_v19, %v7517_v52 }
  0x9f   : > { %5900 = vmatmul.mubr.bf16.gmra.mrb[52].mxu0 %v1248_v29  ;;  %1710 = vmatprep.mubr.bf16.mxu1 %v1173_v4  ;;  %v7528_v29 = vcombine.low %v7266_v34, %v7303_v58  ;;  %v1287_v4 = vrot.slane %v1285_v5, 3  ;;  %v767_v34 = vsel %vm633_vm3, %v757_v46, %v766_v21  ;;  %v1309_v3 = vrot.slane %v1307_v11, 3 }
  0xa0   : > { %5903 = vmatprep.mubr.msk.bf16.mxu0 %vm6692_vm0, %v10870_v54  ;;  %v771_v58 = vrot.slane %v769_v9, 4  ;;  %v1232_v2 = vshrl.u32 %v767_v34, 16  ;;  %v1235_v46 = vshll.u32 %v767_v34, 16  ;;  %v861_v9 = vrot.slane %v7535_v47, 5 }
  0xa1   : > { %10881 = vst [vmem:[#allocation24_spill] sm:$0xff] %v7528_v29  ;;  %v7540_v57 = vshrl.u32 %v7528_v29, 16  ;;  %v1291_v5 = vor.u32 %v1290_v32, %v1287_v4  ;;  %v7543_v20 = vshll.u32 %v7528_v29, 16  ;;  %v781_v4 = vshll.u32 %v7466_v31, 16 }
  0xa2   : > { %v775_v26 = vor.u32 %v774_v6, %v771_v58  ;;  %v1186_v32 = vsel %vm916_vm2, %v1163_v49, %v1185_v35  ;;  %v1312_v6 = vrot.slane %v1310_v1, 4  ;;  %v1234_v61 = vrot.slane %v1232_v2, 3 }
  0xa3   : > { %10882 = vst [vmem:[#allocation25_spill] sm:$0xff] %v7540_v57  ;;  %10883 = vst [vmem:[#allocation26_spill] sm:$0xff] %v7543_v20  ;;  %v1206_v34 = vrot.slane %v7543_v20, 4  ;;  %v1237_v58 = vrot.slane %v1235_v46, 4  ;;  %v862_v50 = vsel %vm825_vm1, %v859_v22, %v861_v9  ;;  %v1217_v49 = vsel %vm916_vm2, %v1194_v41, %v1216_v16 }
  0xa4   : > { %v783_v14 = vrot.slane %v781_v4, 5  ;;  %v7575_v11 = vshrl.u32 %v7560_v59, 16  ;;  %v1329_v2 = vshrl.u32 %v862_v50, 16  ;;  %v1332_v22 = vshll.u32 %v862_v50, 16 }
  0xa5   : > { %v1313_v46 = vor.u32 %v1312_v6, %v1309_v3  ;;  %v1238_v20 = vor.u32 %v1237_v58, %v1234_v61  ;;  %v787_v4 = vshrl.u32 %v7503_v43, 16  ;;  %v7587_v6 = vcombine.low %v7356_v23, %v7398_v53 }
  0xa6   : > { %1711 = vmatmul.mubr.bf16.gmra.mrb[40].mxu1 %v1164_v44  ;;  %v778_v44 = vshrl.u32 %v7466_v31, 16  ;;  %v7567_v31 = vcombine.low %v7546_v42, %v7552_v45  ;;  %10885 = vst [vmem:[#allocation28_spill] sm:$0xff] %v7575_v11  ;;  %v1334_v3 = vrot.slane %v1332_v22, 4 }
  0xa7   : > { %5904 = vmatmul.mubr.bf16.gmra.mrb[56].mxu0 %v1270_v0  ;;  %1718 = vmatprep.mubr.bf16.mxu1 %v1195_v30  ;;  %v1205_v0 = vrot.slane %v7540_v57, 3  ;;  %v1292_v30 = vsel %vm916_vm2, %v1269_v37, %v1291_v5  ;;  %v776_v57 = vsel %vm633_vm3, %v766_v21, %v775_v26  ;;  %v7572_v37 = vshll.u32 %v7560_v59, 16 }
  0xa8   : > { %5907 = vmatprep.mubr.msk.bf16.mxu0 %vm6692_vm0, %v10870_v54  ;;  %v780_v17 = vrot.slane %v778_v44, 4  ;;  %v1254_v29 = vshrl.u32 %v776_v57, 16  ;;  %v863_v41 = vrot.slane %v7567_v31, 5  ;;  %v1257_v21 = vshll.u32 %v776_v57, 16 }
  0xa9   : > { %10884 = vst [vmem:[#allocation27_spill] sm:$0xff] %v7572_v37  ;;  %v1207_v1 = vor.u32 %v1206_v34, %v1205_v0  ;;  %v1227_v0 = vrot.slane %v7575_v11, 3  ;;  %v1228_v50 = vrot.slane %v7572_v37, 4  ;;  %v1331_v34 = vrot.slane %v1329_v2, 3 }
  0xaa   : > { %v784_v44 = vor.u32 %v783_v14, %v780_v17  ;;  %v1314_v61 = vsel %vm916_vm2, %v1291_v5, %v1313_v46  ;;  %v1239_v57 = vsel %vm916_vm2, %v1216_v16, %v1238_v20  ;;  %v1256_v58 = vrot.slane %v1254_v29, 3 }
  0xab   : > { %v1259_v17 = vrot.slane %v1257_v21, 4  ;;  %v789_v11 = vrot.slane %v787_v4, 4  ;;  %v1335_v2 = vor.u32 %v1334_v3, %v1331_v34  ;;  %v7595_v22 = vshll.u32 %v7587_v6, 16 }
  0xac   : > { %v785_v14 = vsel %vm633_vm3, %v775_v26, %v784_v44  ;;  %v7598_v23 = vshrl.u32 %v7587_v6, 16  ;;  %v796_v4 = vshrl.u32 %v7535_v47, 16 }
  0xad   : > { %v1276_v5 = vshrl.u32 %v785_v14, 16  ;;  %v1260_v26 = vor.u32 %v1259_v17, %v1256_v58  ;;  %v1250_v3 = vrot.slane %v7595_v22, 4 }
  0xae   : > { %1719 = vmatmul.mubr.bf16.gmra.mrb[44].mxu1 %v1186_v32  ;;  %v790_v32 = vshll.u32 %v7503_v43, 16  ;;  %v6518_v43 = vld [vmem:[%s6804_s26 + $0xac] ss:$0 sps:$4 sm:$0x77]   ;;  %v1249_v34 = vrot.slane %v7598_v23, 3 }
  0xaf   : > { %5908 = vmatmul.mubr.bf16.gmra.mrb[60].mxu0 %v1292_v30  ;;  %1726 = vmatprep.mubr.bf16.mxu1 %v1217_v49  ;;  %v1208_v30 = vsel %vm916_vm2, %v1185_v35, %v1207_v1  ;;  %v864_v49 = vsel %vm825_vm1, %v861_v9, %v863_v41  ;;  %v1229_v35 = vor.u32 %v1228_v50, %v1227_v0  ;;  %v1279_v9 = vshll.u32 %v785_v14, 16 }
  0xb0   : > { %5911 = vmatprep.mubr.msk.bf16.mxu0 %vm6692_vm0, %v10870_v54  ;;  %v792_v37 = vrot.slane %v790_v32, 5  ;;  %v1356_v53 = vshrl.u32 %v864_v49, 16  ;;  %v1359_v29 = vshll.u32 %v864_v49, 16  ;;  %v865_v16 = vrot.slane %v6518_v43, 5  ;;  %v185_v43 = vld [vmem:[%s6804_s26 + $0x8] sm:$0xf] }
  0xb1   : > { %v799_v32 = vshll.u32 %v7535_v47, 16  ;;  %v1230_v0 = vsel %vm916_vm2, %v1207_v1, %v1229_v35  ;;  %v7607_v50 = vcombine.low %v7401_v38, %v7442_v60  ;;  %v1261_v47 = vsel %vm916_vm2, %v1238_v20, %v1260_v26 }
  0xb2   : > { %v793_v21 = vor.u32 %v792_v37, %v789_v11  ;;  %v1278_v37 = vrot.slane %v1276_v5, 3  ;;  %v1281_v11 = vrot.slane %v1279_v9, 4  ;;  %v866_v58 = vsel %vm825_vm1, %v863_v41, %v865_v16  ;;  %v7623_v5 = vld [vmem:[%s6804_s26 + $0x4] sm:$0xf]  ;;  %v225_v9 = vld [vmem:[%s6804_s26] sm:$0x8] }
  0xb3   : > { %v798_v49 = vrot.slane %v796_v4, 4  ;;  %v801_v60 = vrot.slane %v799_v32, 5  ;;  %v7616_v38 = vshll.u32 %v7607_v50, 16  ;;  %v1251_v17 = vor.u32 %v1250_v3, %v1249_v34 }
  0xb4   : > { %v794_v1 = vsel %vm633_vm3, %v784_v44, %v793_v21  ;;  %v1383_v14 = vshrl.u32 %v866_v58, 16  ;;  %v1386_v41 = vshll.u32 %v866_v58, 16  ;;  %v1282_v44 = vor.u32 %v1281_v11, %v1278_v37 }
  0xb5   : > { %v802_v16 = vor.u32 %v801_v60, %v798_v49  ;;  %v805_v4 = vshrl.u32 %v7567_v31, 16  ;;  %v808_v32 = vshll.u32 %v7567_v31, 16  ;;  %v1272_v3 = vrot.slane %v7616_v38, 4 }
  0xb6   : > { %1727 = vmatmul.mubr.bf16.gmra.mrb[48].mxu1 %v1208_v30  ;;  %v1336_v30 = vsel %vm916_vm2, %v1313_v46, %v1335_v2  ;;  %v7619_v46 = vshrl.u32 %v7607_v50, 16  ;;  %v1252_v37 = vsel %vm916_vm2, %v1229_v35, %v1251_v17  ;;  %v1385_v11 = vrot.slane %v1383_v14, 3 }
  0xb7   : > { %5912 = vmatmul.mubr.bf16.gmra.mrb[64].mxu0 %v1314_v61  ;;  %1734 = vmatprep.mubr.bf16.mxu1 %v1239_v57  ;;  %v1358_v61 = vrot.slane %v1356_v53, 3  ;;  %v1361_v57 = vrot.slane %v1359_v29, 4  ;;  %v1298_v53 = vshrl.u32 %v794_v1, 16  ;;  %v1301_v29 = vshll.u32 %v794_v1, 16 }
  0xb8   : > { %5915 = vmatprep.mubr.msk.bf16.mxu0 %vm6692_vm0, %v10870_v54  ;;  %10886 = vst [vmem:[#allocation29_spill] sm:$0xff] %v7619_v46  ;;  %v1388_v58 = vrot.slane %v1386_v41, 4  ;;  %v1283_v1 = vsel %vm916_vm2, %v1260_v26, %v1282_v44  ;;  %v7661_v26 = vcombine.low %v7488_v10, %v7514_v19 }
  0xb9   : > { %v1362_v20 = vor.u32 %v1361_v57, %v1358_v61  ;;  %v7637_v61 = vcombine.low %v7445_v48, %v7483_v13  ;;  %v7640_v57 = vld [vmem:[%s6804_s26 + $0xac] sm:$0x3]  ;;  %v1300_v49 = vrot.slane %v1298_v53, 3  ;;  %v1303_v60 = vrot.slane %v1301_v29, 4 }
  0xba   : > { %v810_v48 = vrot.slane %v808_v32, 5  ;;  %v5506_v13 = vcombine.low %v7640_v57, %v7640_v57 }
  0xbb   : > { %v1363_v31 = vsel %vm916_vm2, %v1335_v2, %v1362_v20  ;;  %v7652_v35 = vshll.u32 %v7637_v61, 16  ;;  %v7655_v14 = vshrl.u32 %v7637_v61, 16  ;;  %v7657_v2 = vor.u32 %v1388_v58, %v1385_v11 }
  0xbd   : > { %10887 = vst [vmem:[#allocation30_spill] sm:$0xff] %v7652_v35  ;;  %10888 = vst [vmem:[#allocation31_spill] sm:$0xff] %v7655_v14  ;;  %v1390_v10 = vsel %vm916_vm2, %v1362_v20, %v7657_v2  ;;  %v1294_v11 = vrot.slane %v7652_v35, 4  ;;  %v7681_v20 = vshll.u32 %v7661_v26, 16 }
  0xbe   : > { %1735 = vmatmul.mubr.bf16.gmra.mrb[52].mxu1 %v1230_v0  ;;  %v6586_v0 = vld [vmem:[%s6804_s26 + $0xc] sm:$0xf] }
  0xbf   : > { %5916 = vmatmul.mubr.bf16.gmra.mrb[68].mxu0 %v1336_v30  ;;  %1742 = vmatprep.mubr.bf16.mxu1 %v1261_v47  ;;  %v7631_v34 = vcombine.low %v185_v43, %v6586_v0  ;;  %v1271_v30 = vrot.slane %v7619_v46, 3  ;;  %v7644_v47 = vcombine.low %v225_v9, %v7623_v5  ;;  %v803_v43 = vsel %vm633_vm3, %v793_v21, %v802_v16 }
  0xc0   : > { %5919 = vmatprep.mubr.msk.bf16.mxu0 %vm6692_vm0, %v10870_v54  ;;  %v807_v0 = vrot.slane %v805_v4, 4  ;;  %v1320_v53 = vshrl.u32 %v803_v43, 16  ;;  %v1323_v29 = vshll.u32 %v803_v43, 16  ;;  %v510_v9 = vrot.slane %v6949_v36, 1  ;;  %10890 = vst [vmem:[#allocation33_spill] sm:$0xff] %v7681_v20 }
  0xc1   : > { %v1273_v46 = vor.u32 %v1272_v3, %v1271_v30  ;;  %v507_v21 = vrot.slane %v7644_v47, 1  ;;  %v508_v41 = vrot.slane %v7631_v34, 1  ;;  %v1304_v4 = vor.u32 %v1303_v60, %v1300_v49 }
  0xc2   : > { %v811_v32 = vor.u32 %v810_v48, %v807_v0  ;;  %v814_v30 = vshrl.u32 %v5506_v13, 16  ;;  %v817_v3 = vshll.u32 %v5506_v13, 16  ;;  %v1325_v36 = vrot.slane %v1323_v29, 4 }
  0xc3   : > { %v1274_v19 = vsel %vm916_vm2, %v1251_v17, %v1273_v46  ;;  %v509_v58 = vsel %vm506_vm4, %v507_v21, %v508_v41  ;;  %v511_v49 = vsel %vm506_vm4, %v508_v41, %v510_v9  ;;  %v1305_v60 = vsel %vm916_vm2, %v1282_v44, %v1304_v4 }
  0xc4   : > { %v812_v17 = vsel %vm633_vm3, %v802_v16, %v811_v32  ;;  %v816_v43 = vrot.slane %v814_v30, 4  ;;  %v819_v0 = vrot.slane %v817_v3, 5  ;;  %v2029_v48 = vshrl.u32 %v509_v58, 16 }
  0xc5   : > { %v2032_v13 = vshll.u32 %v509_v58, 16  ;;  %v2037_v21 = vshrl.u32 %v511_v49, 16  ;;  %v1350_v35 = vshll.u32 %v812_v17, 16  ;;  %v512_v41 = vrot.slane %v7015_v28, 1 }
  0xc6   : > { %1743 = vmatmul.mubr.bf16.gmra.mrb[56].mxu1 %v1252_v37  ;;  %v1293_v37 = vrot.slane %v7655_v14, 3  ;;  %v1347_v14 = vshrl.u32 %v812_v17, 16  ;;  %v820_v30 = vor.u32 %v819_v0, %v816_v43  ;;  %v1316_v3 = vrot.slane %v7681_v20, 4 }
  0xc7   : > { %5920 = vmatmul.mubr.bf16.gmra.mrb[72].mxu0 %v1363_v31  ;;  %1750 = vmatprep.mubr.bf16.mxu1 %v1283_v1  ;;  %v1322_v31 = vrot.slane %v1320_v53, 3  ;;  %v7675_v1 = vshrl.u32 %v7661_v26, 16  ;;  %v2040_v53 = vshll.u32 %v511_v49, 16  ;;  %v2031_v58 = vrot.slane %v2029_v48, 2 }
  0xc8   : > { %5923 = vmatprep.mubr.msk.bf16.mxu0 %vm6692_vm0, %v10870_v54  ;;  %v1295_v29 = vor.u32 %v1294_v11, %v1293_v37  ;;  %v2039_v49 = vrot.slane %v2037_v21, 2  ;;  %v1352_v28 = vrot.slane %v1350_v35, 4  ;;  %v513_v17 = vsel %vm506_vm4, %v510_v9, %v512_v41 }
  0xc9   : > { %10889 = vst [vmem:[#allocation32_spill] sm:$0xff] %v7675_v1  ;;  %v1326_v44 = vor.u32 %v1325_v36, %v1322_v31  ;;  %v1315_v16 = vrot.slane %v7675_v1, 3  ;;  %v2042_v37 = vrot.slane %v2040_v53, 3  ;;  %v821_v36 = vsel %vm633_vm3, %v811_v32, %v820_v30 }
  0xca   : > { %v1296_v11 = vsel %vm916_vm2, %v1273_v46, %v1295_v29  ;;  %v2059_v20 = vshrl.u32 %v513_v17, 16  ;;  %v1374_v46 = vshrl.u32 %v821_v36, 16  ;;  %v514_v35 = vrot.slane %v7085_v40, 1 }
  0xcb   : > { %v1327_v31 = vsel %vm916_vm2, %v1304_v4, %v1326_v44  ;;  %v1317_v43 = vor.u32 %v1316_v3, %v1315_v16  ;;  %v2043_v48 = vor.u32 %v2042_v37, %v2039_v49  ;;  %v339_v9 = vshll.u32 %v7644_v47, 16 }
  0xcc   : > { %v344_v4 = vshll.u32 %v7631_v34, 16  ;;  %v2061_v30 = vrot.slane %v2059_v20, 2 }
  0xcd   : > { %v1318_v32 = vsel %vm916_vm2, %v1295_v29, %v1317_v43  ;;  %v6526_v29 = vld [vmem:[%s10777_s1 + $0x180] sm:$0xff]   ;;  %v341_v49 = vrot.slane %v339_v9, 1 }
  0xce   : > { %1751 = vmatmul.mubr.bf16.gmra.mrb[60].mxu1 %v1274_v19  ;;  %v2034_v19 = vrot.slane %v2032_v13, 3 }
  0xcf   : > { %5924 = vmatmul.mubr.bf16.gmra.mrb[76].mxu0 %v1390_v10  ;;  %1758 = vmatprep.mubr.bf16.mxu1 %v1305_v60  ;;  %v5484_v10 = vcombine.low %v7517_v52, %v7546_v42  ;;  %v1349_v60 = vrot.slane %v1347_v14, 3  ;;  %v2062_v52 = vshll.u32 %v513_v17, 16  ;;  %v1377_v14 = vshll.u32 %v821_v36, 16 }
  0xd0   : > { %5927 = vmatprep.mubr.msk.bf16.mxu0 %vm6692_vm0, %v10870_v54  ;;  %v2035_v0 = vor.u32 %v2034_v19, %v2031_v58  ;;  %v1376_v58 = vrot.slane %v1374_v46, 3  ;;  %v515_v19 = vsel %vm506_vm4, %v512_v41, %v514_v35 }
  0xd1   : > { %v1338_v1 = vshrl.u32 %v5484_v10, 16  ;;  %v1341_v13 = vshll.u32 %v5484_v10, 16  ;;  %v1353_v42 = vor.u32 %v1352_v28, %v1349_v60  ;;  %v2064_v3 = vrot.slane %v2062_v52, 3  ;;  %v6530_v28 = vld [vmem:[%s10777_s1 + $0x188] sm:$0xff]  }
  0xd2   : > { %v2044_v53 = vsel %vm1998_vm5, %v2035_v0, %v2043_v48  ;;  %v337_v10 = vshrl.u32 %v7644_v47, 16  ;;  %v2084_v47 = vshll.u32 %v515_v19, 16  ;;  %v516_v60 = vrot.slane %v7141_v7, 1 }
  0xd3   : > { %v1340_v21 = vrot.slane %v1338_v1, 3  ;;  %v1343_v16 = vrot.slane %v1341_v13, 4  ;;  %v1354_v40 = vsel %vm916_vm2, %v1326_v44, %v1353_v42  ;;  %v1379_v1 = vrot.slane %v1377_v14, 4 }
  0xd4   : > { %v2065_v41 = vor.u32 %v2064_v3, %v2061_v30  ;;  %v354_v0 = vrot.slane %v6975_v55, 1  ;;  %v517_v9 = vsel %vm506_vm4, %v514_v35, %v516_v60  ;;  %v518_v35 = vrot.slane %v7190_v62, 1 }
  0xd5   : > { %v1344_v44 = vor.u32 %v1343_v16, %v1340_v21  ;;  %v1380_v17 = vor.u32 %v1379_v1, %v1376_v58  ;;  %v2086_v21 = vrot.slane %v2084_v47, 3 }
  0xd6   : > { %1759 = vmatmul.mubr.bf16.gmra.mrb[64].mxu1 %v1296_v11  ;;  %v2081_v11 = vshrl.u32 %v515_v19, 16  ;;  %v2066_v46 = vsel %vm1998_vm5, %v2043_v48, %v2065_v41  ;;  %v2106_v48 = vshll.u32 %v517_v9, 16  ;;  %v183_v19 = vld [vmem:[%s6804_s26] sm:$0xc]  ;;  %v358_v62 = vor.u32 %v6978_v56, %v354_v0 }
  0xd7   : > { %5928 = vmatmul.mubr.bf16.gmra.mrb[80].mxu0 %v7657_v2  ;;  %1766 = vmatprep.mubr.bf16.mxu1 %v1327_v31  ;;  %v5485_v2 = vcombine.low %v7552_v45, %v7640_v57  ;;  %v346_v45 = vrot.slane %v344_v4, 1  ;;  %v348_v57 = vshrl.u32 %v7631_v34, 16  ;;  %v342_v31 = vor.u32 %v341_v49, %v337_v10 }
  0xd8   : > { %5947 = vmatprep.mubr.msk.bf16.mxu0 %vm6692_vm0, %v10870_v54  ;;  %v1345_v7 = vsel %vm916_vm2, %v1317_v43, %v1344_v44  ;;  %v2083_v14 = vrot.slane %v2081_v11, 2  ;;  %v2103_v43 = vshrl.u32 %v517_v9, 16  ;;  %v362_v49 = vrot.slane %v7052_v39, 1 }
  0xd9   : > { %v1365_v20 = vshrl.u32 %v5485_v2, 16  ;;  %v1368_v37 = vshll.u32 %v5485_v2, 16  ;;  %v350_v36 = vor.u32 %v348_v57, %v346_v45  ;;  %v6536_v2 = vld [vmem:[%s10777_s1 + $0x190] sm:$0xff]   ;;  %v519_v11 = vsel %vm506_vm4, %v516_v60, %v518_v35 }
  0xda   : > { %v2087_v10 = vor.u32 %v2086_v21, %v2083_v14  ;;  %v2125_v60 = vshrl.u32 %v519_v11, 16  ;;  %v2128_v9 = vshll.u32 %v519_v11, 16  ;;  %v522_v11 = vrot.slane %v7280_v18, 1 }
  0xdb   : > { %v1367_v13 = vrot.slane %v1365_v20, 3  ;;  %v1370_v52 = vrot.slane %v1368_v37, 4  ;;  %v355_v16 = vsel %vm335_vm6, %v350_v36, %v354_v0  ;;  %v2108_v20 = vrot.slane %v2106_v48, 3 }
  0xdc   : > { %v2023_v58 = vshll.u32 %v355_v16, 16  ;;  %v5460_v37 = vcombine.low %v183_v19, %v7623_v5  ;;  %v363_v0 = vsel %vm335_vm6, %v358_v62, %v362_v49  ;;  %v2008_v48 = vrot.slane %v344_v4, 3 }
  0xdd   : > { %v7732_v30 = vor.u32 %v1370_v52, %v1367_v13  ;;  %v2088_v13 = vsel %vm1998_vm5, %v2065_v41, %v2087_v10  ;;  %v520_v41 = vrot.slane %v7238_v63, 1  ;;  %v2053_v21 = vshll.u32 %v363_v0, 16 }
  0xde   : > { %1767 = vmatmul.mubr.bf16.gmra.mrb[68].mxu1 %v1318_v32  ;;  %v1381_v32 = vsel %vm916_vm2, %v1353_v42, %v1380_v17  ;;  %v2025_v36 = vrot.slane %v2023_v58, 3  ;;  %v2000_v5 = vshrl.u32 %v5460_v37, 16  ;;  %v2007_v63 = vrot.slane %v348_v57, 2 }
  0xdf   : > { %5948 = vmatmul.mubr.bf16.vlgmr.msra.gmra.mrb[84].mxu0 %v2044_v53  ;;  %1774 = vmatprep.mubr.bf16.mxu1 %v1354_v40  ;;  %v347_v53 = vsel %vm335_vm6, %v342_v31, %v346_v45  ;;  %v2020_v40 = vshrl.u32 %v355_v16, 16  ;;  %v1372_v1 = vsel %vm916_vm2, %v1344_v44, %v7732_v30  ;;  %v2105_v45 = vrot.slane %v2103_v43, 2  ;;  %v6541_v44 = vld [vmem:[%s10777_s1 + $0x1a0] sm:$0xff]   ;;  %v6542_v16 = vld [vmem:[%s10777_s1 + $0x1a8] sm:$0xff]  }
  0xe0   : > { %4029 = vmatpush1.bf16.msra.mxu0 %v6526_v29  ;;  %5951 = vmatprep.mubr.msk.bf16.mxu0 %vm6692_vm0, %v10870_v54  ;;  %v2012_v42 = vshrl.u32 %v347_v53, 16  ;;  %v2015_v3 = vshll.u32 %v347_v53, 16  ;;  %v6540_v29 = vld [vmem:[%s10777_s1 + $0x198] sm:$0xff]   ;;  %v370_v53 = vrot.slane %v7113_v24, 1  ;;  %v2002_v43 = vrot.slane %v2000_v5, 2 }
  0xe1   : > { %4030 = vmatprep.subr.bf16.mxu0 %v10869_v25  ;;  %v2022_v31 = vrot.slane %v2020_v40, 2  ;;  %v2109_v52 = vor.u32 %v2108_v20, %v2105_v45  ;;  %v2130_v40 = vrot.slane %v2128_v9, 3  ;;  %v521_v58 = vsel %vm506_vm4, %v518_v35, %v520_v41 }
  0xe2   : > { %v2014_v47 = vrot.slane %v2012_v42, 2  ;;  %v2009_v34 = vor.u32 %v2008_v48, %v2007_v63  ;;  %v2147_v4 = vshrl.u32 %v521_v58, 16  ;;  %v2150_v57 = vshll.u32 %v521_v58, 16  ;;  %v10892_v63 = vld [vmem:[#allocation7_spill] sm:$0xff] }
  0xe3   : > { %v2026_v14 = vor.u32 %v2025_v36, %v2022_v31  ;;  %v2045_v31 = vrot.slane %v6978_v56, 2  ;;  %v2046_v36 = vrot.slane %v6975_v55, 3  ;;  %v6545_v56 = vld [vmem:[%s10777_s1 + $0x1c0] sm:$0xff]   ;;  %v386_v48 = vrot.slane %v10892_v63, 1 }
  0xe4   : > { %4031 = vmatpush1.bf16.msra.mxu0 %v6530_v28  ;;  %v2017_v28 = vrot.slane %v2015_v3, 3  ;;  %v2127_v3 = vrot.slane %v2125_v60, 2  ;;  %v6548_v55 = vld [vmem:[%s10777_s1 + $0x200] sm:$0xff]   ;;  %v2068_v58 = vrot.slane %v7052_v39, 3  ;;  %v6547_v39 = vld [vmem:[%s10777_s1 + $0x1d0] sm:$0xff]  }
  0xe5   : > { %4032 = vmatprep.subr.bf16.mxu0 %v10869_v25 }
  0xe6   : > { %1775 = vmatmul.mubr.bf16.gmra.mrb[72].mxu1 %v1345_v7  ;;  %v2003_v7 = vshll.u32 %v5460_v37, 16 }
  0xe7   : > { %5952 = vmatmul.mubr.bf16.gmra.mrb[88].mxu0 %v2066_v46  ;;  %1782 = vmatprep.mubr.bf16.mxu1 %v1381_v32  ;;  %v2018_v46 = vor.u32 %v2017_v28, %v2014_v47  ;;  %v2050_v32 = vshrl.u32 %v363_v0, 16  ;;  %v374_v47 = vor.u32 %v7116_v15, %v370_v53  ;;  %v378_v28 = vrot.slane %v7164_v33, 1 }
  0xe8   : > { %5955 = vmatprep.mubr.msk.bf16.mxu0 %vm6692_vm0, %v10870_v54  ;;  %4033 = vmatpush1.bf16.msra.mxu0 %v6536_v2  ;;  %v366_v2 = vor.u32 %v7055_v12, %v362_v49  ;;  %v2005_v42 = vrot.slane %v2003_v7, 3  ;;  %v2131_v49 = vor.u32 %v2130_v40, %v2127_v3  ;;  %v6551_v3 = vld [vmem:[%s10777_s1 + $0x208] sm:$0xff]  }
  0xe9   : > { %4034 = vmatprep.subr.bf16.mxu0 %v10869_v25  ;;  %v2027_v19 = vsel %vm1998_vm5, %v2018_v46, %v2026_v14  ;;  %v523_v46 = vsel %vm506_vm4, %v520_v41, %v522_v11  ;;  %v379_v9 = vsel %vm335_vm6, %v374_v47, %v378_v28 }
  0xea   : > { %v371_v62 = vsel %vm335_vm6, %v366_v2, %v370_v53  ;;  %v2006_v35 = vor.u32 %v2005_v42, %v2002_v43  ;;  %v2132_v7 = vsel %vm1998_vm5, %v2109_v52, %v2131_v49  ;;  %v2169_v41 = vshrl.u32 %v523_v46, 16  ;;  %v6546_v42 = vld [vmem:[%s10777_s1 + $0x1c8] sm:$0xff]  }
  0xeb   : > { %v2072_v45 = vshrl.u32 %v371_v62, 16  ;;  %v2075_v20 = vshll.u32 %v371_v62, 16  ;;  %v2094_v2 = vshrl.u32 %v379_v9, 16  ;;  %v2097_v53 = vshll.u32 %v379_v9, 16  ;;  %v6561_v9 = vld [vmem:[%s10777_s1 + $0x218] sm:$0xff]  }
  0xec   : > { %4035 = vmatpush1.bf16.msra.mxu0 %v6540_v29  ;;  %v2052_v29 = vrot.slane %v2050_v32, 2  ;;  %v2010_v0 = vsel %vm1998_vm5, %v2006_v35, %v2009_v34  ;;  %v2047_v32 = vor.u32 %v2046_v36, %v2045_v31  ;;  %v6549_v31 = vld [vmem:[%s10777_s1 + $0x1d8] sm:$0xff]   ;;  %v10894_v36 = vld [vmem:[#allocation6_spill] sm:$0xff] }
  0xed   : > { %4036 = vmatprep.subr.bf16.mxu0 %v10869_v25  ;;  %v2074_v18 = vrot.slane %v2072_v45, 2  ;;  %v2077_v5 = vrot.slane %v2075_v20, 3 }
  0xee   : > { %1783 = vmatmul.mubr.bf16.gmra.mrb[76].mxu1 %v1372_v1  ;;  %v2055_v1 = vrot.slane %v2053_v21, 3  ;;  %v2172_v21 = vshll.u32 %v523_v46, 16  ;;  %v2048_v40 = vsel %vm1998_vm5, %v2009_v34, %v2047_v32 }
  0xef   : > { %5956 = vmatmul.mubr.bf16.gmra.mrb[92].mxu0 %v2088_v13  ;;  %1790 = vmatprep.mubr.bf16.mxu1 %v1380_v17  ;;  %v2110_v17 = vsel %vm1998_vm5, %v2087_v10, %v2109_v52  ;;  %v6543_v10 = vld [vmem:[%s10777_s1 + $0x1b0] sm:$0xff]   ;;  %v2149_v13 = vrot.slane %v2147_v4, 2  ;;  %v2099_v4 = vrot.slane %v2097_v53, 3  ;;  %v6550_v53 = vld [vmem:[%s10777_s1 + $0x1e0] sm:$0xff]  }
  0xf0   : > { %5959 = vmatprep.mubr.msk.bf16.mxu0 %vm6692_vm0, %v10870_v54  ;;  %4037 = vmatpush1.bf16.msra.mxu0 %v6541_v44  ;;  %v2056_v37 = vor.u32 %v2055_v1, %v2052_v29  ;;  %v2152_v44 = vrot.slane %v2150_v57, 3  ;;  %v2171_v1 = vrot.slane %v2169_v41, 2  ;;  %v2174_v62 = vrot.slane %v2172_v21, 3 }
  0xf1   : > { %4038 = vmatprep.subr.bf16.mxu0 %v10869_v25 }
  0xf2   : > { %v2057_v60 = vsel %vm1998_vm5, %v2026_v14, %v2056_v37  ;;  %v7800_v52 = vor.u32 %v2152_v44, %v2149_v13  ;;  %v7802_v14 = vor.u32 %v2077_v5, %v2074_v18  ;;  %v390_v13 = vor.u32 %v10894_v36, %v386_v48  ;;  %v10895_v44 = vld [vmem:[#allocation8_spill] sm:$0xff] }
  0xf4   : > { %4039 = vmatpush1.bf16.msra.mxu0 %v6542_v16  ;;  %v524_v16 = vrot.slane %v7329_v8, 1  ;;  %v2067_v8 = vrot.slane %v7055_v12, 2  ;;  %v2079_v29 = vsel %vm1998_vm5, %v2056_v37, %v7802_v14  ;;  %v6555_v12 = vld [vmem:[%s10777_s1 + $0x210] sm:$0xff]  }
  0xf5   : > { %4040 = vmatprep.subr.bf16.mxu0 %v10869_v25 }
  0xf6   : > { %1791 = vmatmul.mubr.bf16.gmra.mrb[80].mxu1 %v7732_v30  ;;  %v6544_v30 = vld [vmem:[%s10777_s1 + $0x1b8] sm:$0xff]   ;;  %v525_v57 = vsel %vm506_vm4, %v522_v11, %v524_v16  ;;  %v2069_v35 = vor.u32 %v2068_v58, %v2067_v8 }
  0xf7   : > { %5960 = vmatmul.mubr.bf16.gmra.mrb[96].mxu0 %v2110_v17  ;;  %2702 = vmatprep.mubr.bf16.mxu1 %v2027_v19  ;;  %v10891_v17 = vld [vmem:[#allocation5_spill] sm:$0xff]  ;;  %v2154_v19 = vsel %vm1998_vm5, %v2131_v49, %v7800_v52  ;;  %v10893_v49 = vld [vmem:[#allocation14_spill] sm:$0xff]  ;;  %v2191_v20 = vshrl.u32 %v525_v57, 16  ;;  %v2194_v37 = vshll.u32 %v525_v57, 16 }
  0xf8   : > { %5963 = vmatprep.mubr.msk.bf16.mxu0 %vm6692_vm0, %v10870_v54  ;;  %4041 = vmatpush1.bf16.msra.mxu0 %v6543_v10  ;;  %v382_v43 = vor.u32 %v10891_v17, %v378_v28  ;;  %v2096_v10 = vrot.slane %v2094_v2, 2  ;;  %v526_v45 = vrot.slane %v10893_v49, 1  ;;  %v2175_v28 = vor.u32 %v2174_v62, %v2171_v1  ;;  %v10898_v62 = vld [vmem:[#allocation11_spill] sm:$0xff] }
  0xf9   : > { %4042 = vmatprep.subr.bf16.mxu0 %v10869_v25  ;;  %v2070_v5 = vsel %vm1998_vm5, %v2047_v32, %v2069_v35  ;;  %v2196_v41 = vrot.slane %v2194_v37, 3 }
  0xfa   : > { %v387_v34 = vsel %vm335_vm6, %v382_v43, %v386_v48  ;;  %v527_v46 = vsel %vm506_vm4, %v524_v16, %v526_v45 }
  0xfb   : > { %v2116_v11 = vshrl.u32 %v387_v34, 16  ;;  %v2119_v47 = vshll.u32 %v387_v34, 16 }
  0xfc   : > { %4043 = vmatpush1.bf16.msra.mxu0 %v6544_v30  ;;  %v2100_v30 = vor.u32 %v2099_v4, %v2096_v10  ;;  %v402_v10 = vrot.slane %v10898_v62, 1  ;;  %v6552_v4 = vld [vmem:[%s10777_s1 + $0x1e8] sm:$0xff]  }
  0xfd   : > { %4044 = vmatprep.subr.bf16.mxu0 %v10869_v25  ;;  %v2118_v21 = vrot.slane %v2116_v11, 2  ;;  %v2121_v2 = vrot.slane %v2119_v47, 3 }
  0xfe   : > { %2703 = vmatmul.mubr.bf16.vlgmr.msra.gmra.mrb[84].mxu1 %v2010_v0  ;;  %v394_v0 = vrot.slane %v10895_v44, 1 }
  0xff   : > { %5964 = vmatmul.mubr.bf16.gmra.mrb[100].mxu0 %v2132_v7  ;;  %2710 = vmatprep.mubr.bf16.mxu1 %v2057_v60  ;;  %v2089_v7 = vrot.slane %v7116_v15, 2  ;;  %v2090_v60 = vrot.slane %v7113_v24, 3  ;;  %v2176_v24 = vsel %vm1998_vm5, %v7800_v52, %v2175_v28  ;;  %v2101_v15 = vsel %vm1998_vm5, %v7802_v14, %v2100_v30 }
 0x100   : > { %5967 = vmatprep.mubr.msk.bf16.mxu0 %vm6692_vm0, %v10870_v54  ;;  %4045 = vmatpush1.bf16.msra.mxu0 %v6545_v56  ;;  %v395_v43 = vsel %vm335_vm6, %v390_v13, %v394_v0  ;;  %v2122_v14 = vor.u32 %v2121_v2, %v2118_v21  ;;  %v10899_v21 = vld [vmem:[#allocation10_spill] sm:$0xff] }
 0x101   : > { %4046 = vmatprep.subr.bf16.mxu0 %v10869_v25  ;;  %6139 = vmatpush3.bf16.msra.mxu1 %v6548_v55  ;;  %v2193_v55 = vrot.slane %v2191_v20, 2  ;;  %v7866_v48 = vor.u32 %v2090_v60, %v2089_v7  ;;  %v2138_v58 = vshrl.u32 %v395_v43, 16  ;;  %v406_v2 = vor.u32 %v10899_v21, %v402_v10 }
 0x102   : > { %6132 = vmatprep.subr.bf16.mxu1 %v10870_v54 }
 0x103   : > { %v2197_v52 = vor.u32 %v2196_v41, %v2193_v55  ;;  %v2092_v34 = vsel %vm1998_vm5, %v2069_v35, %v7866_v48  ;;  %v530_v55 = vrot.slane %v7460_v27, 1  ;;  %v6556_v41 = vld [vmem:[%s10777_s1 + $0x1f8] sm:$0xff]  }
 0x104   : > { %4047 = vmatpush1.bf16.msra.mxu0 %v6546_v42  ;;  %v2213_v42 = vshrl.u32 %v527_v46, 16 }
 0x105   : > { %4048 = vmatprep.subr.bf16.mxu0 %v10869_v25  ;;  %6140 = vmatpush3.bf16.msra.mxu1 %v6551_v3  ;;  %v2216_v3 = vshll.u32 %v527_v46, 16  ;;  %v2198_v37 = vsel %vm1998_vm5, %v2175_v28, %v2197_v52 }
 0x106   : > { %2711 = vmatmul.mubr.bf16.gmra.mrb[88].mxu1 %v2048_v40  ;;  %6133 = vmatprep.subr.bf16.mxu1 %v10870_v54  ;;  %v10896_v40 = vld [vmem:[#allocation17_spill] sm:$0xff]  ;;  %v2215_v11 = vrot.slane %v2213_v42, 2 }
 0x107   : > { %5968 = vmatmul.mubr.bf16.gmra.mrb[104].mxu0 %v2154_v19  ;;  %2718 = vmatprep.mubr.bf16.mxu1 %v2079_v29  ;;  %v528_v8 = vrot.slane %v10896_v40, 1  ;;  %v2141_v19 = vshll.u32 %v395_v43, 16  ;;  %v10897_v29 = vld [vmem:[#allocation9_spill] sm:$0xff]  ;;  %v2218_v47 = vrot.slane %v2216_v3, 3  ;;  %v2134_v43 = vrot.slane %v10892_v63, 3 }
 0x108   : > { %5971 = vmatprep.mubr.msk.bf16.mxu0 %vm6692_vm0, %v10870_v54  ;;  %4049 = vmatpush1.bf16.msra.mxu0 %v6547_v39  ;;  %v398_v1 = vor.u32 %v10897_v29, %v394_v0  ;;  %v2111_v39 = vrot.slane %v10891_v17, 2  ;;  %v2123_v0 = vsel %vm1998_vm5, %v2100_v30, %v2122_v14  ;;  %v6566_v3 = vld [vmem:[%s10777_s1 + $0x228] sm:$0xff]  }
 0x109   : > { %4050 = vmatprep.subr.bf16.mxu0 %v10869_v25  ;;  %6141 = vmatpush3.bf16.msra.mxu1 %v6555_v12  ;;  %v2112_v12 = vrot.slane %v7164_v33, 3  ;;  %v2143_v7 = vrot.slane %v2141_v19, 3  ;;  %v6554_v33 = vld [vmem:[%s10777_s1 + $0x1f0] sm:$0xff]  }
 0x10a   : > { %v7843_v18 = vpop.f32.mrb[0].mxu0  ;;  %6134 = vmatprep.subr.bf16.mxu1 %v10870_v54  ;;  %v403_v35 = vsel %vm335_vm6, %v398_v1, %v402_v10  ;;  %v531_v10 = vsel %vm506_vm4, %v528_v8, %v530_v55 }
 0x10b   : > { %v5849_v56 = vpop.f32.mrb[1].mxu0  ;;  %v2113_v30 = vor.u32 %v2112_v12, %v2111_v39  ;;  %v2160_v60 = vshrl.u32 %v403_v35, 16  ;;  %v2163_v46 = vshll.u32 %v403_v35, 16  ;;  %v2260_v12 = vshll.u32 %v531_v10, 16 }
 0x10c   : > { %v7855_v32 = vpop.f32.mrb[2].mxu0  ;;  %4051 = vmatpush1.bf16.msra.mxu0 %v6549_v31  ;;  %v529_v31 = vsel %vm506_vm4, %v526_v45, %v528_v8  ;;  %v6565_v45 = vld [vmem:[%s10777_s1 + $0x220] sm:$0xff]   ;;  %v2257_v8 = vshrl.u32 %v531_v10, 16  ;;  %v10905_v10 = vld [vmem:[#allocation18_spill] sm:$0xff] }
 0x10d   : > { %v5850_v16 = vpop.f32.mrb[3].mxu0  ;;  %4052 = vmatprep.subr.bf16.mxu0 %v10869_v25  ;;  %6142 = vmatpush3.bf16.msra.mxu1 %v6561_v9  ;;  %v2235_v49 = vshrl.u32 %v529_v31, 16  ;;  %v2238_v28 = vshll.u32 %v529_v31, 16  ;;  %v2219_v9 = vor.u32 %v2218_v47, %v2215_v11  ;;  %v2165_v19 = vrot.slane %v2163_v46, 3  ;;  %v10901_v47 = vld [vmem:[#allocation13_spill] sm:$0xff] }
 0x10e   : > { %2719 = vmatmul.mubr.bf16.gmra.mrb[92].mxu1 %v2070_v5  ;;  %6135 = vmatprep.subr.bf16.mxu1 %v10870_v54  ;;  %v2140_v5 = vrot.slane %v2138_v58, 2  ;;  %v2133_v16 = vrot.slane %v10894_v36, 2  ;;  %v2114_v58 = vsel %vm1998_vm5, %v7866_v48, %v2113_v30 }
 0x10f   : > { %5972 = vmatmul.mubr.bf16.gmra.mrb[108].mxu0 %v2176_v24  ;;  %2726 = vmatprep.mubr.bf16.mxu1 %v2101_v15  ;;  %v10900_v24 = vld [vmem:[#allocation12_spill] sm:$0xff]  ;;  %v2237_v42 = vrot.slane %v2235_v49, 2  ;;  %v2240_v27 = vrot.slane %v2238_v28, 3  ;;  %v2220_v36 = vsel %vm1998_vm5, %v2197_v52, %v2219_v9  ;;  %v6568_v52 = vld [vmem:[%s10777_s1 + $0x230] sm:$0xff]  }
 0x110   : > { %5975 = vmatprep.mubr.msk.bf16.mxu0 %vm6692_vm0, %v10870_v54  ;;  %4053 = vmatpush1.bf16.msra.mxu0 %v6550_v53  ;;  %v2144_v56 = vor.u32 %v2143_v7, %v2140_v5  ;;  %v410_v15 = vrot.slane %v10900_v24, 1  ;;  %v2135_v39 = vor.u32 %v2134_v43, %v2133_v16 }
 0x111   : > { %4054 = vmatprep.subr.bf16.mxu0 %v10869_v25  ;;  %6143 = vmatpush3.bf16.msra.mxu1 %v6565_v45  ;;  %v7925_v48 = vor.u32 %v2240_v27, %v2237_v42 }
 0x112   : > { %v7878_v57 = vpop.f32.mrb[4].mxu0  ;;  %6136 = vmatprep.subr.bf16.mxu1 %v10870_v54  ;;  %v2145_v63 = vsel %vm1998_vm5, %v2122_v14, %v2144_v56  ;;  %v414_v31 = vor.u32 %v10901_v47, %v410_v15  ;;  %v2136_v35 = vsel %vm1998_vm5, %v2113_v30, %v2135_v39 }
 0x113   : > { %v5853_v20 = vpop.f32.mrb[5].mxu0  ;;  %v2242_v28 = vsel %vm1998_vm5, %v2219_v9, %v7925_v48 }
 0x114   : > { %v7888_v13 = vpop.f32.mrb[6].mxu0  ;;  %4055 = vmatpush1.bf16.msra.mxu0 %v6552_v4  ;;  %v532_v20 = vrot.slane %v7496_v51, 1  ;;  %v6569_v51 = vld [vmem:[%s10777_s1 + $0x238] sm:$0xff]  }
 0x115   : > { %v5854_v17 = vpop.f32.mrb[7].mxu0  ;;  %4056 = vmatprep.subr.bf16.mxu0 %v10869_v25  ;;  %6144 = vmatpush3.bf16.msra.mxu1 %v6566_v3  ;;  %v10903_v3 = vld [vmem:[#allocation24_spill] sm:$0xff] }
 0x116   : > { %2727 = vmatmul.mubr.bf16.gmra.mrb[96].mxu1 %v2092_v34  ;;  %v411_v34 = vsel %vm335_vm6, %v406_v2, %v410_v15  ;;  %6137 = vmatprep.subr.bf16.mxu1 %v10870_v54  ;;  %v2156_v17 = vrot.slane %v10895_v44, 3  ;;  %v533_v46 = vsel %vm506_vm4, %v530_v55, %v532_v20 }
 0x117   : > { %5976 = vmatmul.mubr.bf16.gmra.mrb[112].mxu0 %v2198_v37  ;;  %2734 = vmatprep.mubr.bf16.mxu1 %v2123_v0  ;;  %v2182_v37 = vshrl.u32 %v411_v34, 16  ;;  %v2185_v11 = vshll.u32 %v411_v34, 16  ;;  %v10902_v0 = vld [vmem:[#allocation15_spill] sm:$0xff]  ;;  %v2279_v16 = vshrl.u32 %v533_v46, 16  ;;  %v2282_v43 = vshll.u32 %v533_v46, 16 }
 0x118   : > { %5979 = vmatprep.mubr.msk.bf16.mxu0 %vm6692_vm0, %v10870_v54  ;;  %4057 = vmatpush1.bf16.msra.mxu0 %v6554_v33  ;;  %v418_v5 = vrot.slane %v10902_v0, 1  ;;  %v2155_v33 = vrot.slane %v10897_v29, 2  ;;  %v2262_v29 = vrot.slane %v2260_v12, 3 }
 0x119   : > { %4058 = vmatprep.subr.bf16.mxu0 %v10869_v25  ;;  %v2162_v25 = vrot.slane %v2160_v60, 2  ;;  %6145 = vmatpush3.bf16.msra.mxu1 %v6568_v52  ;;  %v2259_v60 = vrot.slane %v2257_v8, 2  ;;  %v2187_v44 = vrot.slane %v2185_v11, 3  ;;  %v2281_v12 = vrot.slane %v2279_v16, 2 }
 0x11a   : > { %v7908_v53 = vpop.f32.mrb[8].mxu0  ;;  %6138 = vmatprep.subr.bf16.mxu1 %v10870_v54  ;;  %v419_v2 = vsel %vm335_vm6, %v414_v31, %v418_v5  ;;  %v2157_v9 = vor.u32 %v2156_v17, %v2155_v33 }
 0x11b   : > { %v5857_v40 = vpop.f32.mrb[9].mxu0  ;;  %v2166_v14 = vor.u32 %v2165_v19, %v2162_v25  ;;  %v2204_v42 = vshrl.u32 %v419_v2, 16  ;;  %v2263_v55 = vor.u32 %v2262_v29, %v2259_v60  ;;  %v2177_v25 = vrot.slane %v10899_v21, 2 }
 0x11c   : > { %v7918_v1 = vpop.f32.mrb[10].mxu0  ;;  %4059 = vmatpush1.bf16.msra.mxu0 %v6556_v41  ;;  %v2184_v41 = vrot.slane %v2182_v37, 2  ;;  %v534_v40 = vrot.slane %v10903_v3, 1  ;;  %v2178_v19 = vrot.slane %v10898_v62, 3  ;;  %v2284_v37 = vrot.slane %v2282_v43, 3 }
 0x11d   : > { %v5858_v4 = vpop.f32.mrb[11].mxu0  ;;  %6031 = vmatprep.subr.bf16.mxu0 %v10870_v54  ;;  %v2167_v45 = vsel %vm1998_vm5, %v2144_v56, %v2166_v14  ;;  %6146 = vmatpush3.bf16.msra.mxu1 %v6569_v51  ;;  %v2207_v56 = vshll.u32 %v419_v2, 16  ;;  %v2206_v33 = vrot.slane %v2204_v42, 2  ;;  %v10907_v2 = vld [vmem:[#allocation20_spill] sm:$0xff] }
 0x11e   : > { %2735 = vmatmul.mubr.bf16.gmra.mrb[100].mxu1 %v2114_v58  ;;  %v2188_v27 = vor.u32 %v2187_v44, %v2184_v41  ;;  %v426_v4 = vrot.slane %v10905_v10, 1  ;;  %v536_v41 = vrot.slane %v7560_v59, 1 }
 0x11f   : > { %5980 = vmatmul.mubr.bf16.gmra.mrb[116].mxu0 %v2220_v36  ;;  %2742 = vmatprep.mubr.bf16.mxu1 %v2145_v63  ;;  %v10904_v36 = vld [vmem:[#allocation16_spill] sm:$0xff]  ;;  %v2209_v21 = vrot.slane %v2207_v56, 3 }
 0x120   : > { %5983 = vmatprep.mubr.msk.bf16.mxu0 %vm6692_vm0, %v10870_v54  ;;  %v422_v63 = vor.u32 %v10904_v36, %v418_v5  ;;  %v2189_v51 = vsel %vm1998_vm5, %v2166_v14, %v2188_v27 }
 0x122   : > { %v7936_v7 = vpop.f32.mrb[12].mxu0  ;;  %v427_v60 = vsel %vm335_vm6, %v422_v63, %v426_v4 }
 0x123   : > { %v5861_v49 = vpop.f32.mrb[13].mxu0  ;;  %v2229_v14 = vshll.u32 %v427_v60, 16 }
 0x124   : > { %v7949_v30 = vpop.f32.mrb[14].mxu0  ;;  %v535_v49 = vsel %vm506_vm4, %v532_v20, %v534_v40  ;;  %v10906_v20 = vld [vmem:[#allocation19_spill] sm:$0xff] }
 0x125   : > { %v5862_v15 = vpop.f32.mrb[15].mxu0  ;;  %v2301_v46 = vshrl.u32 %v535_v49, 16  ;;  %v2304_v29 = vshll.u32 %v535_v49, 16  ;;  %v430_v44 = vor.u32 %v10906_v20, %v426_v4  ;;  %v2221_v49 = vrot.slane %v10904_v36, 2 }
 0x126   : > { %2743 = vmatmul.mubr.bf16.gmra.mrb[104].mxu1 %v2136_v35  ;;  %v2158_v35 = vsel %vm1998_vm5, %v2135_v39, %v2157_v9  ;;  %v7975_v39 = vor.u32 %v2284_v37, %v2281_v12  ;;  %v434_v15 = vrot.slane %v10907_v2, 1 }
 0x127   : > { %5984 = vmatmul.mubr.bf16.gmra.mrb[120].mxu0 %v2242_v28  ;;  %2750 = vmatprep.mubr.bf16.mxu1 %v2167_v45  ;;  %v2179_v45 = vor.u32 %v2178_v19, %v2177_v25  ;;  %v2200_v25 = vrot.slane %v10900_v24, 3  ;;  %v2306_v12 = vrot.slane %v2304_v29, 3 }
 0x128   : > { %5987 = vmatprep.mubr.msk.bf16.mxu0 %vm6692_vm0, %v10870_v54  ;;  %v2286_v59 = vsel %vm1998_vm5, %v2263_v55, %v7975_v39 }
 0x129   : > { %v1632_v58 = vpop.f32.mrb[0].mxu1  ;;  %v2180_v43 = vsel %vm1998_vm5, %v2157_v9, %v2179_v45  ;;  %v537_v9 = vsel %vm506_vm4, %v534_v40, %v536_v41 }
 0x12a   : > { %v7960_v34 = vadd.f32 %v7843_v18, %v1632_v58  ;;  %v7962_v52 = vpop.f32.mrb[16].mxu0  ;;  %v1634_v8 = vpop.f32.mrb[1].mxu1  ;;  %v2264_v18 = vsel %vm1998_vm5, %v7925_v48, %v2263_v55  ;;  %v2226_v48 = vshrl.u32 %v427_v60, 16  ;;  %v2199_v58 = vrot.slane %v10901_v47, 2 }
 0x12b   : > { %v5865_v11 = vpop.f32.mrb[17].mxu0  ;;  %v1635_v31 = vpop.f32.mrb[2].mxu1  ;;  %v2303_v8 = vrot.slane %v2301_v46, 2  ;;  %v2231_v55 = vrot.slane %v2229_v14, 3  ;;  %v435_v47 = vsel %vm335_vm6, %v430_v44, %v434_v15  ;;  %v2323_v24 = vshrl.u32 %v537_v9, 16  ;;  %v10909_v46 = vld [vmem:[#allocation22_spill] sm:$0xff] }
 0x12c   : > { %v7966_v62 = vadd.f32 %v7855_v32, %v1635_v31  ;;  %v7968_v5 = vpop.f32.mrb[18].mxu0  ;;  %v1637_v17 = vpop.f32.mrb[3].mxu1  ;;  %v2210_v32 = vor.u32 %v2209_v21, %v2206_v33  ;;  %v2228_v31 = vrot.slane %v2226_v48, 2  ;;  %v2326_v33 = vshll.u32 %v537_v9, 16 }
 0x12d   : > { %v5866_v28 = vpop.f32.mrb[19].mxu0  ;;  %v2248_v21 = vshrl.u32 %v435_v47, 16  ;;  %v538_v17 = vrot.slane %v7587_v6, 1  ;;  %v442_v29 = vrot.slane %v10909_v46, 1 }
 0x12e   : > { %2751 = vmatmul.mubr.bf16.gmra.mrb[108].mxu1 %v2158_v35  ;;  %v2211_v4 = vsel %vm1998_vm5, %v2188_v27, %v2210_v32  ;;  %v2201_v27 = vor.u32 %v2200_v25, %v2199_v58  ;;  %v2232_v40 = vor.u32 %v2231_v55, %v2228_v31  ;;  %v10908_v28 = vld [vmem:[#allocation21_spill] sm:$0xff]  ;;  %v10910_v55 = vld [vmem:[#allocation23_spill] sm:$0xff] }
 0x12f   : > { %5988 = vmatmul.mubr.bf16.gmra.mrb[124].mxu0 %v2264_v18  ;;  %2758 = vmatprep.mubr.bf16.mxu1 %v2189_v51  ;;  %v2251_v18 = vshll.u32 %v435_v47, 16  ;;  %v438_v60 = vor.u32 %v10908_v28, %v434_v15  ;;  %v2250_v25 = vrot.slane %v2248_v21, 2  ;;  %v446_v47 = vor.u32 %v10910_v55, %v442_v29 }
 0x130   : > { %5991 = vmatprep.mubr.msk.bf16.mxu0 %vm6692_vm0, %v10870_v54  ;;  %v2202_v6 = vsel %vm1998_vm5, %v2179_v45, %v2201_v27  ;;  %v2243_v21 = vrot.slane %v10906_v20, 2 }
 0x131   : > { %v1640_v16 = vpop.f32.mrb[4].mxu1  ;;  %v2253_v36 = vrot.slane %v2251_v18, 3  ;;  %v2244_v18 = vrot.slane %v10905_v10, 3 }
 0x132   : > { %v7984_v42 = vadd.f32 %v7878_v57, %v1640_v16  ;;  %v7986_v56 = vpop.f32.mrb[20].mxu0  ;;  %v1642_v3 = vpop.f32.mrb[5].mxu1  ;;  %v2222_v16 = vrot.slane %v10902_v0, 3  ;;  %v539_v0 = vsel %vm506_vm4, %v536_v41, %v538_v17 }
 0x133   : > { %v5869_v19 = vpop.f32.mrb[21].mxu0  ;;  %v1643_v63 = vpop.f32.mrb[6].mxu1  ;;  %v2328_v3 = vrot.slane %v2326_v33, 3  ;;  %v2348_v31 = vshll.u32 %v539_v0, 16 }
 0x134   : > { %v7995_v57 = vadd.f32 %v7888_v13, %v1643_v63  ;;  %v7997_v37 = vpop.f32.mrb[22].mxu0  ;;  %v1645_v11 = vpop.f32.mrb[7].mxu1  ;;  %v2307_v13 = vor.u32 %v2306_v12, %v2303_v8  ;;  %v443_v12 = vsel %vm335_vm6, %v438_v60, %v442_v29  ;;  %v2223_v45 = vor.u32 %v2222_v16, %v2221_v49 }
 0x135   : > { %v5870_v35 = vpop.f32.mrb[23].mxu0  ;;  %v2345_v11 = vshrl.u32 %v539_v0, 16  ;;  %v2273_v41 = vshll.u32 %v443_v12, 16  ;;  %v2350_v20 = vrot.slane %v2348_v31, 3 }
 0x136   : > { %2759 = vmatmul.mubr.bf16.gmra.mrb[112].mxu1 %v2180_v43  ;;  %v2325_v43 = vrot.slane %v2323_v24, 2  ;;  %v10911_v35 = vld [vmem:[#allocation26_spill] sm:$0xff]  ;;  %v2224_v60 = vsel %vm1998_vm5, %v2201_v27, %v2223_v45 }
 0x137   : > { %5992 = vmatmul.mubr.bf16.gmra.mrb[128].mxu0 %v2286_v59  ;;  %2766 = vmatprep.mubr.bf16.mxu1 %v2211_v4  ;;  %v2233_v4 = vsel %vm1998_vm5, %v2210_v32, %v2232_v40  ;;  %v2270_v32 = vshrl.u32 %v443_v12, 16  ;;  %v450_v24 = vrot.slane %v10911_v35, 1  ;;  %v2275_v27 = vrot.slane %v2273_v41, 3 }
 0x138   : > { %5995 = vmatprep.mubr.msk.bf16.mxu0 %vm6692_vm0, %v10870_v54  ;;  %v8023_v9 = vor.u32 %v2328_v3, %v2325_v43  ;;  %v2347_v3 = vrot.slane %v2345_v11, 2  ;;  %v10913_v11 = vld [vmem:[#allocation27_spill] sm:$0xff] }
 0x139   : > { %v1648_v51 = vpop.f32.mrb[8].mxu1  ;;  %v458_v31 = vrot.slane %v10913_v11, 1 }
 0x13a   : > { %v8007_v48 = vadd.f32 %v7908_v53, %v1648_v51  ;;  %v8009_v14 = vpop.f32.mrb[24].mxu0  ;;  %v1650_v44 = vpop.f32.mrb[9].mxu1  ;;  %v2308_v53 = vsel %vm1998_vm5, %v7975_v39, %v2307_v13  ;;  %v540_v39 = vrot.slane %v7607_v50, 1 }
 0x13b   : > { %v5873_v59 = vpop.f32.mrb[25].mxu0  ;;  %v1651_v58 = vpop.f32.mrb[10].mxu1  ;;  %v2330_v44 = vsel %vm1998_vm5, %v2307_v13, %v8023_v9 }
 0x13c   : > { %v8014_v15 = vadd.f32 %v7918_v1, %v1651_v58  ;;  %v8016_v19 = vpop.f32.mrb[26].mxu0  ;;  %v1653_v63 = vpop.f32.mrb[11].mxu1  ;;  %v8025_v1 = vor.u32 %v2253_v36, %v2250_v25  ;;  %v541_v10 = vsel %vm506_vm4, %v538_v17, %v540_v39  ;;  %v451_v25 = vsel %vm335_vm6, %v446_v47, %v450_v24 }
 0x13d   : > { %v5874_v8 = vpop.f32.mrb[27].mxu0  ;;  %v2245_v36 = vor.u32 %v2244_v18, %v2243_v21  ;;  %v2292_v63 = vshrl.u32 %v451_v25, 16  ;;  %v542_v17 = vrot.slane %v7637_v61, 1  ;;  %v2265_v61 = vrot.slane %v10908_v28, 2 }
 0x13e   : > { %2767 = vmatmul.mubr.bf16.gmra.mrb[116].mxu1 %v2202_v6  ;;  %v2255_v43 = vsel %vm1998_vm5, %v2232_v40, %v8025_v1  ;;  %v2272_v6 = vrot.slane %v2270_v32, 2  ;;  %v2370_v40 = vshll.u32 %v541_v10, 16  ;;  %v10912_v8 = vld [vmem:[#allocation25_spill] sm:$0xff]  ;;  %v2266_v18 = vrot.slane %v10907_v2, 3 }
 0x13f   : > { %5996 = vmatmul.mubr.bf16.gmra.mrb[132].mxu0 %v2308_v53  ;;  %2774 = vmatprep.mubr.bf16.mxu1 %v2233_v4  ;;  %v2367_v53 = vshrl.u32 %v541_v10, 16  ;;  %v2295_v4 = vshll.u32 %v451_v25, 16  ;;  %v454_v12 = vor.u32 %v10912_v8, %v450_v24  ;;  %v2246_v41 = vsel %vm1998_vm5, %v2223_v45, %v2245_v36 }
 0x140   : > { %5999 = vmatprep.mubr.msk.bf16.mxu0 %vm6692_vm0, %v10870_v54  ;;  %v2276_v0 = vor.u32 %v2275_v27, %v2272_v6  ;;  %v2294_v24 = vrot.slane %v2292_v63, 2 }
 0x141   : > { %v1656_v33 = vpop.f32.mrb[12].mxu1  ;;  %v459_v28 = vsel %vm335_vm6, %v454_v12, %v458_v31  ;;  %v2288_v12 = vrot.slane %v10909_v46, 3 }
 0x142   : > { %v8035_v51 = vadd.f32 %v7936_v7, %v1656_v33  ;;  %v8037_v49 = vpop.f32.mrb[28].mxu0  ;;  %v1658_v50 = vpop.f32.mrb[13].mxu1  ;;  %v2277_v2 = vsel %vm1998_vm5, %v8025_v1, %v2276_v0  ;;  %v2314_v25 = vshrl.u32 %v459_v28, 16  ;;  %v10914_v1 = vld [vmem:[#allocation28_spill] sm:$0xff] }
 0x143   : > { %v5877_v16 = vpop.f32.mrb[29].mxu0  ;;  %v1659_v29 = vpop.f32.mrb[14].mxu1  ;;  %v2369_v50 = vrot.slane %v2367_v53, 2  ;;  %v462_v53 = vor.u32 %v10914_v1, %v458_v31 }
 0x144   : > { %v8046_v7 = vadd.f32 %v7949_v30, %v1659_v29  ;;  %v8048_v59 = vpop.f32.mrb[30].mxu0  ;;  %v1661_v58 = vpop.f32.mrb[15].mxu1  ;;  %v2351_v30 = vor.u32 %v2350_v20, %v2347_v3  ;;  %v2372_v16 = vrot.slane %v2370_v40, 3  ;;  %v2297_v29 = vrot.slane %v2295_v4, 3 }
 0x145   : > { %v5878_v13 = vpop.f32.mrb[31].mxu0  ;;  %v2267_v58 = vor.u32 %v2266_v18, %v2265_v61  ;;  %v466_v40 = vrot.slane %v7595_v22, 1  ;;  %v2287_v4 = vrot.slane %v10910_v55, 2 }
 0x146   : > { %2775 = vmatmul.mubr.bf16.gmra.mrb[120].mxu1 %v2224_v60  ;;  %v2352_v3 = vsel %vm1998_vm5, %v8023_v9, %v2351_v30  ;;  %v2298_v27 = vor.u32 %v2297_v29, %v2294_v24  ;;  %v2317_v13 = vshll.u32 %v459_v28, 16  ;;  %v544_v9 = vrot.slane %v7661_v26, 1 }
 0x147   : > { %6000 = vmatmul.mubr.bf16.gmra.mrb[136].mxu0 %v2330_v44  ;;  %2782 = vmatprep.mubr.bf16.mxu1 %v2255_v43  ;;  %v543_v43 = vsel %vm506_vm4, %v540_v39, %v542_v17  ;;  %v2268_v18 = vsel %vm1998_vm5, %v2245_v36, %v2267_v58  ;;  %v467_v36 = vsel %vm335_vm6, %v462_v53, %v466_v40 }
 0x148   : > { %6003 = vmatprep.mubr.msk.bf16.mxu0 %vm6692_vm0, %v10870_v54  ;;  %v2389_v6 = vshrl.u32 %v543_v43, 16  ;;  %v2392_v39 = vshll.u32 %v543_v43, 16  ;;  %v2299_v55 = vsel %vm1998_vm5, %v2276_v0, %v2298_v27  ;;  %v2319_v46 = vrot.slane %v2317_v13, 3 }
 0x149   : > { %v1664_v32 = vpop.f32.mrb[16].mxu1  ;;  %v545_v43 = vsel %vm506_vm4, %v542_v17, %v544_v9  ;;  %v2336_v17 = vshrl.u32 %v467_v36, 16  ;;  %v474_v13 = vrot.slane %v7616_v38, 1 }
 0x14a   : > { %v8058_v47 = vadd.f32 %v7962_v52, %v1664_v32  ;;  %v8060_v33 = vpop.f32.mrb[32].mxu0  ;;  %v1666_v21 = vpop.f32.mrb[17].mxu1  ;;  %v226_v32 = vld [vmem:[%s6804_s26 + $0xa4] sm:$0x3]  ;;  %v2391_v26 = vrot.slane %v2389_v6, 2  ;;  %v2411_v28 = vshrl.u32 %v545_v43, 16 }
 0x14b   : > { %v5881_v60 = vpop.f32.mrb[33].mxu0  ;;  %v1667_v44 = vpop.f32.mrb[18].mxu1  ;;  %v2339_v6 = vshll.u32 %v467_v36, 16 }
 0x14c   : > { %v8066_v45 = vadd.f32 %v7968_v5, %v1667_v44  ;;  %v8068_v52 = vpop.f32.mrb[34].mxu0  ;;  %v1669_v20 = vpop.f32.mrb[19].mxu1  ;;  %v2373_v5 = vor.u32 %v2372_v16, %v2369_v50  ;;  %v2394_v50 = vrot.slane %v2392_v39, 3  ;;  %v2316_v16 = vrot.slane %v2314_v25, 2 }
 0x14d   : > { %v5882_v10 = vpop.f32.mrb[35].mxu0  ;;  %v470_v25 = vor.u32 %v7598_v23, %v466_v40  ;;  %v2310_v40 = vrot.slane %v10911_v35, 3 }
 0x14e   : > { %2783 = vmatmul.mubr.bf16.gmra.mrb[124].mxu1 %v2246_v41  ;;  %v2374_v44 = vsel %vm1998_vm5, %v2351_v30, %v2373_v5  ;;  %v2289_v30 = vor.u32 %v2288_v12, %v2287_v4  ;;  %v8102_v0 = vor.u32 %v2394_v50, %v2391_v26  ;;  %v2414_v10 = vshll.u32 %v545_v43, 16  ;;  %v8114_v4 = vld [vmem:[%s6804_s26 + $0x18] sm:$0xf]  ;;  %v3111_v50 = vld [vmem:[%s6804_s26 + $0x14] sm:$0xe] }
 0x14f   : > { %6004 = vmatmul.mubr.bf16.gmra.mrb[140].mxu0 %v2352_v3  ;;  %2790 = vmatprep.mubr.bf16.mxu1 %v2277_v2  ;;  %v8099_v3 = vld [vmem:[%s6804_s26 + $0xa0] sm:$0xf]  ;;  %v2309_v26 = vrot.slane %v10912_v8, 2  ;;  %v475_v35 = vsel %vm335_vm6, %v470_v25, %v474_v13 }
 0x150   : > { %6007 = vmatprep.mubr.msk.bf16.mxu0 %vm6692_vm0, %v10870_v54  ;;  %v5482_v20 = vcombine.low %v8099_v3, %v226_v32 }
 0x151   : > { %v1672_v63 = vpop.f32.mrb[20].mxu1  ;;  %v2311_v36 = vor.u32 %v2310_v40, %v2309_v26 }
 0x152   : > { %v8084_v41 = vadd.f32 %v7986_v56, %v1672_v63  ;;  %v8086_v21 = vpop.f32.mrb[36].mxu0  ;;  %v1674_v61 = vpop.f32.mrb[21].mxu1  ;;  %v8108_v39 = vrot.slane %v5482_v20, 1  ;;  %v2290_v63 = vsel %vm1998_vm5, %v2267_v58, %v2289_v30  ;;  %v2332_v20 = vrot.slane %v10913_v11, 3  ;;  %v8146_v11 = vld [vmem:[%s6804_s26 + $0x1c] sm:$0xff]  }
 0x153   : > { %v5885_v31 = vpop.f32.mrb[37].mxu0  ;;  %v1675_v60 = vpop.f32.mrb[22].mxu1 }
 0x154   : > { %v8092_v24 = vadd.f32 %v7997_v37, %v1675_v60  ;;  %v8094_v56 = vpop.f32.mrb[38].mxu0  ;;  %v1677_v29 = vpop.f32.mrb[23].mxu1  ;;  %v8104_v37 = vor.u32 %v2319_v46, %v2316_v16  ;;  %v547_v8 = vsel %vm506_vm4, %v544_v9, %v8108_v39 }
 0x155   : > { %v5886_v2 = vpop.f32.mrb[39].mxu0 }
 0x156   : > { %2791 = vmatmul.mubr.bf16.gmra.mrb[128].mxu1 %v2268_v18  ;;  %v2396_v18 = vsel %vm1998_vm5, %v2373_v5, %v8102_v0  ;;  %v2321_v58 = vsel %vm1998_vm5, %v2298_v27, %v8104_v37  ;;  %v2341_v5 = vrot.slane %v2339_v6, 3  ;;  %v2331_v27 = vrot.slane %v10914_v1, 2  ;;  %v10917_v1 = vld [vmem:[#allocation30_spill] sm:$0xff] }
 0x157   : > { %6008 = vmatmul.mubr.bf16.gmra.mrb[144].mxu0 %v2374_v44  ;;  %2798 = vmatprep.mubr.bf16.mxu1 %v2299_v55  ;;  %v2413_v44 = vrot.slane %v2411_v28, 2  ;;  %v2416_v55 = vrot.slane %v2414_v10, 3  ;;  %v2433_v2 = vshrl.u32 %v547_v8, 16  ;;  %v2436_v28 = vshll.u32 %v547_v8, 16 }
 0x158   : > { %6011 = vmatprep.mubr.msk.bf16.mxu0 %vm6692_vm0, %v10870_v54  ;;  %v2358_v10 = vshrl.u32 %v475_v35, 16 }
 0x159   : > { %v1680_v53 = vpop.f32.mrb[24].mxu1  ;;  %v2417_v9 = vor.u32 %v2416_v55, %v2413_v44  ;;  %v2438_v55 = vrot.slane %v2436_v28, 3 }
 0x15a   : > { %v8117_v12 = vadd.f32 %v8009_v14, %v1680_v53  ;;  %v8119_v32 = vpop.f32.mrb[40].mxu0  ;;  %v1682_v61 = vpop.f32.mrb[25].mxu1  ;;  %v2338_v14 = vrot.slane %v2336_v17, 2  ;;  %v2361_v17 = vshll.u32 %v475_v35, 16  ;;  %v10916_v53 = vld [vmem:[#allocation29_spill] sm:$0xff] }
 0x15b   : > { %v5889_v31 = vpop.f32.mrb[41].mxu0  ;;  %v1683_v60 = vpop.f32.mrb[26].mxu1  ;;  %v482_v61 = vrot.slane %v10917_v1, 1 }
 0x15c   : > { %v8129_v16 = vadd.f32 %v8016_v19, %v1683_v60  ;;  %v8131_v46 = vpop.f32.mrb[42].mxu0  ;;  %v1685_v29 = vpop.f32.mrb[27].mxu1  ;;  %v8139_v19 = vcombine.low %v3111_v50, %v8114_v4  ;;  %v2342_v6 = vor.u32 %v2341_v5, %v2338_v14  ;;  %v2312_v50 = vsel %vm1998_vm5, %v2289_v30, %v2311_v36 }
 0x15d   : > { %v5890_v43 = vpop.f32.mrb[43].mxu0  ;;  %v8154_v31 = vor.u32 %v2332_v20, %v2331_v27  ;;  %v2360_v14 = vrot.slane %v2358_v10, 2  ;;  %v2363_v29 = vrot.slane %v2361_v17, 3  ;;  %v2418_v30 = vsel %vm1998_vm5, %v8102_v0, %v2417_v9  ;;  %v224_v17 = vld [vmem:[%s6804_s26 + $0xa4] sm:$0x1] }
 0x15e   : > { %2799 = vmatmul.mubr.bf16.gmra.mrb[132].mxu1 %v2290_v63  ;;  %10915 = vst [vmem:[#allocation5_spill] sm:$0xff] %v8139_v19  ;;  %v478_v63 = vor.u32 %v10916_v53, %v474_v13  ;;  %v3222_v60 = vshll.u32 %v8139_v19, 16  ;;  %v2435_v13 = vrot.slane %v2433_v2, 2  ;;  %v2343_v35 = vsel %vm1998_vm5, %v8104_v37, %v2342_v6 }
 0x15f   : > { %6012 = vmatmul.mubr.bf16.gmra.mrb[148].mxu0 %v2396_v18  ;;  %2806 = vmatprep.mubr.bf16.mxu1 %v2321_v58  ;;  %v3227_v20 = vshll.u32 %v8146_v11, 16  ;;  %v2334_v2 = vsel %vm1998_vm5, %v2311_v36, %v8154_v31  ;;  %v3220_v28 = vshrl.u32 %v8139_v19, 16  ;;  %v8177_v37 = vor.u32 %v2363_v29, %v2360_v14 }
 0x160   : > { %6015 = vmatprep.mubr.msk.bf16.mxu0 %vm6692_vm0, %v10870_v54  ;;  %v483_v27 = vsel %vm335_vm6, %v478_v63, %v482_v61  ;;  %v3224_v10 = vrot.slane %v3222_v60, 1  ;;  %v8175_v0 = vor.u32 %v2438_v55, %v2435_v13  ;;  %v2458_v63 = vshll.u32 %v8108_v39, 16 }
 0x161   : > { %v1688_v25 = vpop.f32.mrb[28].mxu1  ;;  %v2380_v36 = vshrl.u32 %v483_v27, 16  ;;  %v2354_v13 = vrot.slane %v7595_v22, 3  ;;  %v8187_v55 = vrot.slane %v3227_v20, 1  ;;  %v8190_v14 = vcombine.low %v8099_v3, %v224_v17 }
 0x162   : > { %v8149_v26 = vadd.f32 %v8037_v49, %v1688_v25  ;;  %v8151_v18 = vpop.f32.mrb[44].mxu0  ;;  %v1690_v40 = vpop.f32.mrb[29].mxu1  ;;  %v2455_v25 = vshrl.u32 %v8108_v39, 16  ;;  %v2440_v22 = vsel %vm1998_vm5, %v2417_v9, %v8175_v0  ;;  %v2365_v3 = vsel %vm1998_vm5, %v2342_v6, %v8177_v37 }
 0x163   : > { %v5893_v58 = vpop.f32.mrb[45].mxu0  ;;  %v1691_v44 = vpop.f32.mrb[30].mxu1  ;;  %v2383_v40 = vshll.u32 %v483_v27, 16 }
 0x164   : > { %v8158_v49 = vadd.f32 %v8048_v59, %v1691_v44  ;;  %v8160_v5 = vpop.f32.mrb[46].mxu0  ;;  %v1693_v8 = vpop.f32.mrb[31].mxu1  ;;  %v8171_v59 = vld [vmem:[%s6804_s26 + $0x24] sm:$0xff]   ;;  %v2457_v20 = vrot.slane %v2455_v25, 2 }
 0x165   : > { %v5894_v43 = vpop.f32.mrb[47].mxu0  ;;  %v10920_v44 = vld [vmem:[#allocation33_spill] sm:$0xff]  ;;  %v3235_v27 = vshll.u32 %v8171_v59, 16 }
 0x166   : > { %10918 = vst [vmem:[#allocation7_spill] sm:$0xff] %v8158_v49  ;;  %2807 = vmatmul.mubr.bf16.gmra.mrb[136].mxu1 %v2312_v50  ;;  %v10919_v50 = vld [vmem:[#allocation31_spill] sm:$0xff]  ;;  %v490_v60 = vrot.slane %v10920_v44, 1  ;;  %v3225_v43 = vor.u32 %v3224_v10, %v3220_v28  ;;  %v2385_v10 = vrot.slane %v2383_v40, 3 }
 0x167   : > { %6016 = vmatmul.mubr.bf16.gmra.mrb[152].mxu0 %v2418_v30  ;;  %2814 = vmatprep.mubr.bf16.mxu1 %v2343_v35  ;;  %v486_v58 = vor.u32 %v10919_v50, %v482_v61  ;;  %v2353_v30 = vrot.slane %v7598_v23, 2  ;;  %v3231_v61 = vshrl.u32 %v8146_v11, 16  ;;  %v2382_v11 = vrot.slane %v2380_v36, 2 }
 0x168   : > { %6019 = vmatprep.mubr.msk.bf16.mxu0 %vm6692_vm0, %v10870_v54  ;;  %v3230_v9 = vsel %vm335_vm6, %v3225_v43, %v8187_v55  ;;  %v3237_v25 = vrot.slane %v3235_v27, 1  ;;  %v2376_v43 = vrot.slane %v7616_v38, 3 }
 0x169   : > { %v1696_v8 = vpop.f32.mrb[32].mxu1  ;;  %v3233_v6 = vor.u32 %v3231_v61, %v8187_v55  ;;  %v3490_v27 = vshll.u32 %v3230_v9, 16 }
 0x16a   : > { %v8193_v39 = vadd.f32 %v8060_v33, %v1696_v8  ;;  %v8195_v29 = vpop.f32.mrb[48].mxu0  ;;  %v1698_v35 = vpop.f32.mrb[33].mxu1  ;;  %v2460_v33 = vrot.slane %v2458_v63, 3  ;;  %v2355_v63 = vor.u32 %v2354_v13, %v2353_v30 }
 0x16b   : > { %v5897_v19 = vpop.f32.mrb[49].mxu0  ;;  %v1699_v23 = vpop.f32.mrb[34].mxu1 }
 0x16c   : > { %10921 = vst [vmem:[#allocation14_spill] sm:$0xff] %v8193_v39  ;;  %v8204_v17 = vadd.f32 %v8068_v52, %v1699_v23  ;;  %v8206_v8 = vpop.f32.mrb[50].mxu0  ;;  %v1701_v28 = vpop.f32.mrb[35].mxu1  ;;  %v491_v19 = vsel %vm335_vm6, %v486_v58, %v490_v60  ;;  %v8214_v52 = vld [vmem:[%s6804_s26 + $0x2c] sm:$0xff]   ;;  %v8218_v58 = vor.u32 %v2460_v33, %v2457_v20  ;;  %v2386_v23 = vor.u32 %v2385_v10, %v2382_v11 }
 0x16d   : > { %v5898_v35 = vpop.f32.mrb[51].mxu0  ;;  %v2402_v36 = vshrl.u32 %v491_v19, 16  ;;  %v2405_v40 = vshll.u32 %v491_v19, 16  ;;  %v3070_v28 = vld [vmem:[%s6804_s26 + $0x14] sm:$0xf]  ;;  %v8232_v33 = vsel %vm335_vm6, %v3233_v6, %v3237_v25  ;;  %v3243_v38 = vshll.u32 %v8214_v52, 16 }
 0x16e   : > { %10922 = vst [vmem:[#allocation6_spill] sm:$0xff] %v8204_v17  ;;  %2815 = vmatmul.mubr.bf16.gmra.mrb[140].mxu1 %v2334_v2  ;;  %v2375_v2 = vrot.slane %v10916_v53, 2  ;;  %v10923_v35 = vld [vmem:[#allocation32_spill] sm:$0xff]  ;;  %v3239_v53 = vshrl.u32 %v8171_v59, 16  ;;  %v2462_v6 = vsel %vm1998_vm5, %v8175_v0, %v8218_v58 }
 0x16f   : > { %6020 = vmatmul.mubr.bf16.gmra.mrb[156].mxu0 %v2440_v22  ;;  %2822 = vmatprep.mubr.bf16.mxu1 %v2365_v3  ;;  %v494_v39 = vor.u32 %v10923_v35, %v490_v60  ;;  %v10924_v22 = vshll.u32 %v8190_v14, 16  ;;  %v2356_v60 = vsel %vm1998_vm5, %v8154_v31, %v2355_v63  ;;  %v2404_v19 = vrot.slane %v2402_v36, 2 }
 0x170   : > { %6023 = vmatprep.mubr.msk.bf16.mxu0 %vm6692_vm0, %v10870_v54  ;;  %v8249_v17 = vor.u32 %v2376_v43, %v2375_v2  ;;  %v3488_v36 = vshrl.u32 %v3230_v9, 16  ;;  %v10841_v2 = vshrl.u32 %v8190_v14, 16 }
 0x171   : > { %v1704_v61 = vpop.f32.mrb[36].mxu1  ;;  %v498_v30 = vrot.slane %v10924_v22, 1  ;;  %v2407_v22 = vrot.slane %v2405_v40, 3  ;;  %v3492_v40 = vrot.slane %v3490_v27, 1 }
 0x172   : > { %v8227_v13 = vadd.f32 %v8086_v21, %v1704_v61  ;;  %v8229_v3 = vpop.f32.mrb[52].mxu0  ;;  %v1706_v20 = vpop.f32.mrb[37].mxu1  ;;  %v5604_v21 = vcombine.low %v3070_v28, %v8114_v4  ;;  %v3495_v4 = vshll.u32 %v8232_v33, 16  ;;  %v3241_v28 = vor.u32 %v3239_v53, %v3237_v25 }
 0x173   : > { %v5901_v11 = vpop.f32.mrb[53].mxu0  ;;  %v1707_v10 = vpop.f32.mrb[38].mxu1  ;;  %v8256_v0 = vor.u32 %v2407_v22, %v2404_v19  ;;  %v3493_v25 = vor.u32 %v3492_v40, %v3488_v36  ;;  %v2397_v53 = vrot.slane %v10919_v50, 2  ;;  %v2398_v50 = vrot.slane %v10917_v1, 3 }
 0x174   : > { %10925 = vst [vmem:[#allocation8_spill] sm:$0xff] %v8227_v13  ;;  %v8240_v61 = vadd.f32 %v8094_v56, %v1707_v10  ;;  %v8242_v20 = vpop.f32.mrb[54].mxu0  ;;  %v1709_v13 = vpop.f32.mrb[39].mxu1  ;;  %v2387_v11 = vsel %vm1998_vm5, %v8177_v37, %v2386_v23  ;;  %v499_v56 = vsel %vm335_vm6, %v494_v39, %v498_v30  ;;  %v3245_v10 = vrot.slane %v3243_v38, 1 }
 0x175   : > { %v5902_v31 = vpop.f32.mrb[55].mxu0  ;;  %v3482_v13 = vshll.u32 %v5604_v21, 16  ;;  %v2424_v37 = vshrl.u32 %v499_v56, 16  ;;  %v2427_v9 = vshll.u32 %v499_v56, 16  ;;  %v2378_v39 = vsel %vm1998_vm5, %v2355_v63, %v8249_v17 }
 0x176   : > { %10926 = vst [vmem:[#allocation17_spill] sm:$0xff] %v8240_v61  ;;  %2823 = vmatmul.mubr.bf16.gmra.mrb[144].mxu1 %v2356_v60  ;;  %v8254_v61 = vld [vmem:[%s6804_s26 + $0x34] sm:$0xff]   ;;  %v3497_v27 = vrot.slane %v3495_v4, 1  ;;  %v8270_v22 = vsel %vm335_vm6, %v3241_v28, %v3245_v10  ;;  %v2409_v63 = vsel %vm1998_vm5, %v2386_v23, %v8256_v0  ;;  %v3511_v23 = vshrl.u32 %v8232_v33, 16 }
 0x177   : > { %6024 = vmatmul.mubr.bf16.gmra.mrb[160].mxu0 %v2462_v6  ;;  %2830 = vmatprep.mubr.bf16.mxu1 %v2387_v11  ;;  %v3247_v6 = vshrl.u32 %v8214_v52, 16  ;;  %v3251_v11 = vshll.u32 %v8254_v61, 16  ;;  %v3484_v36 = vrot.slane %v3482_v13, 1  ;;  %v3515_v1 = vshll.u32 %v8270_v22, 16 }
 0x178   : > { %6027 = vmatprep.mubr.msk.bf16.mxu0 %vm6692_vm0, %v10870_v54  ;;  %v3498_v49 = vsel %vm335_vm6, %v3493_v25, %v3497_v27  ;;  %v3513_v25 = vor.u32 %v3511_v23, %v3497_v27 }
 0x179   : > { %v1712_v43 = vpop.f32.mrb[40].mxu1  ;;  %v3253_v13 = vrot.slane %v3251_v11, 1 }
 0x17a   : > { %v8265_v38 = vadd.f32 %v8119_v32, %v1712_v43  ;;  %v8267_v60 = vpop.f32.mrb[56].mxu0  ;;  %v1714_v19 = vpop.f32.mrb[41].mxu1  ;;  %v3480_v32 = vshrl.u32 %v5604_v21, 16  ;;  %v2426_v43 = vrot.slane %v2424_v37, 2  ;;  %v3249_v21 = vor.u32 %v3247_v6, %v3245_v10 }
 0x17b   : > { %v5905_v31 = vpop.f32.mrb[57].mxu0  ;;  %v1715_v56 = vpop.f32.mrb[42].mxu1  ;;  %v2429_v19 = vrot.slane %v2427_v9, 3  ;;  %v2399_v37 = vor.u32 %v2398_v50, %v2397_v53  ;;  %v2420_v50 = vrot.slane %v10920_v44, 3 }
 0x17c   : > { %10927 = vst [vmem:[#allocation9_spill] sm:$0xff] %v8265_v38  ;;  %v8278_v40 = vadd.f32 %v8131_v46, %v1715_v56  ;;  %v8280_v4 = vpop.f32.mrb[58].mxu0  ;;  %v1717_v28 = vpop.f32.mrb[43].mxu1  ;;  %v502_v31 = vor.u32 %v10841_v2, %v498_v30  ;;  %v8288_v46 = vld [vmem:[%s6804_s26 + $0x3c] sm:$0xff]   ;;  %v3485_v9 = vor.u32 %v3484_v36, %v3480_v32  ;;  %v3517_v2 = vrot.slane %v3515_v1, 1 }
 0x17d   : > { %v5906_v38 = vpop.f32.mrb[59].mxu0  ;;  %v2430_v56 = vor.u32 %v2429_v19, %v2426_v43  ;;  %v8297_v6 = vsel %vm335_vm6, %v3249_v21, %v3253_v13  ;;  %v3259_v53 = vshll.u32 %v8288_v46, 16 }
 0x17e   : > { %10928 = vst [vmem:[#allocation11_spill] sm:$0xff] %v8278_v40  ;;  %2831 = vmatmul.mubr.bf16.gmra.mrb[148].mxu1 %v2378_v39  ;;  %v2446_v30 = vshrl.u32 %v502_v31, 16  ;;  %v2449_v38 = vshll.u32 %v502_v31, 16  ;;  %v3486_v27 = vsel %vm335_vm6, %v3485_v9, %v8187_v55  ;;  %v3518_v1 = vsel %vm335_vm6, %v3513_v25, %v3517_v2 }
 0x17f   : > { %6028 = vmatmul.mubr.bf16.gmra.mrb[164].mxu0 %v8218_v58  ;;  %2838 = vmatprep.mubr.bf16.mxu1 %v2409_v63  ;;  %v3255_v58 = vshrl.u32 %v8254_v61, 16  ;;  %v2400_v63 = vsel %vm1998_vm5, %v8249_v17, %v2399_v37  ;;  %v2431_v19 = vsel %vm1998_vm5, %v8256_v0, %v2430_v56  ;;  %v3527_v55 = vshrl.u32 %v8270_v22, 16  ;;  %v6588_v0 = vld [vmem:[%s10777_s1 + $0x200] sm:$0xff]  }
 0x180   : > { %4060 = vmatprep.mubr.bf16.mxu0 %v3498_v49  ;;  %v2448_v31 = vrot.slane %v2446_v30, 2  ;;  %v2451_v23 = vrot.slane %v2449_v38, 3  ;;  %v3261_v21 = vrot.slane %v3259_v53, 1 }
 0x181   : > { %v1720_v28 = vpop.f32.mrb[44].mxu1  ;;  %v3257_v44 = vor.u32 %v3255_v58, %v3253_v13 }
 0x182   : > { %v8292_v40 = vadd.f32 %v8151_v18, %v1720_v28  ;;  %v8294_v39 = vpop.f32.mrb[60].mxu0  ;;  %v1722_v10 = vpop.f32.mrb[45].mxu1  ;;  %v2419_v18 = vrot.slane %v10923_v35, 2  ;;  %v3531_v35 = vshll.u32 %v8297_v6, 16  ;;  %v8323_v30 = vor.u32 %v2451_v23, %v2448_v31 }
 0x183   : > { %v5909_v49 = vpop.f32.mrb[61].mxu0  ;;  %v1723_v11 = vpop.f32.mrb[46].mxu1  ;;  %v3529_v28 = vor.u32 %v3527_v55, %v3517_v2  ;;  %v8332_v53 = vsel %vm335_vm6, %v3257_v44, %v3261_v21 }
 0x184   : > { %v8308_v32 = vadd.f32 %v8160_v5, %v1723_v11  ;;  %v8310_v36 = vpop.f32.mrb[62].mxu0  ;;  %v1725_v43 = vpop.f32.mrb[47].mxu1  ;;  %v8318_v5 = vld [vmem:[%s6804_s26 + $0x44] sm:$0xff]   ;;  %v2421_v9 = vor.u32 %v2420_v50, %v2419_v18  ;;  %v3533_v25 = vrot.slane %v3531_v35, 1  ;;  %v3263_v49 = vshrl.u32 %v8288_v46, 16 }
 0x185   : > { %v5910_v17 = vpop.f32.mrb[63].mxu0  ;;  %v3267_v11 = vshll.u32 %v8318_v5, 16  ;;  %v10929_v18 = vshrl.u32 %v8190_v14, 16  ;;  %v3547_v35 = vshll.u32 %v8332_v53, 16 }
 0x186   : > { %2839 = vmatmul.mubr.bf16.gmra.mrb[152].mxu1 %v2400_v63  ;;  %v2422_v2 = vsel %vm1998_vm5, %v2399_v37, %v2421_v9  ;;  %v2453_v17 = vsel %vm1998_vm5, %v2430_v56, %v8323_v30  ;;  %v6589_v37 = vld [vmem:[%s10777_s1 + $0x208] sm:$0xff]   ;;  %v3534_v55 = vsel %vm335_vm6, %v3529_v28, %v3533_v25  ;;  %v3394_v28 = vrot.slane %v8214_v52, 1 }
 0x187   : > { %4061 = vmatmul.mubr.bf16.vlgmr.msra.gmra.mrb[84].mxu0 %v3486_v27  ;;  %2846 = vmatprep.mubr.bf16.mxu1 %v2431_v19  ;;  %v2441_v50 = vrot.slane %v10929_v18, 2  ;;  %v3269_v44 = vrot.slane %v3267_v11, 1  ;;  %v3271_v52 = vshrl.u32 %v8318_v5, 16 }
 0x188   : > { %6032 = vmatpush3.bf16.msra.mxu0 %v6588_v0  ;;  %4068 = vmatprep.mubr.bf16.mxu0 %v3518_v1  ;;  %v8356_v0 = vld [vmem:[%s6804_s26 + $0x4c] sm:$0xff]  }
 0x189   : > { %v1728_v38 = vpop.f32.mrb[48].mxu1  ;;  %6033 = vmatprep.subr.bf16.mxu0 %v10870_v54  ;;  %v3275_v18 = vshll.u32 %v8356_v0, 16 }
 0x18a   : > { %v8327_v13 = vadd.f32 %v8195_v29, %v1728_v38  ;;  %v8329_v10 = vpop.f32.mrb[64].mxu0  ;;  %v1730_v58 = vpop.f32.mrb[49].mxu1  ;;  %v10930_v29 = vshll.u32 %v8190_v14, 16  ;;  %v3543_v14 = vshrl.u32 %v8297_v6, 16  ;;  %v10842_v38 = vrot.slane %v8171_v59, 1 }
 0x18b   : > { %v5913_v63 = vpop.f32.mrb[65].mxu0  ;;  %v1731_v27 = vpop.f32.mrb[50].mxu1  ;;  %v6590_v58 = vld [vmem:[%s10777_s1 + $0x210] sm:$0xff]  }
 0x18c   : > { %v2442_v43 = vrot.slane %v10930_v29, 3  ;;  %v8342_v19 = vadd.f32 %v8206_v8, %v1731_v27  ;;  %v8344_v31 = vpop.f32.mrb[66].mxu0  ;;  %v1733_v23 = vpop.f32.mrb[51].mxu1  ;;  %6034 = vmatpush3.bf16.msra.mxu0 %v6589_v37  ;;  %v3265_v8 = vor.u32 %v3263_v49, %v3261_v21  ;;  %v3545_v21 = vor.u32 %v3543_v14, %v3533_v25 }
 0x18d   : > { %v5914_v1 = vpop.f32.mrb[67].mxu0  ;;  %6035 = vmatprep.subr.bf16.mxu0 %v10870_v54  ;;  %v3549_v49 = vrot.slane %v3547_v35, 1  ;;  %v3396_v37 = vrot.slane %v8254_v61, 1  ;;  %v3273_v35 = vor.u32 %v3271_v52, %v3269_v44 }
 0x18e   : > { %2847 = vmatmul.mubr.bf16.gmra.mrb[156].mxu1 %v2422_v2  ;;  %v8359_v56 = vor.u32 %v2442_v43, %v2441_v50  ;;  %v8373_v2 = vsel %vm335_vm6, %v3265_v8, %v3269_v44  ;;  %v6591_v1 = vld [vmem:[%s10777_s1 + $0x218] sm:$0xff]   ;;  %v3277_v8 = vrot.slane %v3275_v18, 1 }
 0x18f   : > { %4069 = vmatmul.mubr.bf16.gmra.mrb[88].mxu0 %v8232_v33  ;;  %2854 = vmatprep.mubr.bf16.mxu1 %v2453_v17  ;;  %v3395_v17 = vsel %vm506_vm4, %v10842_v38, %v3394_v28  ;;  %v3563_v14 = vshll.u32 %v8373_v2, 16 }
 0x190   : > { %4076 = vmatprep.mubr.bf16.mxu0 %v3534_v55  ;;  %6036 = vmatpush3.bf16.msra.mxu0 %v6590_v58  ;;  %v2444_v25 = vsel %vm1998_vm5, %v2421_v9, %v8359_v56  ;;  %v3550_v9 = vsel %vm335_vm6, %v3545_v21, %v3549_v49  ;;  %v8396_v58 = vld [vmem:[%s6804_s26 + $0x54] sm:$0xff]   ;;  %v3523_v61 = vshll.u32 %v3395_v17, 16  ;;  %v6592_v21 = vld [vmem:[%s10777_s1 + $0x220] sm:$0xff]   ;;  %v8413_v18 = vsel %vm335_vm6, %v3273_v35, %v3277_v8  ;;  %v6593_v35 = vld [vmem:[%s10777_s1 + $0x228] sm:$0xff]  }
 0x191   : > { %v1736_v63 = vpop.f32.mrb[52].mxu1  ;;  %6037 = vmatprep.subr.bf16.mxu0 %v10870_v54  ;;  %v3565_v44 = vrot.slane %v3563_v14, 1  ;;  %v3398_v14 = vrot.slane %v8288_v46, 1 }
 0x192   : > { %v8368_v33 = vadd.f32 %v8229_v3, %v1736_v63  ;;  %v8370_v11 = vpop.f32.mrb[68].mxu0  ;;  %v1738_v27 = vpop.f32.mrb[53].mxu1  ;;  %v8401_v63 = vsel %vm506_vm4, %v3394_v28, %v3396_v37  ;;  %v3279_v28 = vshrl.u32 %v8356_v0, 16 }
 0x193   : > { %v5917_v50 = vpop.f32.mrb[69].mxu0  ;;  %v1739_v29 = vpop.f32.mrb[54].mxu1 }
 0x194   : > { %v8380_v43 = vadd.f32 %v8242_v20, %v1739_v29  ;;  %v8382_v3 = vpop.f32.mrb[70].mxu0  ;;  %v1741_v23 = vpop.f32.mrb[55].mxu1  ;;  %6038 = vmatpush3.bf16.msra.mxu0 %v6591_v1  ;;  %v3559_v20 = vshrl.u32 %v8332_v53, 16  ;;  %v3283_v29 = vshll.u32 %v8396_v58, 16  ;;  %v8417_v1 = vrot.slane %v3523_v61, 1 }
 0x195   : > { %v5918_v55 = vpop.f32.mrb[71].mxu0  ;;  %6039 = vmatprep.subr.bf16.mxu0 %v10870_v54 }
 0x196   : > { %2855 = vmatmul.mubr.bf16.gmra.mrb[160].mxu1 %v2444_v25  ;;  %v3561_v50 = vor.u32 %v3559_v20, %v3549_v49  ;;  %v3535_v49 = vshrl.u32 %v3395_v17, 16  ;;  %v3539_v55 = vshll.u32 %v8401_v63, 16  ;;  %v3575_v17 = vshrl.u32 %v8373_v2, 16 }
 0x197   : > { %4077 = vmatmul.mubr.bf16.gmra.mrb[92].mxu0 %v8270_v22  ;;  %2862 = vmatprep.mubr.bf16.mxu1 %v8323_v30 }
 0x198   : > { %4084 = vmatprep.mubr.bf16.mxu0 %v3550_v9  ;;  %6040 = vmatpush3.bf16.msra.mxu0 %v6592_v21  ;;  %v3566_v61 = vsel %vm335_vm6, %v3561_v50, %v3565_v44  ;;  %v3537_v46 = vor.u32 %v3535_v49, %v8417_v1  ;;  %v3541_v50 = vrot.slane %v3539_v55, 1 }
 0x199   : > { %v1744_v27 = vpop.f32.mrb[56].mxu1  ;;  %6041 = vmatprep.subr.bf16.mxu0 %v10870_v54 }
 0x19a   : > { %v8408_v52 = vadd.f32 %v8267_v60, %v1744_v27  ;;  %v8410_v22 = vpop.f32.mrb[72].mxu0  ;;  %v1746_v30 = vpop.f32.mrb[57].mxu1  ;;  %v3579_v27 = vshll.u32 %v8413_v18, 16 }
 0x19b   : > { %v5921_v25 = vpop.f32.mrb[73].mxu0  ;;  %v1747_v23 = vpop.f32.mrb[58].mxu1  ;;  %v3285_v30 = vrot.slane %v3283_v29, 1 }
 0x19c   : > { %10931 = vst [vmem:[#allocation10_spill] sm:$0xff] %v8408_v52  ;;  %v8421_v60 = vadd.f32 %v8280_v4, %v1747_v23  ;;  %v8423_v9 = vpop.f32.mrb[74].mxu0  ;;  %v1749_v20 = vpop.f32.mrb[59].mxu1  ;;  %6042 = vmatpush3.bf16.msra.mxu0 %v6593_v35  ;;  %v3281_v4 = vor.u32 %v3279_v28, %v3277_v8  ;;  %v8435_v25 = vld [vmem:[%s6804_s26 + $0x5c] sm:$0xff]   ;;  %v8442_v23 = vsel %vm506_vm4, %v3396_v37, %v3398_v14  ;;  %v3581_v29 = vrot.slane %v3579_v27, 1  ;;  %v8500_v52 = vld [vmem:[%s6804_s26 + $0x6c] sm:$0xff]  }
 0x19d   : > { %v5922_v21 = vpop.f32.mrb[75].mxu0  ;;  %6043 = vmatprep.subr.bf16.mxu0 %v10870_v54  ;;  %v3577_v28 = vor.u32 %v3575_v17, %v3565_v44  ;;  %v3287_v37 = vshrl.u32 %v8396_v58, 16  ;;  %v3291_v35 = vshll.u32 %v8435_v25, 16  ;;  %v3542_v44 = vsel %vm335_vm6, %v3537_v46, %v3541_v50 }
 0x19e   : > { %10932 = vst [vmem:[#allocation12_spill] sm:$0xff] %v8421_v60  ;;  %2863 = vmatmul.mubr.bf16.gmra.mrb[164].mxu1 %v8359_v56  ;;  %v6594_v56 = vld [vmem:[%s10777_s1 + $0x230] sm:$0xff]   ;;  %v8454_v55 = vsel %vm335_vm6, %v3281_v4, %v3285_v30  ;;  %v3551_v17 = vshrl.u32 %v8401_v63, 16  ;;  %v3591_v63 = vshrl.u32 %v8413_v18, 16 }
 0x19f   : > { %4085 = vmatmul.mubr.bf16.gmra.mrb[96].mxu0 %v8297_v6  ;;  %6055 = vmatprep.mubr.msk.bf16.mxu1 %vm6692_vm0, %v10870_v54  ;;  %v3582_v46 = vsel %vm335_vm6, %v3577_v28, %v3581_v29  ;;  %v3595_v38 = vshll.u32 %v8454_v55, 16 }
 0x1a0   : > { %4092 = vmatprep.mubr.bf16.mxu0 %v3566_v61  ;;  %6044 = vmatpush3.bf16.msra.mxu0 %v6594_v56 }
 0x1a1   : > { %v1752_v8 = vpop.f32.mrb[60].mxu1  ;;  %6045 = vmatprep.subr.bf16.mxu0 %v10870_v54 }
 0x1a2   : > { %v8449_v6 = vadd.f32 %v8294_v39, %v1752_v8  ;;  %v8451_v20 = vpop.f32.mrb[76].mxu0  ;;  %v1754_v49 = vpop.f32.mrb[61].mxu1  ;;  %v3555_v39 = vshll.u32 %v8442_v23, 16  ;;  %v3400_v8 = vrot.slane %v8318_v5, 1  ;;  %v3553_v5 = vor.u32 %v3551_v17, %v3541_v50 }
 0x1a3   : > { %v5925_v21 = vpop.f32.mrb[77].mxu0  ;;  %v1755_v61 = vpop.f32.mrb[62].mxu1  ;;  %v6595_v49 = vld [vmem:[%s10777_s1 + $0x238] sm:$0xff]  }
 0x1a4   : > { %10933 = vst [vmem:[#allocation13_spill] sm:$0xff] %v8449_v6  ;;  %v8462_v27 = vadd.f32 %v8310_v36, %v1755_v61  ;;  %v8464_v56 = vpop.f32.mrb[78].mxu0  ;;  %v1757_v4 = vpop.f32.mrb[63].mxu1  ;;  %6046 = vmatpush3.bf16.msra.mxu0 %v6595_v49  ;;  %v3289_v36 = vor.u32 %v3287_v37, %v3285_v30  ;;  %v3293_v61 = vrot.slane %v3291_v35, 1  ;;  %v3401_v49 = vsel %vm506_vm4, %v3398_v14, %v3400_v8 }
 0x1a5   : > { %v5926_v21 = vpop.f32.mrb[79].mxu0  ;;  %v3557_v4 = vrot.slane %v3555_v39, 1  ;;  %v3597_v6 = vrot.slane %v3595_v38, 1  ;;  %v3567_v38 = vshrl.u32 %v8442_v23, 16 }
 0x1a6   : > { %10934 = vst [vmem:[#allocation15_spill] sm:$0xff] %v8462_v27  ;;  %6056 = vmatmul.mubr.bf16.vlgmr.msra.gmra.mrb[168].mxu1 %v3542_v44  ;;  %v8474_v27 = vld [vmem:[%s6804_s26 + $0x64] sm:$0xff]   ;;  %v3593_v21 = vor.u32 %v3591_v63, %v3581_v29  ;;  %v8486_v35 = vsel %vm335_vm6, %v3289_v36, %v3293_v61  ;;  %v3571_v29 = vshll.u32 %v3401_v49, 16  ;;  %v3402_v63 = vrot.slane %v8356_v0, 1 }
 0x1a7   : > { %4093 = vmatmul.mubr.bf16.gmra.mrb[100].mxu0 %v8332_v53  ;;  %6059 = vmatprep.mubr.msk.bf16.mxu1 %vm6692_vm0, %v10870_v54  ;;  %v3295_v53 = vshrl.u32 %v8435_v25, 16  ;;  %v3299_v50 = vshll.u32 %v8474_v27, 16  ;;  %v3558_v14 = vsel %vm335_vm6, %v3553_v5, %v3557_v4 }
 0x1a8   : > { %4100 = vmatprep.mubr.bf16.mxu0 %v3582_v46  ;;  %v3573_v23 = vrot.slane %v3571_v29, 1  ;;  %v3403_v0 = vsel %vm506_vm4, %v3400_v8, %v3402_v63 }
 0x1a9   : > { %v1760_v28 = vpop.f32.mrb[64].mxu1  ;;  %v3301_v5 = vrot.slane %v3299_v50, 1  ;;  %v3307_v50 = vshll.u32 %v8500_v52, 16  ;;  %v3587_v8 = vshll.u32 %v3403_v0, 16 }
 0x1aa   : > { %v8481_v60 = vadd.f32 %v8329_v10, %v1760_v28  ;;  %v8483_v30 = vpop.f32.mrb[80].mxu0  ;;  %v1762_v37 = vpop.f32.mrb[65].mxu1  ;;  %v3598_v28 = vsel %vm335_vm6, %v3593_v21, %v3597_v6 }
 0x1ab   : > { %v5929_v44 = vpop.f32.mrb[81].mxu0  ;;  %v1763_v17 = vpop.f32.mrb[66].mxu1  ;;  %v3607_v37 = vshrl.u32 %v8454_v55, 16 }
 0x1ac   : > { %10935 = vst [vmem:[#allocation24_spill] sm:$0xff] %v8481_v60  ;;  %v8493_v10 = vadd.f32 %v8344_v31, %v1763_v17  ;;  %v1995_v39 = vpop.f32.mrb[82].mxu0  ;;  %v1765_v46 = vpop.f32.mrb[67].mxu1  ;;  %v3611_v44 = vshll.u32 %v8486_v35, 16  ;;  %v3297_v60 = vor.u32 %v3295_v53, %v3293_v61  ;;  %v3569_v31 = vor.u32 %v3567_v38, %v3557_v4 }
 0x1ad   : > { %v5930_v36 = vpop.f32.mrb[83].mxu0  ;;  %v3609_v17 = vor.u32 %v3607_v37, %v3597_v6  ;;  %v3583_v38 = vshrl.u32 %v3401_v49, 16  ;;  %v3589_v49 = vrot.slane %v3587_v8, 1 }
 0x1ae   : > { %6060 = vmatmul.mubr.bf16.gmra.mrb[172].mxu1 %v3558_v14  ;;  %v3613_v39 = vrot.slane %v3611_v44, 1  ;;  %v8510_v53 = vsel %vm335_vm6, %v3297_v60, %v3301_v5  ;;  %v3574_v14 = vsel %vm335_vm6, %v3569_v31, %v3573_v23  ;;  %v3623_v60 = vshrl.u32 %v8486_v35, 16 }
 0x1af   : > { %4101 = vmatmul.mubr.bf16.gmra.mrb[104].mxu0 %v8373_v2  ;;  %6063 = vmatprep.mubr.msk.bf16.mxu1 %vm6692_vm0, %v10870_v54  ;;  %v3303_v2 = vshrl.u32 %v8474_v27, 16  ;;  %v3309_v44 = vrot.slane %v3307_v50, 1 }
 0x1b0   : > { %4108 = vmatprep.mubr.bf16.mxu0 %v3598_v28  ;;  %v3614_v36 = vsel %vm335_vm6, %v3609_v17, %v3613_v39  ;;  %v3627_v28 = vshll.u32 %v8510_v53, 16  ;;  %v3625_v17 = vor.u32 %v3623_v60, %v3613_v39 }
 0x1b1   : > { %v1768_v21 = vpop.f32.mrb[68].mxu1  ;;  %v3305_v37 = vor.u32 %v3303_v2, %v3301_v5 }
 0x1b2   : > { %v8507_v46 = vadd.f32 %v8370_v11, %v1768_v21  ;;  %v1770_v61 = vpop.f32.mrb[69].mxu1  ;;  %v3404_v11 = vrot.slane %v8396_v58, 1  ;;  %v8523_v21 = vld [vmem:[%s6804_s26 + $0x74] sm:$0xff]  }
 0x1b3   : > { %v1771_v4 = vpop.f32.mrb[70].mxu1  ;;  %v3629_v61 = vrot.slane %v3627_v28, 1  ;;  %v8533_v2 = vsel %vm335_vm6, %v3305_v37, %v3309_v44  ;;  %v3315_v50 = vshll.u32 %v8523_v21, 16 }
 0x1b4   : > { %v8516_v6 = vadd.f32 %v8382_v3, %v1771_v4  ;;  %v1773_v29 = vpop.f32.mrb[71].mxu1  ;;  %v3585_v3 = vor.u32 %v3583_v38, %v3573_v23  ;;  %v3405_v58 = vsel %vm506_vm4, %v3402_v63, %v3404_v11  ;;  %v3599_v38 = vshrl.u32 %v3403_v0, 16 }
 0x1b5   : > { %v3603_v63 = vshll.u32 %v3405_v58, 16  ;;  %v3630_v29 = vsel %vm335_vm6, %v3625_v17, %v3629_v61  ;;  %v3643_v60 = vshll.u32 %v8533_v2, 16  ;;  %v3317_v37 = vrot.slane %v3315_v50, 1 }
 0x1b6   : > { %6064 = vmatmul.mubr.bf16.gmra.mrb[176].mxu1 %v3574_v14  ;;  %v3590_v14 = vsel %vm335_vm6, %v3585_v3, %v3589_v49 }
 0x1b7   : > { %4109 = vmatmul.mubr.bf16.gmra.mrb[108].mxu0 %v8413_v18  ;;  %6067 = vmatprep.mubr.msk.bf16.mxu1 %vm6692_vm0, %v10870_v54  ;;  %v3311_v18 = vshrl.u32 %v8500_v52, 16  ;;  %v3605_v0 = vrot.slane %v3603_v63, 1 }
 0x1b8   : > { %4116 = vmatprep.mubr.bf16.mxu0 %v3614_v36  ;;  %v3639_v36 = vshrl.u32 %v8510_v53, 16 }
 0x1b9   : > { %v1776_v31 = vpop.f32.mrb[72].mxu1  ;;  %v3313_v28 = vor.u32 %v3311_v18, %v3309_v44 }
 0x1ba   : > { %v8530_v4 = vadd.f32 %v8410_v22, %v1776_v31  ;;  %v1778_v5 = vpop.f32.mrb[73].mxu1  ;;  %v3406_v22 = vrot.slane %v8435_v25, 1  ;;  %v8546_v31 = vld [vmem:[%s6804_s26 + $0x7c] sm:$0xff]   ;;  %v3641_v17 = vor.u32 %v3639_v36, %v3629_v61 }
 0x1bb   : > { %v1779_v23 = vpop.f32.mrb[74].mxu1  ;;  %v3645_v5 = vrot.slane %v3643_v60, 1  ;;  %v8556_v18 = vsel %vm335_vm6, %v3313_v28, %v3317_v37  ;;  %v3323_v50 = vshll.u32 %v8546_v31, 16 }
 0x1bc   : > { %v8539_v39 = vadd.f32 %v8423_v9, %v1779_v23  ;;  %v1781_v8 = vpop.f32.mrb[75].mxu1  ;;  %v3601_v9 = vor.u32 %v3599_v38, %v3589_v49  ;;  %v3407_v25 = vsel %vm506_vm4, %v3404_v11, %v3406_v22  ;;  %v3615_v38 = vshrl.u32 %v3405_v58, 16 }
 0x1bd   : > { %v3619_v11 = vshll.u32 %v3407_v25, 16  ;;  %v3646_v8 = vsel %vm335_vm6, %v3641_v17, %v3645_v5  ;;  %v3659_v36 = vshll.u32 %v8556_v18, 16  ;;  %v3325_v28 = vrot.slane %v3323_v50, 1 }
 0x1be   : > { %6068 = vmatmul.mubr.bf16.gmra.mrb[180].mxu1 %v3590_v14  ;;  %v3606_v14 = vsel %vm335_vm6, %v3601_v9, %v3605_v0 }
 0x1bf   : > { %4117 = vmatmul.mubr.bf16.gmra.mrb[112].mxu0 %v8454_v55  ;;  %6071 = vmatprep.mubr.msk.bf16.mxu1 %vm6692_vm0, %v10870_v54  ;;  %v3319_v55 = vshrl.u32 %v8523_v21, 16  ;;  %v3621_v58 = vrot.slane %v3619_v11, 1 }
 0x1c0   : > { %4124 = vmatprep.mubr.bf16.mxu0 %v3630_v29  ;;  %v3655_v29 = vshrl.u32 %v8533_v2, 16 }
 0x1c1   : > { %v1784_v3 = vpop.f32.mrb[76].mxu1  ;;  %v3321_v60 = vor.u32 %v3319_v55, %v3317_v37 }
 0x1c2   : > { %v8553_v23 = vadd.f32 %v8451_v20, %v1784_v3  ;;  %v1786_v44 = vpop.f32.mrb[77].mxu1  ;;  %v3408_v20 = vrot.slane %v8474_v27, 1  ;;  %v8569_v3 = vld [vmem:[%s6804_s26 + $0x84] sm:$0xff]   ;;  %v3657_v17 = vor.u32 %v3655_v29, %v3645_v5  ;;  %v3410_v5 = vrot.slane %v8500_v52, 1 }
 0x1c3   : > { %v1787_v49 = vpop.f32.mrb[78].mxu1  ;;  %v3661_v44 = vrot.slane %v3659_v36, 1  ;;  %v8579_v55 = vsel %vm335_vm6, %v3321_v60, %v3325_v28  ;;  %v3331_v50 = vshll.u32 %v8569_v3, 16  ;;  %v8589_v60 = vld [vmem:[%s6804_s26 + $0x8c] sm:$0xff]  }
 0x1c4   : > { %v8562_v61 = vadd.f32 %v8464_v56, %v1787_v49  ;;  %v1789_v63 = vpop.f32.mrb[79].mxu1  ;;  %v3617_v56 = vor.u32 %v3615_v38, %v3605_v0  ;;  %v3409_v27 = vsel %vm506_vm4, %v3406_v22, %v3408_v20  ;;  %v3631_v38 = vshrl.u32 %v3407_v25, 16 }
 0x1c5   : > { %v3635_v22 = vshll.u32 %v3409_v27, 16  ;;  %v3671_v63 = vshrl.u32 %v8556_v18, 16  ;;  %v3333_v36 = vrot.slane %v3331_v50, 1  ;;  %v3411_v52 = vsel %vm506_vm4, %v3408_v20, %v3410_v5 }
 0x1c6   : > { %6072 = vmatmul.mubr.bf16.gmra.mrb[184].mxu1 %v3606_v14  ;;  %v3622_v0 = vsel %vm335_vm6, %v3617_v56, %v3621_v58  ;;  %v3633_v25 = vor.u32 %v3631_v38, %v3621_v58  ;;  %v3339_v50 = vshll.u32 %v8589_v60, 16  ;;  %v3647_v38 = vshrl.u32 %v3409_v27, 16 }
 0x1c7   : > { %4125 = vmatmul.mubr.bf16.gmra.mrb[116].mxu0 %v8486_v35  ;;  %6075 = vmatprep.mubr.msk.bf16.mxu1 %vm6692_vm0, %v10870_v54  ;;  %v3327_v35 = vshrl.u32 %v8546_v31, 16  ;;  %v3637_v56 = vrot.slane %v3635_v22, 1  ;;  %v3651_v20 = vshll.u32 %v3411_v52, 16 }
 0x1c8   : > { %4132 = vmatprep.mubr.bf16.mxu0 %v3646_v8  ;;  %v3675_v8 = vshll.u32 %v8579_v55, 16 }
 0x1c9   : > { %v1792_v9 = vpop.f32.mrb[80].mxu1  ;;  %v3329_v29 = vor.u32 %v3327_v35, %v3325_v28  ;;  %v3653_v27 = vrot.slane %v3651_v20, 1 }
 0x1ca   : > { %v8576_v49 = vadd.f32 %v8483_v30, %v1792_v9  ;;  %v1794_v37 = vpop.f32.mrb[81].mxu1  ;;  %v3662_v30 = vsel %vm335_vm6, %v3657_v17, %v3661_v44  ;;  %v3673_v17 = vor.u32 %v3671_v63, %v3661_v44 }
 0x1cb   : > { %v1795_v14 = vpop.f32.mrb[82].mxu1  ;;  %v3677_v37 = vrot.slane %v3675_v8, 1  ;;  %v8599_v35 = vsel %vm335_vm6, %v3329_v29, %v3333_v36  ;;  %v3341_v29 = vrot.slane %v3339_v50, 1 }
 0x1cc   : > { %v1796_v11 = vpop.f32.mrb[83].mxu1  ;;  %v3691_v63 = vshll.u32 %v8599_v35, 16 }
 0x1cd   : > { %v3678_v11 = vsel %vm335_vm6, %v3673_v17, %v3677_v37 }
 0x1ce   : > { %6076 = vmatmul.mubr.bf16.gmra.mrb[188].mxu1 %v3622_v0  ;;  %v3638_v0 = vsel %vm335_vm6, %v3633_v25, %v3637_v56 }
 0x1cf   : > { %4133 = vmatmul.mubr.bf16.gmra.mrb[120].mxu0 %v8510_v53  ;;  %6079 = vmatprep.mubr.msk.bf16.mxu1 %vm6692_vm0, %v10870_v54  ;;  %v3335_v53 = vshrl.u32 %v8569_v3, 16 }
 0x1d0   : > { %4140 = vmatprep.mubr.bf16.mxu0 %v3662_v30  ;;  %v3687_v30 = vshrl.u32 %v8579_v55, 16 }
 0x1d1   : > { %v2704_v9 = vpop.f32.mrb[84].mxu1  ;;  %v3337_v8 = vor.u32 %v3335_v53, %v3333_v36 }
 0x1d2   : > { %v8596_v14 = vadd.f32 %v2704_v9, %v7960_v34  ;;  %v2706_v28 = vpop.f32.mrb[85].mxu1  ;;  %v3412_v34 = vrot.slane %v8523_v21, 1  ;;  %v8612_v9 = vld [vmem:[%s6804_s26 + $0x94] sm:$0xff]   ;;  %v3689_v17 = vor.u32 %v3687_v30, %v3677_v37 }
 0x1d3   : > { %v2707_v58 = vpop.f32.mrb[86].mxu1  ;;  %v3693_v28 = vrot.slane %v3691_v63, 1  ;;  %v8622_v53 = vsel %vm335_vm6, %v3337_v8, %v3341_v29  ;;  %v3347_v50 = vshll.u32 %v8612_v9, 16 }
 0x1d4   : > { %v8605_v44 = vadd.f32 %v2707_v58, %v7966_v62  ;;  %v2709_v22 = vpop.f32.mrb[87].mxu1  ;;  %v3649_v62 = vor.u32 %v3647_v38, %v3637_v56  ;;  %v3413_v21 = vsel %vm506_vm4, %v3410_v5, %v3412_v34  ;;  %v3663_v38 = vshrl.u32 %v3411_v52, 16 }
 0x1d5   : > { %v3667_v5 = vshll.u32 %v3413_v21, 16  ;;  %v3694_v22 = vsel %vm335_vm6, %v3689_v17, %v3693_v28  ;;  %v3707_v30 = vshll.u32 %v8622_v53, 16  ;;  %v3349_v8 = vrot.slane %v3347_v50, 1 }
 0x1d6   : > { %6080 = vmatmul.mubr.bf16.gmra.mrb[192].mxu1 %v3638_v0  ;;  %v3654_v0 = vsel %vm335_vm6, %v3649_v62, %v3653_v27 }
 0x1d7   : > { %4141 = vmatmul.mubr.bf16.gmra.mrb[124].mxu0 %v8533_v2  ;;  %6083 = vmatprep.mubr.msk.bf16.mxu1 %vm6692_vm0, %v10870_v54  ;;  %v3343_v2 = vshrl.u32 %v8589_v60, 16  ;;  %v3669_v52 = vrot.slane %v3667_v5, 1 }
 0x1d8   : > { %4148 = vmatprep.mubr.bf16.mxu0 %v3678_v11  ;;  %v3703_v11 = vshrl.u32 %v8599_v35, 16 }
 0x1d9   : > { %v2712_v25 = vpop.f32.mrb[88].mxu1  ;;  %v3345_v63 = vor.u32 %v3343_v2, %v3341_v29 }
 0x1da   : > { %v8619_v58 = vadd.f32 %v2712_v25, %v7984_v42  ;;  %v2714_v36 = vpop.f32.mrb[89].mxu1  ;;  %v3414_v42 = vrot.slane %v8546_v31, 1  ;;  %v8635_v25 = vld [vmem:[%s6804_s26 + $0x9c] sm:$0xff]   ;;  %v3705_v17 = vor.u32 %v3703_v11, %v3693_v28 }
 0x1db   : > { %v2715_v56 = vpop.f32.mrb[90].mxu1  ;;  %v3709_v36 = vrot.slane %v3707_v30, 1  ;;  %v8645_v2 = vsel %vm335_vm6, %v3345_v63, %v3349_v8  ;;  %v3355_v50 = vshll.u32 %v8635_v25, 16 }
 0x1dc   : > { %v8628_v37 = vadd.f32 %v2715_v56, %v7995_v57  ;;  %v2717_v20 = vpop.f32.mrb[91].mxu1  ;;  %v3665_v57 = vor.u32 %v3663_v38, %v3653_v27  ;;  %v3415_v31 = vsel %vm506_vm4, %v3412_v34, %v3414_v42  ;;  %v3679_v38 = vshrl.u32 %v3413_v21, 16 }
 0x1dd   : > { %v3683_v34 = vshll.u32 %v3415_v31, 16  ;;  %v3710_v20 = vsel %vm335_vm6, %v3705_v17, %v3709_v36  ;;  %v3723_v11 = vshll.u32 %v8645_v2, 16  ;;  %v3357_v63 = vrot.slane %v3355_v50, 1 }
 0x1de   : > { %10936 = vst [vmem:[#allocation16_spill] sm:$0xff] %v8628_v37  ;;  %6084 = vmatmul.mubr.bf16.gmra.mrb[196].mxu1 %v3654_v0  ;;  %v3670_v0 = vsel %vm335_vm6, %v3665_v57, %v3669_v52 }
 0x1df   : > { %4149 = vmatmul.mubr.bf16.gmra.mrb[128].mxu0 %v8556_v18  ;;  %6087 = vmatprep.mubr.msk.bf16.mxu1 %vm6692_vm0, %v10870_v54  ;;  %v3351_v18 = vshrl.u32 %v8612_v9, 16  ;;  %v3685_v21 = vrot.slane %v3683_v34, 1 }
 0x1e0   : > { %4156 = vmatprep.mubr.bf16.mxu0 %v3694_v22  ;;  %v3719_v22 = vshrl.u32 %v8622_v53, 16 }
 0x1e1   : > { %v2720_v62 = vpop.f32.mrb[92].mxu1  ;;  %v3353_v30 = vor.u32 %v3351_v18, %v3349_v8 }
 0x1e2   : > { %v8642_v56 = vadd.f32 %v2720_v62, %v8007_v48  ;;  %v2722_v29 = vpop.f32.mrb[93].mxu1  ;;  %v3416_v48 = vrot.slane %v8569_v3, 1  ;;  %v8658_v62 = vld [vmem:[%s6804_s26 + $0xa4] sm:$0xff]   ;;  %v3721_v17 = vor.u32 %v3719_v22, %v3709_v36 }
 0x1e3   : > { %v2723_v27 = vpop.f32.mrb[94].mxu1  ;;  %v3725_v29 = vrot.slane %v3723_v11, 1  ;;  %v8668_v18 = vsel %vm335_vm6, %v3353_v30, %v3357_v63  ;;  %v3363_v50 = vshll.u32 %v8658_v62, 16 }
 0x1e4   : > { %v8651_v28 = vadd.f32 %v2723_v27, %v8014_v15  ;;  %v2725_v5 = vpop.f32.mrb[95].mxu1  ;;  %v3681_v15 = vor.u32 %v3679_v38, %v3669_v52  ;;  %v3417_v3 = vsel %vm506_vm4, %v3414_v42, %v3416_v48  ;;  %v3695_v38 = vshrl.u32 %v3415_v31, 16 }
 0x1e5   : > { %v3699_v42 = vshll.u32 %v3417_v3, 16  ;;  %v3726_v5 = vsel %vm335_vm6, %v3721_v17, %v3725_v29  ;;  %v3739_v22 = vshll.u32 %v8668_v18, 16  ;;  %v3365_v30 = vrot.slane %v3363_v50, 1 }
 0x1e6   : > { %6088 = vmatmul.mubr.bf16.gmra.mrb[200].mxu1 %v3670_v0  ;;  %v3686_v0 = vsel %vm335_vm6, %v3681_v15, %v3685_v21 }
 0x1e7   : > { %4157 = vmatmul.mubr.bf16.gmra.mrb[132].mxu0 %v8579_v55  ;;  %6091 = vmatprep.mubr.msk.bf16.mxu1 %vm6692_vm0, %v10870_v54  ;;  %v3359_v55 = vshrl.u32 %v8635_v25, 16  ;;  %v3701_v31 = vrot.slane %v3699_v42, 1 }
 0x1e8   : > { %4164 = vmatprep.mubr.bf16.mxu0 %v3710_v20  ;;  %v3735_v20 = vshrl.u32 %v8645_v2, 16 }
 0x1e9   : > { %v2728_v57 = vpop.f32.mrb[96].mxu1  ;;  %v3361_v11 = vor.u32 %v3359_v55, %v3357_v63 }
 0x1ea   : > { %v8665_v27 = vadd.f32 %v2728_v57, %v8035_v51  ;;  %v2730_v8 = vpop.f32.mrb[97].mxu1  ;;  %v3418_v51 = vrot.slane %v8589_v60, 1  ;;  %v8681_v57 = vld [vmem:[%s6804_s26 + $0xac] sm:$0xff]   ;;  %v3737_v17 = vor.u32 %v3735_v20, %v3725_v29 }
 0x1eb   : > { %v2731_v52 = vpop.f32.mrb[98].mxu1  ;;  %v3741_v8 = vrot.slane %v3739_v22, 1  ;;  %v8691_v55 = vsel %vm335_vm6, %v3361_v11, %v3365_v30  ;;  %v3371_v50 = vshll.u32 %v8681_v57, 16 }
 0x1ec   : > { %v8674_v36 = vadd.f32 %v2731_v52, %v8046_v7  ;;  %v2733_v34 = vpop.f32.mrb[99].mxu1  ;;  %v3697_v7 = vor.u32 %v3695_v38, %v3685_v21  ;;  %v3419_v60 = vsel %vm506_vm4, %v3416_v48, %v3418_v51  ;;  %v3711_v38 = vshrl.u32 %v3417_v3, 16 }
 0x1ed   : > { %v3715_v48 = vshll.u32 %v3419_v60, 16  ;;  %v3742_v34 = vsel %vm335_vm6, %v3737_v17, %v3741_v8  ;;  %v3755_v20 = vshll.u32 %v8691_v55, 16  ;;  %v3373_v11 = vrot.slane %v3371_v50, 1 }
 0x1ee   : > { %6092 = vmatmul.mubr.bf16.gmra.mrb[204].mxu1 %v3686_v0  ;;  %v3702_v0 = vsel %vm335_vm6, %v3697_v7, %v3701_v31 }
 0x1ef   : > { %4165 = vmatmul.mubr.bf16.gmra.mrb[136].mxu0 %v8599_v35  ;;  %6095 = vmatprep.mubr.msk.bf16.mxu1 %vm6692_vm0, %v10870_v54  ;;  %v3367_v35 = vshrl.u32 %v8658_v62, 16  ;;  %v3717_v3 = vrot.slane %v3715_v48, 1 }
 0x1f0   : > { %4172 = vmatprep.mubr.bf16.mxu0 %v3726_v5  ;;  %v3751_v5 = vshrl.u32 %v8668_v18, 16 }
 0x1f1   : > { %v2736_v15 = vpop.f32.mrb[100].mxu1  ;;  %v3369_v22 = vor.u32 %v3367_v35, %v3365_v30 }
 0x1f2   : > { %v8688_v52 = vadd.f32 %v2736_v15, %v8058_v47  ;;  %v2738_v63 = vpop.f32.mrb[101].mxu1  ;;  %v3420_v47 = vrot.slane %v8612_v9, 1  ;;  %v6584_v15 = vld [vmem:[%s6804_s26 + $0xb4] ss:$0 sps:$4 sm:$0x77]   ;;  %v3753_v17 = vor.u32 %v3751_v5, %v3741_v8 }
 0x1f3   : > { %v2739_v21 = vpop.f32.mrb[102].mxu1  ;;  %v3757_v63 = vrot.slane %v3755_v20, 1  ;;  %v8712_v30 = vsel %vm335_vm6, %v3369_v22, %v3373_v11  ;;  %v3379_v35 = vshll.u32 %v6584_v15, 16 }
 0x1f4   : > { %v8697_v29 = vadd.f32 %v2739_v21, %v8066_v45  ;;  %v2741_v42 = vpop.f32.mrb[103].mxu1  ;;  %v3713_v45 = vor.u32 %v3711_v38, %v3701_v31  ;;  %v3421_v9 = vsel %vm506_vm4, %v3418_v51, %v3420_v47  ;;  %v3727_v38 = vshrl.u32 %v3419_v60, 16 }
 0x1f5   : > { %v3731_v48 = vshll.u32 %v3421_v9, 16  ;;  %v3422_v42 = vrot.slane %v8635_v25, 1  ;;  %v3771_v5 = vshll.u32 %v8712_v30, 16  ;;  %v3381_v22 = vrot.slane %v3379_v35, 1 }
 0x1f6   : > { %6096 = vmatmul.mubr.bf16.gmra.mrb[208].mxu1 %v3702_v0  ;;  %v3718_v31 = vsel %vm335_vm6, %v3713_v45, %v3717_v3  ;;  %v3729_v60 = vor.u32 %v3727_v38, %v3717_v3  ;;  %v3743_v35 = vshrl.u32 %v3421_v9, 16 }
 0x1f7   : > { %4173 = vmatmul.mubr.bf16.gmra.mrb[140].mxu0 %v8622_v53  ;;  %6099 = vmatprep.mubr.msk.bf16.mxu1 %vm6692_vm0, %v10870_v54  ;;  %v3375_v53 = vshrl.u32 %v8681_v57, 16  ;;  %v3423_v45 = vsel %vm506_vm4, %v3420_v47, %v3422_v42  ;;  %v3424_v47 = vrot.slane %v8658_v62, 1 }
 0x1f8   : > { %4180 = vmatprep.mubr.bf16.mxu0 %v3742_v34  ;;  %v3767_v34 = vshrl.u32 %v8691_v55, 16 }
 0x1f9   : > { %v2744_v7 = vpop.f32.mrb[104].mxu1  ;;  %v3377_v20 = vor.u32 %v3375_v53, %v3373_v11 }
 0x1fa   : > { %v8709_v21 = vadd.f32 %v2744_v7, %v8084_v41  ;;  %v2746_v0 = vpop.f32.mrb[105].mxu1  ;;  %v3758_v41 = vsel %vm335_vm6, %v3753_v17, %v3757_v63  ;;  %v3769_v7 = vor.u32 %v3767_v34, %v3757_v63  ;;  %v3773_v17 = vrot.slane %v3771_v5, 1 }
 0x1fb   : > { %v2747_v50 = vpop.f32.mrb[106].mxu1  ;;  %v8731_v11 = vsel %vm335_vm6, %v3377_v20, %v3381_v22 }
 0x1fc   : > { %v8717_v51 = vadd.f32 %v2747_v50, %v8092_v24  ;;  %v2749_v8 = vpop.f32.mrb[107].mxu1  ;;  %v3733_v24 = vrot.slane %v3731_v48, 1  ;;  %v3774_v63 = vsel %vm335_vm6, %v3769_v7, %v3773_v17  ;;  %v3787_v48 = vshll.u32 %v8731_v11, 16 }
 0x1fd   : > { %v3383_v8 = vshrl.u32 %v6584_v15, 16  ;;  %v3759_v7 = vshrl.u32 %v3423_v45, 16 }
 0x1fe   : > { %6100 = vmatmul.mubr.bf16.gmra.mrb[212].mxu1 %v3718_v31  ;;  %v3747_v31 = vshll.u32 %v3423_v45, 16  ;;  %v3745_v9 = vor.u32 %v3743_v35, %v3733_v24  ;;  %v3789_v5 = vrot.slane %v3787_v48, 1  ;;  %v10938_v48 = vld [vmem:[#allocation14_spill] sm:$0xff] }
 0x1ff   : > { %4181 = vmatmul.mubr.bf16.gmra.mrb[144].mxu0 %v8645_v2  ;;  %6103 = vmatprep.mubr.msk.bf16.mxu1 %vm6692_vm0, %v10870_v54  ;;  %v3734_v2 = vsel %vm335_vm6, %v3729_v60, %v3733_v24  ;;  %v8745_v20 = vor.u32 %v3383_v8, %v3381_v22  ;;  %v10937_v24 = vld [vmem:[#allocation7_spill] sm:$0xff]  ;;  %v3799_v22 = vshrl.u32 %v8731_v11, 16 }
 0x200   : > { %4188 = vmatprep.mubr.bf16.mxu0 %v3758_v41  ;;  %v3749_v41 = vrot.slane %v3747_v31, 1 }
 0x201   : > { %v2752_v25 = vpop.f32.mrb[108].mxu1 }
 0x202   : > { %v8728_v0 = vadd.f32 %v2752_v25, %v8117_v12  ;;  %v2754_v50 = vpop.f32.mrb[109].mxu1  ;;  %v3783_v12 = vshrl.u32 %v8712_v30, 16  ;;  %v3761_v45 = vor.u32 %v3759_v7, %v3749_v41 }
 0x203   : > { %v2755_v53 = vpop.f32.mrb[110].mxu1 }
 0x204   : > { %v8735_v3 = vadd.f32 %v2755_v53, %v8129_v16  ;;  %v2757_v38 = vpop.f32.mrb[111].mxu1  ;;  %v3425_v16 = vsel %vm506_vm4, %v3422_v42, %v3424_v47  ;;  %v3785_v62 = vor.u32 %v3783_v12, %v3773_v17  ;;  %v3426_v42 = vrot.slane %v8681_v57, 1 }
 0x205   : > { %v3763_v50 = vshll.u32 %v3425_v16, 16  ;;  %v6585_v38 = vld [vmem:[%s6804_s26 + $0xb4] ss:$0 sps:$4 sm:$0xff]   ;;  %v3801_v57 = vor.u32 %v3799_v22, %v3789_v5 }
 0x206   : > { %6104 = vmatmul.mubr.bf16.gmra.mrb[216].mxu1 %v3734_v2  ;;  %v3790_v17 = vsel %vm335_vm6, %v3785_v62, %v3789_v5  ;;  %v3427_v31 = vsel %vm506_vm4, %v3424_v47, %v3426_v42  ;;  %v8770_v7 = vrot.slane %v6585_v38, 1  ;;  %v10941_v38 = vld [vmem:[#allocation8_spill] sm:$0xff] }
 0x207   : > { %4189 = vmatmul.mubr.bf16.gmra.mrb[148].mxu0 %v8668_v18  ;;  %6107 = vmatprep.mubr.msk.bf16.mxu1 %vm6692_vm0, %v10870_v54  ;;  %v3750_v18 = vsel %vm335_vm6, %v3745_v9, %v3749_v41  ;;  %v3765_v35 = vrot.slane %v3763_v50, 1 }
 0x208   : > { %4196 = vmatprep.mubr.bf16.mxu0 %v3774_v63 }
 0x209   : > { %v2760_v34 = vpop.f32.mrb[112].mxu1  ;;  %v3766_v62 = vsel %vm335_vm6, %v3761_v45, %v3765_v35 }
 0x20a   : > { %v8748_v60 = vadd.f32 %v2760_v34, %v8149_v26  ;;  %v2762_v15 = vpop.f32.mrb[113].mxu1  ;;  %v3803_v26 = vshll.u32 %v8745_v20, 16 }
 0x20b   : > { %v2763_v25 = vpop.f32.mrb[114].mxu1  ;;  %v3779_v15 = vshll.u32 %v3427_v31, 16 }
 0x20c   : > { %v8752_v53 = vadd.f32 %v2763_v25, %v10937_v24  ;;  %v2765_v2 = vpop.f32.mrb[115].mxu1  ;;  %v3805_v12 = vrot.slane %v3803_v26, 1  ;;  %v10939_v25 = vld [vmem:[#allocation6_spill] sm:$0xff]  ;;  %v3429_v24 = vsel %vm506_vm4, %v3426_v42, %v8770_v7  ;;  %v6596_v26 = vld [vmem:[%s6804_s26 + $0x1c] sm:$0xff]   ;;  %s6400_s26 = smul.u32 328, %s6782_s5  ;;  %s169_s5 = sand.u32 1, %s6680_s13  }
 0x20d   : > { %v3781_v50 = vrot.slane %v3779_v15, 1  ;;  %v3390_v45 = vrot.slane %v6596_v26, 1  ;;  %s5457_s30 = sshll.u32 %s169_s5, 1  ;;  %s5353_s11 = scalar_lea.sflag [#allocation3], %s169_s5 }
 0x20e   : > { %6108 = vmatmul.mubr.bf16.gmra.mrb[220].mxu1 %v3750_v18  ;;  %v3806_v47 = vsel %vm335_vm6, %v3801_v57, %v3805_v12  ;;  %s8882_s29 = scalar_lea.vmem %s10778_s2, %s6400_s26  ;;  %s171_s6 = scalar_lea.vmem [#allocation2], %s5457_s30 }
 0x20f   : > { %4197 = vmatmul.mubr.bf16.gmra.mrb[152].mxu0 %v8691_v55  ;;  %6111 = vmatprep.mubr.msk.bf16.mxu1 %vm6692_vm0, %v10870_v54  ;;  %v3775_v55 = vshrl.u32 %v3425_v16, 16  ;;  %v3815_v16 = vshrl.u32 %v8745_v20, 16  ;;  %s5369_s7 = sshll.u32 %s171_s6, 4  ;;  %s10736_s7 = int_to_ptr.vmem [resolvable:$true] %s5369_s7 }
 0x210   : > { %4204 = vmatprep.mubr.bf16.mxu0 %v3790_v17  ;;  %v10940_v17 = vld [vmem:[#allocation5_spill] sm:$0xff]  ;;  %s6626_s17 = scalar_lea.vmem %s10736_s7, 32  ;;  %p6633_p0 = scmp.lt.s32.totalorder %s10736_s7, %s6631_s19 }
 0x211   : > { %v2768_v63 = vpop.f32.mrb[116].mxu1  ;;  %v3777_v5 = vor.u32 %v3775_v55, %v3765_v35  ;;  %v3389_v22 = vrot.slane %v10940_v17, 1  ;;  %v3791_v35 = vshrl.u32 %v3427_v31, 16  ;;  %v3817_v15 = vor.u32 %v3815_v16, %v3805_v12  ;;  %v10944_v17 = vld [vmem:[#allocation9_spill] sm:$0xff]  ;;  %p6627_p11 = scmp.ne.s32.totalorder %s10736_s7, %s6626_s17  ;;  %p6634_p1 = scmp.lt.s32.totalorder %s6632_s20, %s6626_s17 }
 0x212   : > { %v8764_v8 = vadd.f32 %v2768_v63, %v10938_v48  ;;  %v2770_v9 = vpop.f32.mrb[117].mxu1  ;;  %v10943_v31 = vrot.slane %v8171_v59, 1 }
 0x213   : > { %v2771_v34 = vpop.f32.mrb[118].mxu1  ;;  %v3782_v48 = vsel %vm335_vm6, %v3777_v5, %v3781_v50  ;;  %v3795_v9 = vshll.u32 %v3429_v24, 16  ;;  %v3391_v42 = vsel %vm506_vm4, %v3389_v22, %v3390_v45  ;;  %p6628_p12 = pnand %p6627_p11, %p6752_p5  ;;  %p6635_p2 = por %p6634_p1, %p6633_p0 }
 0x214   : > { %v8768_v41 = vadd.f32 %v2771_v34, %v10939_v25  ;;  %v2773_v18 = vpop.f32.mrb[119].mxu1  ;;  %v10942_v34 = vld [vmem:[#allocation17_spill] sm:$0xff]  ;;  %v3793_v25 = vor.u32 %v3791_v35, %v3781_v50 }
 0x215   : > { %v3797_v18 = vrot.slane %v3795_v9, 1  ;;  %p6629_p13 = pneg %p6628_p12 }
 0x216   : > { %6112 = vmatmul.mubr.bf16.gmra.mrb[224].mxu1 %v3766_v62 }
 0x217   : > { %4205 = vmatmul.mubr.bf16.gmra.mrb[156].mxu0 %v8712_v30  ;;  %6115 = vmatprep.mubr.msk.bf16.mxu1 %vm6692_vm0, %v10870_v54  ;;  %v3798_v22 = vsel %vm335_vm6, %v3793_v25, %v3797_v18  ;;  %p6636_p3 = pnand %p6635_p2, %p6629_p13 }
 0x218   : > { %4212 = vmatprep.mubr.bf16.mxu0 %v3806_v47  ;;  %v3502_v47 = vshll.u32 %v3391_v42, 16 }
 0x219   : > { %v2776_v2 = vpop.f32.mrb[120].mxu1 }
 0x21a   : > { %v8782_v63 = vadd.f32 %v2776_v2, %v10941_v38  ;;  %v2778_v30 = vpop.f32.mrb[121].mxu1  ;;  %v3393_v2 = vsel %vm506_vm4, %v3390_v45, %v10943_v31  ;;  %v3811_v38 = vshll.u32 %v8770_v7, 16  ;;  %v3504_v35 = vrot.slane %v3502_v47, 1 }
 0x21b   : > { %v2779_v57 = vpop.f32.mrb[122].mxu1  ;;  %v10945_v30 = vld [vmem:[#allocation11_spill] sm:$0xff]  ;;  %v3507_v9 = vshll.u32 %v3393_v2, 16  ;;  %v3519_v31 = vshrl.u32 %v3393_v2, 16 }
 0x21c   : > { %v8786_v62 = vadd.f32 %v2779_v57, %v10942_v34  ;;  %v2781_v55 = vpop.f32.mrb[123].mxu1  ;;  %v3813_v45 = vrot.slane %v3811_v38, 1 }
 0x21d   : > { %v3509_v34 = vrot.slane %v3507_v9, 1 }
 0x21e   : > { %6116 = vmatmul.mubr.bf16.gmra.mrb[228].mxu1 %v3782_v48  ;;  %v3500_v48 = vshrl.u32 %v3391_v42, 16 }
 0x21f   : > { %4213 = vmatmul.mubr.bf16.gmra.mrb[160].mxu0 %v8731_v11  ;;  %6119 = vmatprep.mubr.msk.bf16.mxu1 %vm6692_vm0, %v10870_v54  ;;  %v3807_v11 = vshrl.u32 %v3429_v24, 16 }
 0x220   : > { %4220 = vmatprep.mubr.bf16.mxu0 %v3817_v15  ;;  %v3505_v24 = vor.u32 %v3504_v35, %v3500_v48 }
 0x221   : > { %v2784_v5 = vpop.f32.mrb[124].mxu1  ;;  %v3809_v59 = vor.u32 %v3807_v11, %v3797_v18 }
 0x222   : > { %v8796_v26 = vadd.f32 %v2784_v5, %v10944_v17  ;;  %v2786_v12 = vpop.f32.mrb[125].mxu1  ;;  %v3510_v5 = vsel %vm335_vm6, %v3505_v24, %v3509_v34  ;;  %v3818_v17 = vshrl.u32 %v8770_v7, 16 }
 0x223   : > { %v2787_v16 = vpop.f32.mrb[126].mxu1  ;;  %v3814_v47 = vsel %vm335_vm6, %v3809_v59, %v3813_v45 }
 0x224   : > { %v8801_v50 = vadd.f32 %v2787_v16, %v10945_v30  ;;  %v2789_v57 = vpop.f32.mrb[127].mxu1 }
 0x226   : > { %6120 = vmatmul.mubr.bf16.gmra.mrb[232].mxu1 %v3798_v22  ;;  %v3820_v22 = vor.u32 %v3818_v17, %v3813_v45  ;;  %v10946_v45 = vld [vmem:[#allocation10_spill] sm:$0xff] }
 0x227   : > { %4221 = vmatmul.mubr.bf16.gmra.mrb[164].mxu0 %v8745_v20  ;;  %6123 = vmatprep.mubr.msk.bf16.mxu1 %vm6692_vm0, %v10870_v54 }
 0x228   : > { %6047 = vmatprep.mubr.msk.bf16.mxu0 %vm6692_vm0, %v10870_v54 }
 0x229   : > { %v2792_v55 = vpop.f32.mrb[128].mxu1 }
 0x22a   : > { %v8809_v15 = vadd.f32 %v2792_v55, %v8292_v40  ;;  %v2794_v42 = vpop.f32.mrb[129].mxu1  ;;  %v3521_v40 = vor.u32 %v3519_v31, %v3509_v34  ;;  %v10949_v31 = vld [vmem:[#allocation15_spill] sm:$0xff] }
 0x22b   : > { %v2795_v25 = vpop.f32.mrb[130].mxu1 }
 0x22c   : > { %v8813_v20 = vadd.f32 %v2795_v25, %v8308_v32  ;;  %v2797_v18 = vpop.f32.mrb[131].mxu1  ;;  %v3526_v7 = vsel %vm335_vm6, %v3521_v40, %v8417_v1  ;;  %v10947_v1 = vld [vmem:[#allocation12_spill] sm:$0xff] }
 0x22e   : > { %6124 = vmatmul.mubr.bf16.gmra.mrb[236].mxu1 %v3814_v47  ;;  %v10948_v47 = vld [vmem:[#allocation13_spill] sm:$0xff] }
 0x22f   : > { %6048 = vmatmul.mubr.bf16.vlgmr.msra.gmra.mrb[84].mxu0 %v3510_v5  ;;  %6127 = vmatprep.mubr.msk.bf16.mxu1 %vm6692_vm0, %v10870_v54 }
 0x230   : > { %6051 = vmatprep.mubr.msk.bf16.mxu0 %vm6692_vm0, %v10870_v54 }
 0x231   : > { %v2800_v12 = vpop.f32.mrb[132].mxu1 }
 0x232   : > { %v8822_v16 = vadd.f32 %v2800_v12, %v8327_v13  ;;  %v2802_v32 = vpop.f32.mrb[133].mxu1  ;;  %v10950_v12 = vld [vmem:[#allocation24_spill] sm:$0xff] }
 0x233   : > { %v2803_v11 = vpop.f32.mrb[134].mxu1 }
 0x234   : > { %v8825_v2 = vadd.f32 %v2803_v11, %v8342_v19  ;;  %v2805_v38 = vpop.f32.mrb[135].mxu1 }
 0x236   : > { %6128 = vmatmul.mubr.bf16.gmra.mrb[240].mxu1 %v3820_v22 }
 0x237   : > { %6052 = vmatmul.mubr.bf16.gmra.mrb[88].mxu0 %v3526_v7 }
 0x239   : > { %v2808_v30 = vpop.f32.mrb[136].mxu1 }
 0x23a   : > { %v8830_v57 = vadd.f32 %v2808_v30, %v8368_v33  ;;  %v2810_v48 = vpop.f32.mrb[137].mxu1 }
 0x23b   : > { %v2811_v35 = vpop.f32.mrb[138].mxu1 }
 0x23c   : > { %v8833_v13 = vadd.f32 %v2811_v35, %v8380_v43  ;;  %v2813_v9 = vpop.f32.mrb[139].mxu1 }
 0x241   : > { %v2816_v59 = vpop.f32.mrb[140].mxu1 }
 0x242   : > { %v8836_v19 = vadd.f32 %v2816_v59, %v10946_v45  ;;  %v2818_v24 = vpop.f32.mrb[141].mxu1 }
 0x243   : > { %v2819_v34 = vpop.f32.mrb[142].mxu1 }
 0x244   : > { %v8839_v55 = vadd.f32 %v2819_v34, %v10947_v1  ;;  %v2821_v42 = vpop.f32.mrb[143].mxu1 }
 0x249   : > { %v2824_v25 = vpop.f32.mrb[144].mxu1 }
 0x24a   : > { %v8842_v33 = vadd.f32 %v2824_v25, %v10948_v47  ;;  %v2826_v5 = vpop.f32.mrb[145].mxu1 }
 0x24b   : > { %v2827_v18 = vpop.f32.mrb[146].mxu1 }
 0x24c   : > { %v8845_v43 = vadd.f32 %v2827_v18, %v10949_v31  ;;  %v2829_v17 = vpop.f32.mrb[147].mxu1 }
 0x251   : > { %v2832_v40 = vpop.f32.mrb[148].mxu1 }
 0x252   : > { %v8848_v32 = vadd.f32 %v2832_v40, %v10950_v12  ;;  %v2834_v22 = vpop.f32.mrb[149].mxu1 }
 0x253   : > { %v2835_v11 = vpop.f32.mrb[150].mxu1 }
 0x254   : > { %v8851_v7 = vadd.f32 %v2835_v11, %v8493_v10  ;;  %v2837_v38 = vpop.f32.mrb[151].mxu1 }
 0x259   : > { %v2840_v30 = vpop.f32.mrb[152].mxu1 }
 0x25a   : > { %v8854_v48 = vadd.f32 %v2840_v30, %v8507_v46  ;;  %v2842_v35 = vpop.f32.mrb[153].mxu1 }
 0x25b   : > { %v2843_v9 = vpop.f32.mrb[154].mxu1 }
 0x25c   : > { %v8857_v59 = vadd.f32 %v2843_v9, %v8516_v6  ;;  %v2845_v45 = vpop.f32.mrb[155].mxu1 }
 0x261   : > { %v2848_v24 = vpop.f32.mrb[156].mxu1 }
 0x262   : > { %v8860_v34 = vadd.f32 %v2848_v24, %v8530_v4  ;;  %v2850_v1 = vpop.f32.mrb[157].mxu1 }
 0x263   : > { %v2851_v42 = vpop.f32.mrb[158].mxu1 }
 0x264   : > { %v8863_v10 = vadd.f32 %v2851_v42, %v8539_v39  ;;  %v2853_v25 = vpop.f32.mrb[159].mxu1 }
 0x269   : > { %v2856_v47 = vpop.f32.mrb[160].mxu1 }
 0x26a   : > { %v8866_v46 = vadd.f32 %v2856_v47, %v8553_v23  ;;  %v4078_v5 = vpop.f32.mrb[92].mxu0  ;;  %v2858_v18 = vpop.f32.mrb[161].mxu1 }
 0x26b   : > { %v6161_v6 = vadd.f32 %v4078_v5, %v8642_v56  ;;  %v4080_v31 = vpop.f32.mrb[93].mxu0  ;;  %v2859_v17 = vpop.f32.mrb[162].mxu1 }
 0x26c   : > { %v8870_v40 = vadd.f32 %v2859_v17, %v8562_v61  ;;  %v4081_v4 = vpop.f32.mrb[94].mxu0  ;;  %v2861_v12 = vpop.f32.mrb[163].mxu1 }
 0x26d   : > { %v6165_v39 = vadd.f32 %v4081_v4, %v8651_v28  ;;  %v4083_v22 = vpop.f32.mrb[95].mxu0 }
 0x271   : > { %v2864_v11 = vpop.f32.mrb[164].mxu1 }
 0x272   : > { %v8874_v38 = vadd.f32 %v2864_v11, %v8576_v49  ;;  %v4086_v23 = vpop.f32.mrb[96].mxu0  ;;  %v2866_v30 = vpop.f32.mrb[165].mxu1 }
 0x273   : > { %v6169_v35 = vadd.f32 %v4086_v23, %v8665_v27  ;;  %v4088_v56 = vpop.f32.mrb[97].mxu0  ;;  %v2867_v9 = vpop.f32.mrb[166].mxu1 }
 0x274   : > { %v4089_v45 = vpop.f32.mrb[98].mxu0  ;;  %v2868_v24 = vpop.f32.mrb[167].mxu1 }
 0x275   : > { %v6173_v61 = vadd.f32 %v4089_v45, %v8674_v36  ;;  %v4091_v1 = vpop.f32.mrb[99].mxu0 }
 0x279   : > { %v4278_v49 = vpop.f32.mrb[168].mxu1 }
 0x27a   : > { %v4094_v28 = vpop.f32.mrb[100].mxu0  ;;  %v6162_v42 = vadd.f32 %v6161_v6, %v4278_v49  ;;  %v6057_v25 = vpop.f32.mrb[169].mxu1 }
 0x27b   : > { %v6177_v27 = vadd.f32 %v4094_v28, %v8688_v52  ;;  %v4096_v47 = vpop.f32.mrb[101].mxu0  ;;  %v4281_v5 = vpop.f32.mrb[170].mxu1 }
 0x27c   : > { %4473 = vst [vmem:[%s8882_s29 + $0x20] sm:$0xff] %v6162_v42  ;;  %v4097_v36 = vpop.f32.mrb[102].mxu0  ;;  %v6166_v18 = vadd.f32 %v6165_v39, %v4281_v5  ;;  %v6058_v31 = vpop.f32.mrb[171].mxu1 }
 0x27d   : > { %v6181_v17 = vadd.f32 %v4097_v36, %v8697_v29  ;;  %v4099_v4 = vpop.f32.mrb[103].mxu0 }
 0x27e   : > { %4474 = vst [vmem:[%s8882_s29 + $0x28] sm:$0xff] %v6166_v18 }
 0x281   : > { %v4286_v12 = vpop.f32.mrb[172].mxu1 }
 0x282   : > { %v4102_v22 = vpop.f32.mrb[104].mxu0  ;;  %v6170_v11 = vadd.f32 %v6169_v35, %v4286_v12  ;;  %v6061_v23 = vpop.f32.mrb[173].mxu1 }
 0x283   : > { %v6185_v6 = vadd.f32 %v4102_v22, %v8709_v21  ;;  %v4104_v30 = vpop.f32.mrb[105].mxu0  ;;  %v4289_v52 = vpop.f32.mrb[174].mxu1 }
 0x284   : > { %4475 = vst [vmem:[%s8882_s29 + $0x30] sm:$0xff] %v6170_v11  ;;  %v4105_v56 = vpop.f32.mrb[106].mxu0  ;;  %v6174_v9 = vadd.f32 %v6173_v61, %v4289_v52  ;;  %v6062_v45 = vpop.f32.mrb[175].mxu1 }
 0x285   : > { %v6189_v39 = vadd.f32 %v4105_v56, %v8717_v51  ;;  %v4107_v29 = vpop.f32.mrb[107].mxu0  ;;  %v4510_v51 = vlaneseq }
 0x286   : > { %4476 = vst [vmem:[%s8882_s29 + $0x38] sm:$0xff] %v6174_v9 }
 0x287   : > { %v8898_v30 = vshrl.u32 %v4510_v51, 7 }
 0x289   : > { %v4294_v24 = vpop.f32.mrb[176].mxu1  ;;  %v8903_v56 = vadd.s32 32, %v8898_v30 }
 0x28a   : > { %v4110_v1 = vpop.f32.mrb[108].mxu0  ;;  %v6178_v49 = vadd.f32 %v6177_v27, %v4294_v24  ;;  %v6065_v28 = vpop.f32.mrb[177].mxu1 }
 0x28b   : > { %v6193_v35 = vadd.f32 %v4110_v1, %v8728_v0  ;;  %v4112_v42 = vpop.f32.mrb[109].mxu0  ;;  %v4297_v21 = vpop.f32.mrb[178].mxu1 }
 0x28c   : > { %4477 = vst [vmem:[%s8882_s29 + $0x40] sm:$0xff] %v6178_v49  ;;  %v4113_v25 = vpop.f32.mrb[110].mxu0  ;;  %v6182_v47 = vadd.f32 %v6181_v17, %v4297_v21  ;;  %v6066_v5 = vpop.f32.mrb[179].mxu1  ;;  %v4556_v42 = vcvt.s32.f32 %v8903_v56 }
 0x28d   : > { %v6197_v61 = vadd.f32 %v4113_v25, %v8735_v3  ;;  %v4115_v36 = vpop.f32.mrb[111].mxu0 }
 0x28e   : > { %4478 = vst [vmem:[%s8882_s29 + $0x48] sm:$0xff] %v6182_v47  ;;  %v4597_v5 = vadd.f32 0.5, %v4556_v42 }
 0x291   : > { %v4302_v18 = vpop.f32.mrb[180].mxu1 }
 0x292   : > { %v4118_v31 = vpop.f32.mrb[112].mxu0  ;;  %v6186_v4 = vadd.f32 %v6185_v6, %v4302_v18  ;;  %v6069_v27 = vpop.f32.mrb[181].mxu1 }
 0x293   : > { %v6201_v12 = vadd.f32 %v4118_v31, %v8748_v60  ;;  %v4120_v0 = vpop.f32.mrb[113].mxu0  ;;  %v4305_v22 = vpop.f32.mrb[182].mxu1  ;;  %v8906_v60 = vadd.s32 40, %v8898_v30 }
 0x294   : > { %4479 = vst [vmem:[%s8882_s29 + $0x50] sm:$0xff] %v6186_v4  ;;  %v4121_v11 = vpop.f32.mrb[114].mxu0  ;;  %v6190_v23 = vadd.f32 %v6189_v39, %v4305_v22  ;;  %v6070_v17 = vpop.f32.mrb[183].mxu1 }
 0x295   : > { %v6205_v3 = vadd.f32 %v4121_v11, %v8752_v53  ;;  %v4123_v52 = vpop.f32.mrb[115].mxu0  ;;  %v4557_v47 = vcvt.s32.f32 %v8906_v60  ;;  %v8928_v60 = vadd.s32 64, %v8898_v30 }
 0x296   : > { %4480 = vst [vmem:[%s8882_s29 + $0x58] sm:$0xff] %v6190_v23  ;;  %v4639_v23 = vmul.f32 0.055555556, %v4597_v5 }
 0x297   : > { %v4598_v36 = vadd.f32 0.5, %v4557_v47 }
 0x299   : > { %v4310_v6 = vpop.f32.mrb[184].mxu1  ;;  %v4640_v56 = vmul.f32 0.055555556, %v4598_v36 }
 0x29a   : > { %v4126_v9 = vpop.f32.mrb[116].mxu0  ;;  %v6194_v45 = vadd.f32 %v6193_v35, %v4310_v6  ;;  %v6073_v29 = vpop.f32.mrb[185].mxu1  ;;  %v8915_v35 = vadd.s32 48, %v8898_v30  ;;  %v4680_v6 = vfloor.f32 %v4639_v23 }
 0x29b   : > { %v6209_v39 = vadd.f32 %v4126_v9, %v8764_v8  ;;  %v4128_v24 = vpop.f32.mrb[117].mxu0  ;;  %v4313_v1 = vpop.f32.mrb[186].mxu1 }
 0x29c   : > { %4481 = vst [vmem:[%s8882_s29 + $0x60] sm:$0xff] %v6194_v45  ;;  %v4129_v49 = vpop.f32.mrb[118].mxu0  ;;  %v6198_v53 = vadd.f32 %v6197_v61, %v4313_v1  ;;  %v6074_v28 = vpop.f32.mrb[187].mxu1  ;;  %vm4803_vm7 = vcmp.ge.f32.partialorder %v4680_v6, 1.0  ;;  %vm4844_vm8 = vcmp.le.f32.partialorder %v4680_v6, 16.0 }
 0x29d   : > { %v6213_v21 = vadd.f32 %v4129_v49, %v8768_v41  ;;  %v4131_v25 = vpop.f32.mrb[119].mxu0  ;;  %v4558_v41 = vcvt.s32.f32 %v8915_v35  ;;  %vm4885_vm11 = vmand %vm4803_vm7, %vm4844_vm8 }
 0x29e   : > { %4482 = vst [vmem:[%s8882_s29 + $0x68] sm:$0xff] %v6198_v53 }
 0x2a1   : > { %v4318_v8 = vpop.f32.mrb[188].mxu1 }
 0x2a2   : > { %v4134_v51 = vpop.f32.mrb[120].mxu0  ;;  %v6202_v18 = vadd.f32 %v6201_v12, %v4318_v8  ;;  %v6077_v61 = vpop.f32.mrb[189].mxu1  ;;  %v4599_v12 = vadd.f32 0.5, %v4558_v41 }
 0x2a3   : > { %v6217_v31 = vadd.f32 %v4134_v51, %v8782_v63  ;;  %v4136_v4 = vpop.f32.mrb[121].mxu0  ;;  %v4321_v27 = vpop.f32.mrb[190].mxu1  ;;  %v8925_v63 = vadd.s32 56, %v8898_v30  ;;  %v4721_v51 = vmul.f32 18.0, %v4680_v6 }
 0x2a4   : > { %4483 = vst [vmem:[%s8882_s29 + $0x70] sm:$0xff] %v6202_v18  ;;  %v4137_v0 = vpop.f32.mrb[122].mxu0  ;;  %v6206_v22 = vadd.f32 %v6205_v3, %v4321_v27  ;;  %v6078_v11 = vpop.f32.mrb[191].mxu1  ;;  %v4681_v3 = vfloor.f32 %v4640_v56  ;;  %v4641_v28 = vmul.f32 0.055555556, %v4599_v12  ;;  %v4560_v18 = vcvt.s32.f32 %v8928_v60 }
 0x2a5   : > { %v6221_v17 = vadd.f32 %v4137_v0, %v8786_v62  ;;  %v4139_v52 = vpop.f32.mrb[123].mxu0  ;;  %v8931_v62 = vadd.s32 72, %v8898_v30  ;;  %v4559_v25 = vcvt.s32.f32 %v8925_v63  ;;  %v8947_v11 = vadd.s32 80, %v8898_v30 }
 0x2a6   : > { %4484 = vst [vmem:[%s8882_s29 + $0x78] sm:$0xff] %v6206_v22  ;;  %v4722_v4 = vmul.f32 18.0, %v4681_v3  ;;  %v4682_v27 = vfloor.f32 %v4641_v28  ;;  %v4762_v22 = vsub.f32 %v4556_v42, %v4721_v51  ;;  %vm4804_vm9 = vcmp.ge.f32.partialorder %v4681_v3, 1.0 }
 0x2a7   : > { %v4600_v0 = vadd.f32 0.5, %v4559_v25  ;;  %vm4845_vm10 = vcmp.le.f32.partialorder %v4681_v3, 16.0  ;;  %v9036_v63 = vadd.s32 112, %v8898_v30 }
 0x2a8   : > { %vm4926_vm12 = vcmp.ge.f32.partialorder %v4762_v22, 1.0  ;;  %vm4886_vm13 = vmand %vm4804_vm9, %vm4845_vm10  ;;  %vm5008_vm0 = vcmp.le.f32.partialorder %v4762_v22, 16.0  ;;  %vm4805_vm3 = vcmp.ge.f32.partialorder %v4682_v27, 1.0  ;;  %vm4846_vm4 = vcmp.le.f32.partialorder %v4682_v27, 16.0 }
 0x2a9   : > { %v4326_v9 = vpop.f32.mrb[192].mxu1  ;;  %vm4967_vm15 = vmand %vm4885_vm11, %vm4926_vm12 }
 0x2aa   : > { %v4142_v45 = vpop.f32.mrb[124].mxu0  ;;  %v6210_v29 = vadd.f32 %v6209_v39, %v4326_v9  ;;  %v6081_v24 = vpop.f32.mrb[193].mxu1  ;;  %vm8976_vm5 = vmand %vm4967_vm15, %vm5008_vm0 }
 0x2ab   : > { %v6225_v1 = vadd.f32 %v4142_v45, %v8796_v26  ;;  %v4144_v49 = vpop.f32.mrb[125].mxu0  ;;  %v4329_v53 = vpop.f32.mrb[194].mxu1  ;;  %v4561_v26 = vcvt.s32.f32 %v8931_v62  ;;  %v4723_v24 = vmul.f32 18.0, %v4682_v27  ;;  %vm4887_vm8 = vmand %vm4805_vm3, %vm4846_vm4 }
 0x2ac   : > { %4485 = vst [vmem:[%s8882_s29 + $0x80] sm:$0xff] %v6210_v29  ;;  %v4145_v5 = vpop.f32.mrb[126].mxu0  ;;  %v6214_v8 = vadd.f32 %v6213_v21, %v4329_v53  ;;  %v6082_v36 = vpop.f32.mrb[195].mxu1  ;;  %v4601_v21 = vadd.f32 0.5, %v4560_v18  ;;  %v4642_v49 = vmul.f32 0.055555556, %v4600_v0 }
 0x2ad   : > { %v8938_v39 = vadd.f32 %v4145_v5, %v8801_v50  ;;  %v4147_v61 = vpop.f32.mrb[127].mxu0  ;;  %v4763_v50 = vsub.f32 %v4557_v47, %v4722_v4  ;;  %v4602_v9 = vadd.f32 0.5, %v4561_v26  ;;  %v4562_v5 = vcvt.s32.f32 %v8947_v11 }
 0x2ae   : > { %4486 = vst [vmem:[%s8882_s29 + $0x88] sm:$0xff] %v6214_v8  ;;  %v8966_v6 = vfloor.f32 %v4642_v49  ;;  %v9003_v49 = vsel %vm8976_vm5, 1.0, %v10870_v54 }
 0x2af   : > { %vm4927_vm14 = vcmp.ge.f32.partialorder %v4763_v50, 1.0  ;;  %v4644_v36 = vmul.f32 0.055555556, %v4602_v9  ;;  %vm5009_vm2 = vcmp.le.f32.partialorder %v4763_v50, 16.0  ;;  %v4603_v3 = vadd.f32 0.5, %v4562_v5  ;;  %10955 = vst [vmem:[#allocation18_spill] sm:$0xff] %v9003_v49 }
 0x2b0   : > { %vm8968_vm1 = vmand %vm4886_vm13, %vm4927_vm14  ;;  %vm4806_vm11 = vcmp.ge.f32.partialorder %v8966_v6, 1.0  ;;  %vm4847_vm12 = vcmp.le.f32.partialorder %v8966_v6, 16.0 }
 0x2b1   : > { %v4334_v23 = vpop.f32.mrb[196].mxu1  ;;  %v8980_v22 = vfloor.f32 %v4644_v36  ;;  %vm5050_vm6 = vmand %vm8968_vm1, %vm5009_vm2  ;;  %v4645_v9 = vmul.f32 0.055555556, %v4603_v3 }
 0x2b2   : > { %v4150_v52 = vpop.f32.mrb[128].mxu0  ;;  %v6218_v56 = vadd.f32 %v6217_v31, %v4334_v23  ;;  %v6085_v12 = vpop.f32.mrb[197].mxu1  ;;  %v4643_v31 = vmul.f32 0.055555556, %v4601_v21  ;;  %vm9066_vm2 = vmand %vm4806_vm11, %vm4847_vm12 }
 0x2b3   : > { %v8952_v42 = vadd.f32 %v4150_v52, %v8809_v15  ;;  %v4152_v45 = vpop.f32.mrb[129].mxu0  ;;  %v4337_v29 = vpop.f32.mrb[198].mxu1  ;;  %v4724_v52 = vmul.f32 18.0, %v8966_v6  ;;  %v4726_v27 = vmul.f32 18.0, %v8980_v22  ;;  %vm4808_vm0 = vcmp.ge.f32.partialorder %v8980_v22, 1.0 }
 0x2b4   : > { %4487 = vst [vmem:[%s8882_s29 + $0x90] sm:$0xff] %v6218_v56  ;;  %v4153_v53 = vpop.f32.mrb[130].mxu0  ;;  %v6222_v28 = vadd.f32 %v6221_v17, %v4337_v29  ;;  %v6086_v47 = vpop.f32.mrb[199].mxu1  ;;  %v4764_v17 = vsub.f32 %v4558_v41, %v4723_v24  ;;  %v8994_v45 = vadd.s32 88, %v8898_v30  ;;  %vm4849_vm1 = vcmp.le.f32.partialorder %v8980_v22, 16.0 }
 0x2b5   : > { %v8959_v8 = vadd.f32 %v4153_v53, %v8813_v20  ;;  %v4155_v15 = vpop.f32.mrb[131].mxu0  ;;  %v8972_v20 = vfloor.f32 %v4643_v31  ;;  %v9010_v53 = vadd.s32 96, %v8898_v30  ;;  %v9023_v47 = vadd.s32 104, %v8898_v30 }
 0x2b6   : > { %4488 = vst [vmem:[%s8882_s29 + $0x98] sm:$0xff] %v6222_v28  ;;  %vm4928_vm7 = vcmp.ge.f32.partialorder %v4764_v17, 1.0  ;;  %vm5010_vm10 = vcmp.le.f32.partialorder %v4764_v17, 16.0  ;;  %v9030_v15 = vfloor.f32 %v4645_v9  ;;  %v10851_v36 = vcvt.s32.f32 %v8994_v45 }
 0x2b7   : > { %vm9013_vm9 = vmand %vm4887_vm8, %vm4928_vm7  ;;  %vm4807_vm13 = vcmp.ge.f32.partialorder %v8972_v20, 1.0  ;;  %vm4848_vm14 = vcmp.le.f32.partialorder %v8972_v20, 16.0  ;;  %v10847_v17 = vcvt.s32.f32 %v9023_v47  ;;  %v9058_v41 = vadd.s32 120, %v8898_v30 }
 0x2b8   : > { %vm9042_vm15 = vmand %vm9013_vm9, %vm5010_vm10  ;;  %v9109_v9 = vadd.s32 136, %v8898_v30 }
 0x2b9   : > { %v4342_v61 = vpop.f32.mrb[200].mxu1  ;;  %vm9086_vm4 = vmand %vm4807_vm13, %vm4848_vm14  ;;  %v4606_v22 = vadd.f32 0.5, %v10847_v17  ;;  %vm4809_vm14 = vcmp.ge.f32.partialorder %v9030_v15, 1.0 }
 0x2ba   : > { %v4158_v4 = vpop.f32.mrb[132].mxu0  ;;  %v6226_v0 = vadd.f32 %v6225_v1, %v4342_v61  ;;  %v6089_v35 = vpop.f32.mrb[201].mxu1  ;;  %vm9101_vm7 = vmand %vm4808_vm0, %vm4849_vm1  ;;  %vm4850_vm0 = vcmp.le.f32.partialorder %v9030_v15, 16.0 }
 0x2bb   : > { %v8983_v21 = vadd.f32 %v4158_v4, %v8822_v16  ;;  %v4160_v23 = vpop.f32.mrb[133].mxu0  ;;  %v4345_v50 = vpop.f32.mrb[202].mxu1  ;;  %v4725_v16 = vmul.f32 18.0, %v8972_v20  ;;  %v10850_v4 = vcvt.s32.f32 %v9010_v53 }
 0x2bc   : > { %4489 = vst [vmem:[%s8882_s29 + $0xa0] sm:$0xff] %v6226_v0  ;;  %v4161_v1 = vpop.f32.mrb[134].mxu0  ;;  %v6230_v56 = vadd.f32 %v8938_v39, %v4345_v50  ;;  %v6090_v12 = vpop.f32.mrb[203].mxu1  ;;  %v9006_v39 = vsel %vm5050_vm6, 1.0, %v10870_v54  ;;  %v4727_v50 = vmul.f32 18.0, %v9030_v15 }
 0x2bd   : > { %v8997_v29 = vadd.f32 %v4161_v1, %v8825_v2  ;;  %v4163_v24 = vpop.f32.mrb[135].mxu0  ;;  %10956 = vst [vmem:[#allocation19_spill] sm:$0xff] %v9006_v39  ;;  %v9019_v2 = vsub.f32 %v4559_v25, %v4724_v52  ;;  %v9028_v31 = vsub.f32 %v4560_v18, %v4725_v16  ;;  %v9048_v18 = vsub.f32 %v4561_v26, %v4726_v27 }
 0x2be   : > { %4490 = vst [vmem:[%s8882_s29 + $0xa8] sm:$0xff] %v6230_v56  ;;  %v4604_v52 = vadd.f32 0.5, %v10851_v36  ;;  %v9080_v56 = vsel %vm9042_vm15, 1.0, %v10870_v54  ;;  %v10846_v12 = vcvt.s32.f32 %v9036_v63  ;;  %v4605_v16 = vadd.f32 0.5, %v10850_v4 }
 0x2bf   : > { %vm4929_vm3 = vcmp.ge.f32.partialorder %v9019_v2, 1.0  ;;  %10963 = vst [vmem:[#allocation20_spill] sm:$0xff] %v9080_v56  ;;  %vm4930_vm5 = vcmp.ge.f32.partialorder %v9028_v31, 1.0  ;;  %vm5011_vm6 = vcmp.le.f32.partialorder %v9019_v2, 16.0  ;;  %vm4931_vm8 = vcmp.ge.f32.partialorder %v9048_v18, 1.0 }
 0x2c0   : > { %vm9115_vm9 = vmand %vm9066_vm2, %vm4929_vm3  ;;  %vm5012_vm10 = vcmp.le.f32.partialorder %v9028_v31, 16.0  ;;  %vm5013_vm11 = vcmp.le.f32.partialorder %v9048_v18, 16.0  ;;  %v10845_v27 = vcvt.s32.f32 %v9058_v41  ;;  %v4607_v11 = vadd.f32 0.5, %v10846_v12 }
 0x2c1   : > { %v4350_v51 = vpop.f32.mrb[204].mxu1  ;;  %vm9126_vm12 = vmand %vm9086_vm4, %vm4930_vm5  ;;  %v4648_v2 = vmul.f32 0.055555556, %v4606_v22 }
 0x2c2   : > { %v4166_v25 = vpop.f32.mrb[136].mxu0  ;;  %v6234_v3 = vadd.f32 %v8952_v42, %v4350_v51  ;;  %v6093_v61 = vpop.f32.mrb[205].mxu1  ;;  %v9132_v51 = vsub.f32 %v4562_v5, %v4727_v50  ;;  %vm9142_vm13 = vmand %vm9101_vm7, %vm4931_vm8  ;;  %v10843_v50 = vcvt.s32.f32 %v9109_v9  ;;  %v4608_v20 = vadd.f32 0.5, %v10845_v27 }
 0x2c3   : > { %v9053_v0 = vadd.f32 %v4166_v25, %v8830_v57  ;;  %v4168_v42 = vpop.f32.mrb[137].mxu0  ;;  %v4353_v35 = vpop.f32.mrb[206].mxu1  ;;  %v4646_v25 = vmul.f32 0.055555556, %v4604_v52  ;;  %v9138_v61 = vadd.s32 152, %v8898_v30  ;;  %vm9155_vm15 = vmand %vm9115_vm9, %vm5011_vm6 }
 0x2c4   : > { %4491 = vst [vmem:[%s8882_s29 + $0xb0] sm:$0xff] %v6234_v3  ;;  %v4169_v62 = vpop.f32.mrb[138].mxu0  ;;  %v6238_v26 = vadd.f32 %v8959_v8, %v4353_v35  ;;  %v6094_v23 = vpop.f32.mrb[207].mxu1  ;;  %v9135_v3 = vadd.s32 144, %v8898_v30  ;;  %v4647_v57 = vmul.f32 0.055555556, %v4605_v16  ;;  %vm9168_vm1 = vmand %vm9126_vm12, %vm5012_vm10 }
 0x2c5   : > { %v9075_v1 = vadd.f32 %v4169_v62, %v8833_v13  ;;  %v4171_v8 = vpop.f32.mrb[139].mxu0  ;;  %v9093_v13 = vadd.s32 128, %v8898_v30  ;;  %v9175_v16 = vadd.s32 160, %v8898_v30  ;;  %vm9183_vm2 = vmand %vm9142_vm13, %vm5013_vm11  ;;  %v10849_v28 = vcvt.s32.f32 %v9138_v61 }
 0x2c6   : > { %4492 = vst [vmem:[%s8882_s29 + $0xb8] sm:$0xff] %v6238_v26  ;;  %v10848_v22 = vcvt.s32.f32 %v9135_v3  ;;  %vm4891_vm3 = vmand %vm4809_vm14, %vm4850_vm0  ;;  %vm4932_vm4 = vcmp.ge.f32.partialorder %v9132_v51, 1.0  ;;  %v9200_v18 = vfloor.f32 %v4646_v25  ;;  %v4649_v42 = vmul.f32 0.055555556, %v4607_v11 }
 0x2c7   : > { %v10844_v5 = vcvt.s32.f32 %v9093_v13  ;;  %v9215_v15 = vfloor.f32 %v4647_v57  ;;  %v4610_v25 = vadd.f32 0.5, %v10843_v50  ;;  %v9222_v11 = vsel %vm9183_vm2, 1.0, %v10870_v54  ;;  %vm9227_vm5 = vmand %vm4891_vm3, %vm4932_vm4 }
 0x2c8   : > { %10982 = vst [vmem:[#allocation23_spill] sm:$0xff] %v9222_v11  ;;  %v4650_v23 = vmul.f32 0.055555556, %v4608_v20  ;;  %vm5014_vm6 = vcmp.le.f32.partialorder %v9132_v51, 16.0  ;;  %v4611_v57 = vadd.f32 0.5, %v10848_v22  ;;  %v9238_v20 = vfloor.f32 %v4649_v42 }
 0x2c9   : > { %v4358_v60 = vpop.f32.mrb[208].mxu1  ;;  %v4729_v12 = vmul.f32 18.0, %v9215_v15  ;;  %v4652_v17 = vmul.f32 0.055555556, %v4610_v25  ;;  %v9243_v22 = vadd.s32 176, %v8898_v30  ;;  %vm9252_vm7 = vmand %vm9227_vm5, %vm5014_vm6  ;;  %vm4810_vm8 = vcmp.ge.f32.partialorder %v9200_v18, 1.0 }
 0x2ca   : > { %v4174_v35 = vpop.f32.mrb[140].mxu0  ;;  %v6242_v62 = vadd.f32 %v8983_v21, %v4358_v60  ;;  %v6097_v26 = vpop.f32.mrb[209].mxu1  ;;  %v4612_v21 = vadd.f32 0.5, %v10849_v28  ;;  %v4653_v51 = vmul.f32 0.055555556, %v4611_v57  ;;  %vm4851_vm9 = vcmp.le.f32.partialorder %v9200_v18, 16.0 }
 0x2cb   : > { %v9162_v52 = vadd.f32 %v4174_v35, %v8836_v19  ;;  %v4176_v8 = vpop.f32.mrb[141].mxu0  ;;  %v4361_v6 = vpop.f32.mrb[210].mxu1  ;;  %v9190_v35 = vadd.s32 168, %v8898_v30  ;;  %v4609_v26 = vadd.f32 0.5, %v10844_v5  ;;  %v10989_v57 = vcvt.s32.f32 %v9010_v53  ;;  %vm9397_vm5 = vmand %vm4810_vm8, %vm4851_vm9 }
 0x2cc   : > { %4493 = vst [vmem:[%s8882_s29 + $0xc0] sm:$0xff] %v6242_v62  ;;  %v4177_v19 = vpop.f32.mrb[142].mxu0  ;;  %v6246_v24 = vadd.f32 %v8997_v29, %v4361_v6  ;;  %v6098_v60 = vpop.f32.mrb[211].mxu1  ;;  %v9213_v8 = vsel %vm9168_vm1, 1.0, %v10870_v54  ;;  %v9224_v6 = vfloor.f32 %v4648_v2  ;;  %v4728_v2 = vmul.f32 18.0, %v9200_v18 }
 0x2cd   : > { %v9193_v62 = vadd.f32 %v4177_v19, %v8839_v55  ;;  %v4179_v29 = vpop.f32.mrb[143].mxu0  ;;  %v9208_v55 = vsel %vm9155_vm15, 1.0, %v10870_v54  ;;  %10981 = vst [vmem:[#allocation22_spill] sm:$0xff] %v9213_v8  ;;  %v10852_v19 = vcvt.s32.f32 %v9175_v16  ;;  %v10853_v60 = vcvt.s32.f32 %v9190_v35 }
 0x2ce   : > { %4494 = vst [vmem:[%s8882_s29 + $0xc8] sm:$0xff] %v6246_v24  ;;  %10980 = vst [vmem:[#allocation21_spill] sm:$0xff] %v9208_v55  ;;  %v4651_v29 = vmul.f32 0.055555556, %v4609_v26  ;;  %v4654_v25 = vmul.f32 0.055555556, %v4612_v21  ;;  %v9294_v21 = vsub.f32 %v10989_v57, %v4729_v12  ;;  %v10991_v53 = vcvt.s32.f32 %v9036_v63 }
 0x2cf   : > { %v4613_v26 = vadd.f32 0.5, %v10852_v19  ;;  %v4614_v24 = vadd.f32 0.5, %v10853_v60  ;;  %v4731_v19 = vmul.f32 18.0, %v9238_v20  ;;  %v9298_v42 = vadd.s32 200, %v8898_v30 }
 0x2d0   : > { %vm4811_vm10 = vcmp.ge.f32.partialorder %v9215_v15, 1.0  ;;  %vm4852_vm11 = vcmp.le.f32.partialorder %v9215_v15, 16.0  ;;  %vm4812_vm13 = vcmp.ge.f32.partialorder %v9224_v6, 1.0  ;;  %vm4853_vm14 = vcmp.le.f32.partialorder %v9224_v6, 16.0 }
 0x2d1   : > { %v4366_v31 = vpop.f32.mrb[212].mxu1  ;;  %v9312_v12 = vsub.f32 %v10991_v53, %v4731_v19  ;;  %vm4813_vm15 = vcmp.ge.f32.partialorder %v9238_v20, 1.0  ;;  %vm4854_vm0 = vcmp.le.f32.partialorder %v9238_v20, 16.0  ;;  %v9413_v55 = vadd.s32 216, %v8898_v30  ;;  %vm9421_vm8 = vmand %vm4811_vm10, %vm4852_vm11 }
 0x2d2   : > { %v4182_v50 = vpop.f32.mrb[144].mxu0  ;;  %v6250_v5 = vadd.f32 %v9053_v0, %v4366_v31  ;;  %v6101_v27 = vpop.f32.mrb[213].mxu1  ;;  %v4730_v0 = vmul.f32 18.0, %v9224_v6  ;;  %vm9451_vm9 = vmand %vm4812_vm13, %vm4853_vm14  ;;  %vm11016_vm1 = vcmp.ge.f32.partialorder %v9294_v21, 1.0  ;;  %v11035_v6 = vcvt.s32.f32 %v9243_v22 }
 0x2d3   : > { %v9246_v28 = vadd.f32 %v4182_v50, %v8842_v33  ;;  %v4184_v4 = vpop.f32.mrb[145].mxu0  ;;  %v4369_v36 = vpop.f32.mrb[214].mxu1  ;;  %v9257_v27 = vfloor.f32 %v4650_v23  ;;  %v10987_v23 = vcvt.s32.f32 %v8994_v45  ;;  %v9288_v45 = vadd.s32 192, %v8898_v30  ;;  %vm9495_vm11 = vmand %vm9421_vm8, %vm11016_vm1 }
 0x2d4   : > { %4495 = vst [vmem:[%s8882_s29 + $0xd0] sm:$0xff] %v6250_v5  ;;  %v4185_v33 = vpop.f32.mrb[146].mxu0  ;;  %v6254_v4 = vadd.f32 %v9075_v1, %v4369_v36  ;;  %v6102_v50 = vpop.f32.mrb[215].mxu1  ;;  %v9273_v5 = vfloor.f32 %v4651_v29  ;;  %v9276_v36 = vadd.s32 184, %v8898_v30  ;;  %v9282_v1 = vsel %vm9252_vm7, 1.0, %v10870_v54 }
 0x2d5   : > { %v9266_v31 = vadd.f32 %v4185_v33, %v8845_v43  ;;  %v4187_v11 = vpop.f32.mrb[147].mxu0  ;;  %v9270_v8 = vsub.f32 %v10987_v23, %v4728_v2  ;;  %10988 = vst [vmem:[#allocation26_spill] sm:$0xff] %v9282_v1  ;;  %v9284_v43 = vfloor.f32 %v4652_v17  ;;  %v4732_v2 = vmul.f32 18.0, %v9257_v27 }
 0x2d6   : > { %4496 = vst [vmem:[%s8882_s29 + $0xd8] sm:$0xff] %v6254_v4  ;;  %v10854_v11 = vcvt.s32.f32 %v9243_v22  ;;  %v4655_v29 = vmul.f32 0.055555556, %v4613_v26  ;;  %v10990_v17 = vcvt.s32.f32 %v9023_v47  ;;  %v9304_v4 = vfloor.f32 %v4653_v51 }
 0x2d7   : > { %v9306_v50 = vfloor.f32 %v4654_v25  ;;  %v4656_v23 = vmul.f32 0.055555556, %v4614_v24  ;;  %v4733_v26 = vmul.f32 18.0, %v9273_v5  ;;  %vm4933_vm12 = vcmp.ge.f32.partialorder %v9270_v8, 1.0 }
 0x2d8   : > { %v9302_v33 = vsub.f32 %v10990_v17, %v4730_v0  ;;  %v4734_v24 = vmul.f32 18.0, %v9284_v43  ;;  %v4615_v63 = vadd.f32 0.5, %v10854_v11  ;;  %v10855_v11 = vcvt.s32.f32 %v9298_v42  ;;  %vm9442_vm10 = vmand %vm9397_vm5, %vm4933_vm12 }
 0x2d9   : > { %v4374_v60 = vpop.f32.mrb[216].mxu1  ;;  %v4736_v47 = vmul.f32 18.0, %v9306_v50  ;;  %v9341_v1 = vfloor.f32 %v4656_v23  ;;  %vm4855_vm3 = vcmp.le.f32.partialorder %v9257_v27, 16.0  ;;  %vm4936_vm7 = vcmp.ge.f32.partialorder %v9312_v12, 1.0  ;;  %vm9467_vm12 = vmand %vm4813_vm15, %vm4854_vm0 }
 0x2da   : > { %v4190_v0 = vpop.f32.mrb[148].mxu0  ;;  %v6258_v51 = vadd.f32 %v9162_v52, %v4374_v60  ;;  %v6105_v25 = vpop.f32.mrb[217].mxu1  ;;  %v10992_v60 = vcvt.s32.f32 %v9058_v41  ;;  %vm4858_vm6 = vcmp.le.f32.partialorder %v9304_v4, 16.0  ;;  %vm11013_vm14 = vcmp.ge.f32.partialorder %v9257_v27, 1.0 }
 0x2db   : > { %v9325_v57 = vadd.f32 %v4190_v0, %v8848_v32  ;;  %v4192_v17 = vpop.f32.mrb[149].mxu0  ;;  %v4377_v52 = vpop.f32.mrb[218].mxu1  ;;  %v9333_v25 = vfloor.f32 %v4655_v29  ;;  %v10993_v29 = vcvt.s32.f32 %v9093_v13  ;;  %v4657_v13 = vmul.f32 0.055555556, %v4615_v63  ;;  %vm9482_vm5 = vmand %vm11013_vm14, %vm4855_vm3 }
 0x2dc   : > { %v9331_v53 = vsub.f32 %v10992_v60, %v4732_v2  ;;  %4497 = vst [vmem:[%s8882_s29 + $0xe0] sm:$0xff] %v6258_v51  ;;  %v4193_v19 = vpop.f32.mrb[150].mxu0  ;;  %v6262_v32 = vadd.f32 %v9193_v62, %v4377_v52  ;;  %v6106_v0 = vpop.f32.mrb[219].mxu1  ;;  %v4735_v17 = vmul.f32 18.0, %v9304_v4  ;;  %v10994_v51 = vcvt.s32.f32 %v9276_v36 }
 0x2dd   : > { %v9344_v41 = vadd.f32 %v4193_v19, %v8851_v7  ;;  %v4195_v2 = vpop.f32.mrb[151].mxu0  ;;  %v9350_v62 = vsub.f32 %v10993_v29, %v4733_v26  ;;  %v9356_v60 = vadd.s32 8, %v8898_v30  ;;  %v10995_v7 = vcvt.s32.f32 %v9109_v9 }
 0x2de   : > { %v4616_v52 = vadd.f32 0.5, %v10994_v51  ;;  %4498 = vst [vmem:[%s8882_s29 + $0xe8] sm:$0xff] %v6262_v32  ;;  %v10996_v26 = vcvt.s32.f32 %v9288_v45  ;;  %vm4937_vm2 = vcmp.ge.f32.partialorder %v9331_v53, 1.0  ;;  %v4737_v32 = vmul.f32 18.0, %v9333_v25 }
 0x2df   : > { %v9363_v23 = vsub.f32 %v10995_v7, %v4734_v24  ;;  %v4618_v0 = vadd.f32 0.5, %v10855_v11  ;;  %v10997_v9 = vcvt.s32.f32 %v9135_v3  ;;  %v10998_v63 = vcvt.s32.f32 %v9138_v61 }
 0x2e0   : > { %v4617_v19 = vadd.f32 0.5, %v10996_v26  ;;  %v4738_v29 = vmul.f32 18.0, %v9341_v1  ;;  %v4658_v3 = vmul.f32 0.055555556, %v4616_v52  ;;  %v9402_v52 = vfloor.f32 %v4657_v13 }
 0x2e1   : > { %v9376_v24 = vsub.f32 %v10997_v9, %v4735_v17  ;;  %v9382_v2 = vsub.f32 %v10998_v63, %v4736_v47  ;;  %v4382_v51 = vpop.f32.mrb[220].mxu1  ;;  %v9389_v17 = vadd.s32 208, %v8898_v30  ;;  %v4660_v18 = vmul.f32 0.055555556, %v4618_v0 }
 0x2e2   : > { %v4198_v26 = vpop.f32.mrb[152].mxu0  ;;  %v6266_v9 = vadd.f32 %v9246_v28, %v4382_v51  ;;  %v6109_v61 = vpop.f32.mrb[221].mxu1  ;;  %v4659_v11 = vmul.f32 0.055555556, %v4617_v19  ;;  %vm4860_vm13 = vcmp.le.f32.partialorder %v9333_v25, 16.0  ;;  %vm11019_vm0 = vcmp.ge.f32.partialorder %v9302_v33, 1.0 }
 0x2e3   : > { %v9405_v7 = vadd.f32 %v4198_v26, %v8854_v48  ;;  %v4200_v28 = vpop.f32.mrb[153].mxu0  ;;  %v4385_v51 = vpop.f32.mrb[222].mxu1  ;;  %v11001_v61 = vcvt.s32.f32 %v9175_v16  ;;  %v11004_v16 = vcvt.s32.f32 %v9190_v35  ;;  %v11005_v26 = vcvt.s32.f32 %v8898_v30  ;;  %vm9507_vm4 = vmand %vm9451_vm9, %vm11019_vm0 }
 0x2e4   : > { %4499 = vst [vmem:[%s8882_s29 + $0xf0] sm:$0xff] %v6266_v9  ;;  %v4201_v56 = vpop.f32.mrb[154].mxu0  ;;  %v6270_v13 = vadd.f32 %v9266_v31, %v4385_v51  ;;  %v6110_v19 = vpop.f32.mrb[223].mxu1  ;;  %v9436_v28 = vadd.s32 16, %v8898_v30  ;;  %v10856_v35 = vcvt.s32.f32 %v9389_v17  ;;  %v4739_v51 = vmul.f32 18.0, %v9402_v52  ;;  %vm9530_vm9 = vmand %vm9467_vm12, %vm4936_vm7 }
 0x2e5   : > { %v9410_v47 = vsub.f32 %v11001_v61, %v4737_v32  ;;  %v9428_v32 = vsub.f32 %v11004_v16, %v4738_v29  ;;  %v9431_v0 = vadd.f32 %v4201_v56, %v8857_v59  ;;  %v4203_v31 = vpop.f32.mrb[155].mxu0  ;;  %v4593_v9 = vadd.f32 0.5, %v11005_v26 }
 0x2e6   : > { %v9457_v56 = vfloor.f32 %v4658_v3  ;;  %4500 = vst [vmem:[%s8882_s29 + $0xf8] sm:$0xff] %v6270_v13  ;;  %v11010_v29 = vcvt.s32.f32 %v9356_v60  ;;  %v9473_v3 = vfloor.f32 %v4659_v11  ;;  %v9476_v61 = vadd.s32 24, %v8898_v30 }
 0x2e7   : > { %v9488_v20 = vfloor.f32 %v4660_v18  ;;  %v4635_v16 = vmul.f32 0.055555556, %v4593_v9  ;;  %vm11022_vm8 = vcmp.le.f32.partialorder %v9273_v5, 16.0  ;;  %vm11023_vm3 = vcmp.ge.f32.partialorder %v9273_v5, 1.0 }
 0x2e8   : > { %v4594_v63 = vadd.f32 0.5, %v11010_v29  ;;  %vm9516_vm14 = vmand %vm11023_vm3, %vm11022_vm8  ;;  %v4740_v26 = vmul.f32 18.0, %v9457_v56  ;;  %v4619_v9 = vadd.f32 0.5, %v10856_v35  ;;  %vm11031_vm1 = vcmp.le.f32.partialorder %v9284_v43, 16.0 }
 0x2e9   : > { %v4390_v27 = vpop.f32.mrb[224].mxu1  ;;  %vm9539_vm3 = vmand %vm9482_vm5, %vm4937_vm2  ;;  %vm11032_vm15 = vcmp.ge.f32.partialorder %v9284_v43, 1.0  ;;  %v4741_v13 = vmul.f32 18.0, %v9473_v3  ;;  %vm11036_vm2 = vcmp.ge.f32.partialorder %v9304_v4, 1.0  ;;  %v4742_v22 = vmul.f32 18.0, %v9488_v20 }
 0x2ea   : > { %v4206_v59 = vpop.f32.mrb[156].mxu0  ;;  %v9524_v29 = vadd.f32 %v9325_v57, %v4390_v27  ;;  %v6113_v18 = vpop.f32.mrb[225].mxu1  ;;  %v4636_v11 = vmul.f32 0.055555556, %v4594_v63  ;;  %v11029_v57 = vmov 0  ;;  %vm9548_vm7 = vmand %vm11032_vm15, %vm11031_vm1  ;;  %v9554_v27 = vsub.f32 %v11035_v6, %v4739_v51 }
 0x2eb   : > { %v11030_v57 = vsel %vm9539_vm3, 4294967295, %v11029_v57  ;;  %v9558_v18 = vadd.f32 %v4206_v59, %v8860_v34  ;;  %v4208_v35 = vpop.f32.mrb[157].mxu0  ;;  %v4393_v39 = vpop.f32.mrb[226].mxu1  ;;  %vm9565_vm12 = vmand %vm11036_vm2, %vm4858_vm6  ;;  %v11039_v51 = vcvt.s32.f32 %v9413_v55  ;;  %vm11040_vm6 = vcmp.ge.f32.partialorder %v9350_v62, 1.0 }
 0x2ec   : > { %11026 = vst [vmem:[#allocation25_spill] sm:$0xff] %v9524_v29  ;;  %4501 = vst [vmem:[%s8882_s29 + $0x100] sm:$0xff] %v9524_v29  ;;  %v4209_v35 = vpop.f32.mrb[158].mxu0  ;;  %v9576_v59 = vadd.f32 %v9344_v41, %v4393_v39  ;;  %v6114_v6 = vpop.f32.mrb[227].mxu1  ;;  %v11041_v4 = vmov 0  ;;  %vm11043_vm2 = vcmp.le.f32.partialorder %v9306_v50, 16.0  ;;  %v9599_v31 = vfloor.f32 %v4635_v16 }
 0x2ed   : > { %v4620_v34 = vadd.f32 0.5, %v11039_v51  ;;  %vm9582_vm15 = vmand %vm9516_vm14, %vm11040_vm6  ;;  %vm11044_vm8 = vcmp.ge.f32.partialorder %v9306_v50, 1.0  ;;  %v9597_v39 = vadd.f32 %v4209_v35, %v8863_v10  ;;  %v4211_v41 = vpop.f32.mrb[159].mxu0  ;;  %v11047_v6 = vcvt.s32.f32 %v9436_v28 }
 0x2ee   : > { %v11042_v4 = vsel %vm9582_vm15, 4294967295, %v11041_v4  ;;  %vm9591_vm0 = vmand %vm11044_vm8, %vm11043_vm2  ;;  %vm11048_vm14 = vcmp.ge.f32.partialorder %v9333_v25, 1.0  ;;  %v11051_v29 = vcvt.s32.f32 %v9276_v36  ;;  %v4661_v10 = vmul.f32 0.055555556, %v4619_v9  ;;  %4502 = vst [vmem:[%s8882_s29 + $0x108] sm:$0xff] %v9576_v59 }
 0x2ef   : > { %v4595_v49 = vadd.f32 0.5, %v11047_v6  ;;  %vm9607_vm6 = vmand %vm11048_vm14, %vm4860_vm13  ;;  %v9618_v16 = vfloor.f32 %v4636_v11  ;;  %vm11052_vm2 = vcmp.ge.f32.partialorder %v9363_v23, 1.0  ;;  %v11053_v25 = vmov 0 }
 0x2f0   : > { %v9613_v37 = vsub.f32 %v11051_v29, %v4740_v26  ;;  %vm9624_vm1 = vmand %vm9548_vm7, %vm11052_vm2  ;;  %vm11055_vm14 = vcmp.le.f32.partialorder %v9341_v1, 16.0  ;;  %vm11056_vm5 = vcmp.ge.f32.partialorder %v9341_v1, 1.0  ;;  %v11059_v11 = vcvt.s32.f32 %v9288_v45 }
 0x2f1   : > { %v11054_v25 = vsel %vm9624_vm1, 4294967295, %v11053_v25  ;;  %vm9633_vm8 = vmand %vm11056_vm5, %vm11055_vm14  ;;  %v11060_v9 = vcvt.s32.f32 %v9476_v61  ;;  %vm11061_vm7 = vcmp.ge.f32.partialorder %v9376_v24, 1.0  ;;  %vm11064_vm14 = vcmp.le.f32.partialorder %v9402_v52, 16.0  ;;  %v4398_v15 = vpop.f32.mrb[228].mxu1 }
 0x2f2   : > { %v9641_v26 = vsub.f32 %v11059_v11, %v4741_v13  ;;  %vm9649_vm2 = vmand %vm9565_vm12, %vm11061_vm7  ;;  %vm11065_vm13 = vcmp.ge.f32.partialorder %v9402_v52, 1.0  ;;  %v11068_v63 = vcvt.s32.f32 %v9298_v42  ;;  %v4662_v43 = vmul.f32 0.055555556, %v4620_v34  ;;  %v6117_v36 = vpop.f32.mrb[229].mxu1 }
 0x2f3   : > { %v4596_v29 = vadd.f32 0.5, %v11060_v9  ;;  %vm9658_vm15 = vmand %vm11065_vm13, %vm11064_vm14  ;;  %vm11069_vm12 = vcmp.le.f32.partialorder %v9270_v8, 16.0  ;;  %vm11072_vm13 = vcmp.ge.f32.partialorder %v9382_v2, 1.0  ;;  %vm11075_vm3 = vcmp.ge.f32.partialorder %v9410_v47, 1.0  ;;  %v4401_v9 = vpop.f32.mrb[230].mxu1 }
 0x2f4   : > { %v9666_v13 = vsub.f32 %v11068_v63, %v4742_v22  ;;  %vm9672_vm7 = vmand %vm9442_vm10, %vm11069_vm12  ;;  %v9696_v42 = vadd.s32 224, %v8898_v30  ;;  %v4717_v22 = vmul.f32 18.0, %v9599_v31  ;;  %v4637_v34 = vmul.f32 0.055555556, %v4595_v49  ;;  %v4214_v49 = vpop.f32.mrb[160].mxu0 }
 0x2f5   : > { %vm9680_vm14 = vmand %vm9591_vm0, %vm11072_vm13  ;;  %vm11078_vm0 = vcmp.ge.f32.partialorder %v9428_v32, 1.0  ;;  %v4702_v6 = vfloor.f32 %v4661_v10  ;;  %v9717_v50 = vadd.f32 %v9405_v7, %v4398_v15  ;;  %v4718_v11 = vmul.f32 18.0, %v9618_v16  ;;  %v4216_v7 = vpop.f32.mrb[161].mxu0 }
 0x2f6   : > { %vm9689_vm1 = vmand %vm9607_vm6, %vm11075_vm3  ;;  %vm11081_vm3 = vcmp.le.f32.partialorder %v9457_v56, 16.0  ;;  %vm11082_vm6 = vcmp.ge.f32.partialorder %v9457_v56, 1.0  ;;  %v11086_v56 = vmov 0  ;;  %v9731_v10 = vadd.f32 %v4214_v49, %v8866_v46  ;;  %v4217_v19 = vpop.f32.mrb[162].mxu0  ;;  %v6118_v49 = vpop.f32.mrb[231].mxu1 }
 0x2f7   : > { %vm9703_vm13 = vmand %vm9633_vm8, %vm11078_vm0  ;;  %vm11085_vm8 = vcmp.ge.f32.partialorder %v9554_v27, 1.0  ;;  %v4638_v63 = vmul.f32 0.055555556, %v4596_v29  ;;  %vm11088_vm12 = vcmp.le.f32.partialorder %v9294_v21, 16.0  ;;  %v11089_v45 = vmov 0  ;;  %4503 = vst [vmem:[%s8882_s29 + $0x110] sm:$0xff] %v9717_v50 }
 0x2f8   : > { %vm9711_vm10 = vmand %vm11082_vm6, %vm11081_vm3  ;;  %v9750_v46 = vfloor.f32 %v4662_v43  ;;  %v9753_v21 = vadd.s32 232, %v8898_v30  ;;  %v9758_v29 = vadd.f32 %v9431_v0, %v4401_v9  ;;  %v4580_v0 = vcvt.s32.f32 %v9696_v42 }
 0x2f9   : > { %vm9724_vm0 = vmand %vm9658_vm15, %vm11085_vm8  ;;  %vm11091_vm15 = vcmp.le.f32.partialorder %v9473_v3, 16.0  ;;  %vm11092_vm8 = vcmp.ge.f32.partialorder %v9473_v3, 1.0  ;;  %v11096_v3 = vmov 0  ;;  %v9778_v36 = vadd.f32 %v4217_v19, %v8870_v40 }
 0x2fa   : > { %v11087_v56 = vsel %vm9724_vm0, 4294967295, %v11086_v56  ;;  %vm9737_vm5 = vmand %vm9495_vm11, %vm11088_vm12  ;;  %vm11095_vm11 = vcmp.le.f32.partialorder %v9302_v33, 16.0  ;;  %v4219_v33 = vpop.f32.mrb[163].mxu0  ;;  %v11102_v48 = vcvt.s32.f32 %v8898_v30  ;;  %v9784_v9 = vfloor.f32 %v4637_v34  ;;  %4504 = vst [vmem:[%s8882_s29 + $0x118] sm:$0xff] %v9758_v29 }
 0x2fb   : > { %v11090_v45 = vsel %vm9737_vm5, 4294967295, %v11089_v45  ;;  %vm9745_vm3 = vmand %vm11092_vm8, %vm11091_vm15  ;;  %vm11098_vm15 = vcmp.le.f32.partialorder %v9488_v20, 16.0  ;;  %vm11099_vm8 = vcmp.ge.f32.partialorder %v9488_v20, 1.0  ;;  %v11104_v20 = vmov 0  ;;  %v4222_v33 = vpop.f32.mrb[164].mxu0 }
 0x2fc   : > { %vm9764_vm12 = vmand %vm9507_vm4, %vm11095_vm11  ;;  %v9782_v7 = vsub.f32 %v11102_v48, %v4717_v22  ;;  %vm11103_vm4 = vcmp.le.f32.partialorder %v9312_v12, 16.0  ;;  %v11108_v40 = vmov 0  ;;  %vm11110_vm5 = vcmp.ge.f32.partialorder %v9613_v37, 1.0 }
 0x2fd   : > { %v11097_v3 = vsel %vm9764_vm12, 4294967295, %v11096_v3  ;;  %vm9772_vm6 = vmand %vm11099_vm8, %vm11098_vm15  ;;  %vm11106_vm15 = vcmp.le.f32.partialorder %v9331_v53, 16.0  ;;  %vm11107_vm8 = vnez %v11030_v57  ;;  %v4743_v5 = vmul.f32 18.0, %v4702_v6 }
 0x2fe   : > { %vm9790_vm11 = vmand %vm9530_vm9, %vm11103_vm4  ;;  %v11113_v53 = vcvt.s32.f32 %v9356_v60  ;;  %v11115_v22 = vmov 0  ;;  %v9829_v34 = vfloor.f32 %v4638_v63  ;;  %vm11117_vm4 = vcmp.le.f32.partialorder %v9350_v62, 16.0 }
 0x2ff   : > { %v11105_v20 = vsel %vm9790_vm11, 4294967295, %v11104_v20  ;;  %vm9798_vm12 = vmand %vm11107_vm8, %vm11106_vm15  ;;  %vm11114_vm8 = vcmp.ge.f32.partialorder %v9641_v26, 1.0  ;;  %v11119_v60 = vmov 0  ;;  %v11122_v41 = vmov 0 }
 0x300   : > { %v11109_v40 = vsel %vm9798_vm12, 4294967295, %v11108_v40  ;;  %vm9806_vm0 = vmand %vm9711_vm10, %vm11110_vm5  ;;  %v9816_v57 = vsub.f32 %v11113_v53, %v4718_v11  ;;  %vm11118_vm12 = vnez %v11042_v4  ;;  %v4744_v62 = vmul.f32 18.0, %v9750_v46  ;;  %v4406_v11 = vpop.f32.mrb[232].mxu1 }
 0x301   : > { %vm9823_vm5 = vmand %vm9745_vm3, %vm11114_vm8  ;;  %vm11121_vm8 = vcmp.ge.f32.partialorder %v9666_v13, 1.0  ;;  %v4581_v4 = vcvt.s32.f32 %v9753_v21  ;;  %v4719_v15 = vmul.f32 18.0, %v9784_v9  ;;  %vm11129_vm15 = vnez %v11054_v25  ;;  %v6121_v53 = vpop.f32.mrb[233].mxu1 }
 0x302   : > { %v11116_v22 = vsel %vm9823_vm5, 4294967295, %v11115_v22  ;;  %vm9835_vm11 = vmand %vm11118_vm12, %vm11117_vm4  ;;  %vm11124_vm12 = vcmp.le.f32.partialorder %v9599_v31, 16.0  ;;  %vm11125_vm4 = vcmp.ge.f32.partialorder %v9599_v31, 1.0  ;;  %v11130_v19 = vmov 0  ;;  %v4409_v25 = vpop.f32.mrb[234].mxu1 }
 0x303   : > { %v11120_v60 = vsel %vm9835_vm11, 4294967295, %v11119_v60  ;;  %vm9845_vm10 = vmand %vm9772_vm6, %vm11121_vm8  ;;  %vm11128_vm8 = vcmp.le.f32.partialorder %v9363_v23, 16.0  ;;  %v11132_v49 = vcvt.s32.f32 %v9389_v17  ;;  %v4621_v31 = vadd.f32 0.5, %v4580_v0  ;;  %v6122_v52 = vpop.f32.mrb[235].mxu1 }
 0x304   : > { %v11123_v41 = vsel %vm9845_vm10, 4294967295, %v11122_v41  ;;  %vm9855_vm3 = vmand %vm11125_vm4, %vm11124_vm12  ;;  %v9876_v48 = vadd.f32 %v9558_v18, %v4406_v11  ;;  %vm11133_vm12 = vcmp.le.f32.partialorder %v9618_v16, 16.0  ;;  %vm11137_vm6 = vcmp.le.f32.partialorder %v9376_v24, 16.0  ;;  %v4224_v24 = vpop.f32.mrb[165].mxu0 }
 0x305   : > { %vm9865_vm9 = vmand %vm11129_vm15, %vm11128_vm8  ;;  %v9871_v43 = vsub.f32 %v11132_v49, %v4743_v5  ;;  %vm11134_vm15 = vcmp.ge.f32.partialorder %v9618_v16, 1.0  ;;  %vm11141_vm11 = vcmp.ge.f32.partialorder %v4702_v6, 1.0  ;;  %v9904_v16 = vadd.f32 %v4222_v33, %v8874_v38  ;;  %v4225_v35 = vpop.f32.mrb[166].mxu0 }
 0x306   : > { %v11131_v19 = vsel %vm9865_vm9, 4294967295, %v11130_v19  ;;  %vm9882_vm4 = vmand %vm11134_vm15, %vm11133_vm12  ;;  %vm11140_vm9 = vcmp.le.f32.partialorder %v4702_v6, 16.0  ;;  %v4720_v1 = vmul.f32 18.0, %v9829_v34  ;;  %v9910_v5 = vsel %vm9672_vm7, 1.0, %v10870_v54  ;;  %4505 = vst [vmem:[%s8882_s29 + $0x120] sm:$0xff] %v9876_v48 }
 0x307   : > { %vm9891_vm5 = vmand %vm9649_vm2, %vm11137_vm6  ;;  %vm11144_vm2 = vcmp.le.f32.partialorder %v9382_v2, 16.0  ;;  %v9932_v2 = vadd.f32 %v9597_v39, %v4409_v25  ;;  %vm11150_vm7 = vcmp.ge.f32.partialorder %v9782_v7, 1.0  ;;  %vm11156_vm12 = vcmp.le.f32.partialorder %v9554_v27, 16.0 }
 0x308   : > { %vm9897_vm10 = vmand %vm11141_vm11, %vm11140_vm9  ;;  %vm11147_vm9 = vcmp.le.f32.partialorder %v9410_v47, 16.0  ;;  %vm11157_vm15 = vnez %v11087_v56  ;;  %v11158_v39 = vmov 0  ;;  %v11160_v11 = vcvt.s32.f32 %v9413_v55 }
 0x309   : > { %vm9916_vm11 = vmand %vm9680_vm14, %vm11144_vm2  ;;  %vm11153_vm2 = vcmp.le.f32.partialorder %v9428_v32, 16.0  ;;  %v4226_v32 = vpop.f32.mrb[167].mxu0  ;;  %v11164_v27 = vcvt.s32.f32 %v9436_v28  ;;  %v11166_v55 = vmov 0  ;;  %v4622_v28 = vadd.f32 0.5, %v4581_v4  ;;  %4506 = vst [vmem:[%s8882_s29 + $0x128] sm:$0xff] %v9932_v2 }
 0x30a   : > { %vm9924_vm6 = vmand %vm9689_vm1, %vm11147_vm9  ;;  %vm5004_vm1 = vcmp.le.f32.partialorder %v9782_v7, 16.0  ;;  %v9962_v63 = vsub.f32 %v11160_v11, %v4744_v62  ;;  %v11175_v49 = vcvt.s32.f32 %v9476_v61  ;;  %v11183_v61 = vmov 0  ;;  %v4262_v53 = vpop.f32.mrb[84].mxu0 }
 0x30b   : > { %vm9938_vm14 = vmand %vm9855_vm3, %vm11150_vm7  ;;  %v9975_v56 = vsub.f32 %v11164_v27, %v4719_v15  ;;  %vm11168_vm3 = vcmp.le.f32.partialorder %v9750_v46, 16.0  ;;  %v9996_v15 = vadd.s32 240, %v8898_v30  ;;  %v6049_v35 = vpop.f32.mrb[85].mxu0  ;;  %v10168_v17 = vsel %vm9924_vm6, 1.0, %v10870_v54 }
 0x30c   : > { %vm9947_vm9 = vmand %vm9703_vm13, %vm11153_vm2  ;;  %vm11161_vm13 = vcmp.ge.f32.partialorder %v9816_v57, 1.0  ;;  %v10018_v33 = vsub.f32 %v11175_v49, %v4720_v1  ;;  %v6149_v1 = vadd.f32 %v4262_v53, %v8596_v14  ;;  %v4265_v47 = vpop.f32.mrb[86].mxu0  ;;  %v10245_v7 = vadd.s32 256, %v8898_v30 }
 0x30d   : > { %vm9955_vm8 = vmand %vm11157_vm15, %vm11156_vm12  ;;  %vm11165_vm15 = vcmp.le.f32.partialorder %v9613_v37, 16.0  ;;  %vm11172_vm12 = vnez %v11090_v45  ;;  %v10183_v6 = vsel %vm9947_vm9, 1.0, %v10870_v54  ;;  %v10280_v21 = vadd.s32 264, %v8898_v30 }
 0x30e   : > { %v11159_v39 = vsel %vm9955_vm8, 4294967295, %v11158_v39  ;;  %vm9968_vm7 = vmand %vm9882_vm4, %vm11161_vm13  ;;  %vm11169_vm4 = vcmp.ge.f32.partialorder %v9750_v46, 1.0  ;;  %v10005_v37 = vsel %vm11172_vm12, 1.0, %v10870_v54  ;;  %v4663_v46 = vmul.f32 0.055555556, %v4621_v31  ;;  %4469 = vst [vmem:[%s8882_s29] sm:$0xff] %v6149_v1 }
 0x30f   : > { %vm9981_vm2 = vmand %vm9806_vm0, %vm11165_vm15  ;;  %vm11176_vm0 = vnez %v11097_v3  ;;  %vm11177_vm12 = vcmp.le.f32.partialorder %v9641_v26, 16.0  ;;  %v10042_v3 = vadd.s32 248, %v8898_v30  ;;  %v4582_v31 = vcvt.s32.f32 %v9996_v15 }
 0x310   : > { %v11167_v55 = vsel %vm9981_vm2, 4294967295, %v11166_v55  ;;  %vm9989_vm13 = vmand %vm11169_vm4, %vm11168_vm3  ;;  %v10023_v45 = vsel %vm11176_vm0, 1.0, %v10870_v54  ;;  %vm11178_vm3 = vnez %v11116_v22  ;;  %vm11185_vm0 = vcmp.le.f32.partialorder %v9816_v57, 16.0  ;;  %v4414_v57 = vpop.f32.mrb[236].mxu1 }
 0x311   : > { %vm10012_vm4 = vmand %vm9938_vm14, %vm5004_vm1  ;;  %vm11181_vm14 = vcmp.le.f32.partialorder %v9666_v13, 16.0  ;;  %vm11182_vm1 = vnez %v11123_v41  ;;  %v10087_v23 = vadd.f32 %v9731_v10, %v4414_v57  ;;  %v6125_v24 = vpop.f32.mrb[237].mxu1  ;;  %v10094_v25 = vfloor.f32 %v4663_v46  ;;  %v6050_v46 = vpop.f32.mrb[87].mxu0 }
 0x312   : > { %vm10029_vm15 = vmand %vm11178_vm3, %vm11177_vm12  ;;  %vm4924_vm12 = vcmp.ge.f32.partialorder %v9975_v56, 1.0  ;;  %v4417_v52 = vpop.f32.mrb[238].mxu1  ;;  %v4623_v49 = vadd.f32 0.5, %v4582_v31  ;;  %vm11215_vm9 = vnez %v11167_v55  ;;  %v4270_v35 = vpop.f32.mrb[88].mxu0 }
 0x313   : > { %vm10037_vm2 = vmand %vm11182_vm1, %vm11181_vm14  ;;  %vm11188_vm14 = vnez %v11105_v20  ;;  %vm11189_vm1 = vnez %v11109_v40  ;;  %v4664_v40 = vmul.f32 0.055555556, %v4622_v28  ;;  %4507 = vst [vmem:[%s8882_s29 + $0x130] sm:$0xff] %v10087_v23  ;;  %v10113_v11 = vadd.f32 %v9778_v36, %v4417_v52  ;;  %v6053_v32 = vpop.f32.mrb[89].mxu0 }
 0x314   : > { %v11184_v61 = vsel %vm10037_vm2, 4294967295, %v11183_v61  ;;  %vm10048_vm8 = vmand %vm9968_vm7, %vm11185_vm0  ;;  %v10057_v13 = vsel %vm11188_vm14, 1.0, %v10870_v54  ;;  %v10062_v22 = vsel %vm11189_vm1, 1.0, %v10870_v54  ;;  %vm4949_vm2 = vcmp.ge.f32.partialorder %v9962_v63, 1.0 }
 0x315   : > { %vm11190_vm7 = vcmp.le.f32.partialorder %v9784_v9, 16.0  ;;  %vm11191_vm0 = vcmp.ge.f32.partialorder %v9784_v9, 1.0  ;;  %vm11194_vm14 = vcmp.ge.f32.partialorder %v9871_v43, 1.0  ;;  %v5699_v9 = vsel %vm10012_vm4, 1.0, %v10870_v54  ;;  %4508 = vst [vmem:[%s8882_s29 + $0x138] sm:$0xff] %v10113_v11 }
 0x316   : > { %vm10069_vm3 = vmand %vm11191_vm0, %vm11190_vm7  ;;  %vm11197_vm7 = vnez %v11120_v60  ;;  %vm11199_vm4 = vcmp.ge.f32.partialorder %v9829_v34, 1.0  ;;  %v4583_v60 = vcvt.s32.f32 %v10042_v3  ;;  %v5700_v14 = vsel %vm10048_vm8, 1.0, %v10870_v54  ;;  %v6606_v3 = vld [vmem:[%s8882_s29 + $0x68] sm:$0xff] }
 0x317   : > { %vm10078_vm1 = vmand %vm9897_vm10, %vm11194_vm14  ;;  %v10092_v18 = vsel %vm11197_vm7, 1.0, %v10870_v54  ;;  %vm11198_vm10 = vcmp.le.f32.partialorder %v9829_v34, 16.0  ;;  %v6126_v34 = vpop.f32.mrb[239].mxu1  ;;  %vm5030_vm8 = vcmp.le.f32.partialorder %v9871_v43, 16.0  ;;  %v5168_v27 = vmul.f32 %v6149_v1, %v5699_v9 }
 0x318   : > { %vm10101_vm0 = vmand %vm11199_vm4, %vm11198_vm10  ;;  %vm5006_vm10 = vcmp.le.f32.partialorder %v9975_v56, 16.0  ;;  %vm11204_vm4 = vnez %v11131_v19  ;;  %v6152_v28 = vadd.f32 %v4265_v47, %v8605_v44  ;;  %v10143_v19 = vsel %vm9891_vm5, 1.0, %v10870_v54  ;;  %v4422_v43 = vpop.f32.mrb[240].mxu1 }
 0x319   : > { %vm10119_vm7 = vmand %vm10069_vm3, %vm4924_vm12  ;;  %v10127_v51 = vsel %vm11204_vm4, 1.0, %v10870_v54  ;;  %v10145_v12 = vfloor.f32 %v4664_v40  ;;  %vm5007_vm3 = vcmp.le.f32.partialorder %v10018_v33, 16.0  ;;  %v10163_v44 = vsel %vm9916_vm11, 1.0, %v10870_v54  ;;  %v6129_v10 = vpop.f32.mrb[241].mxu1 }
 0x31a   : > { %vm10134_vm14 = vmand %vm9989_vm13, %vm4949_vm2  ;;  %vm11207_vm2 = vcmp.ge.f32.partialorder %v10018_v33, 1.0  ;;  %vm5031_vm5 = vcmp.le.f32.partialorder %v9962_v63, 16.0  ;;  %4470 = vst [vmem:[%s8882_s29 + $0x8] sm:$0xff] %v6152_v28  ;;  %v5169_v26 = vmul.f32 %v6152_v28, %v5700_v14  ;;  %vm11212_vm11 = vnez %v11159_v39  ;;  %v4425_v36 = vpop.f32.mrb[242].mxu1 }
 0x31b   : > { %vm10155_vm13 = vmand %vm10101_vm0, %vm11207_vm2  ;;  %v10188_v38 = vsel %vm11212_vm11, 1.0, %v10870_v54  ;;  %v4745_v41 = vmul.f32 18.0, %v10094_v25  ;;  %v4624_v8 = vadd.f32 0.5, %v4583_v60  ;;  %v10204_v40 = vsel %vm11215_vm9, 1.0, %v10870_v54  ;;  %v6599_v36 = vld [vmem:[%s8882_s29 + $0x30] sm:$0xff] }
 0x31c   : > { %vm10176_vm12 = vmand %vm10119_vm7, %vm5006_vm10  ;;  %v5258_v39 = vmul.f32 %v6149_v1, %v5168_v27  ;;  %v5209_v53 = vadd.f32 %v5169_v26, %v5168_v27  ;;  %v5259_v9 = vmul.f32 %v6152_v28, %v5169_v26  ;;  %v4746_v24 = vmul.f32 18.0, %v10145_v12  ;;  %v4273_v28 = vpop.f32.mrb[90].mxu0 }
 0x31d   : > { %vm10194_vm6 = vmand %vm10078_vm1, %vm5030_vm8  ;;  %v4665_v1 = vmul.f32 0.055555556, %v4623_v49  ;;  %v5701_v33 = vsel %vm10176_vm12, 1.0, %v10870_v54  ;;  %v10227_v52 = vadd.f32 %v9904_v16, %v4422_v43  ;;  %v10232_v63 = vsel %vm10029_vm15, 1.0, %v10870_v54  ;;  %v11221_v49 = vld [vmem:[#allocation16_spill] sm:$0xff]  ;;  %v6054_v26 = vpop.f32.mrb[91].mxu0 }
 0x31e   : > { %vm10210_vm1 = vmand %vm10155_vm13, %vm5007_vm3  ;;  %v5299_v14 = vadd.f32 %v5259_v9, %v5258_v39  ;;  %v6155_v34 = vadd.f32 %v4270_v35, %v8619_v58  ;;  %v10242_v16 = vsub.f32 %v4580_v0, %v4745_v41  ;;  %v4666_v27 = vmul.f32 0.055555556, %v4624_v8  ;;  %v6130_v58 = vpop.f32.mrb[243].mxu1  ;;  %v6597_v41 = vld [vmem:[%s8882_s29 + $0x20] sm:$0xff]  ;;  %v11222_v8 = vld [vmem:[#allocation18_spill] sm:$0xff] }
 0x31f   : > { %vm10218_vm0 = vmand %vm10134_vm14, %vm5031_vm5  ;;  %vm11220_vm14 = vnez %v11184_v61  ;;  %4509 = vst [vmem:[%s8882_s29 + $0x140] sm:$0xf] %v10227_v52  ;;  %v5702_v61 = vsel %vm10210_vm1, 1.0, %v10870_v54  ;;  %v10255_v42 = vsel %vm10194_vm6, 1.0, %v10870_v54  ;;  %v6158_v62 = vadd.f32 %v4273_v28, %v11221_v49 }
 0x320   : > { %v10237_v47 = vsel %vm11220_vm14, 1.0, %v10870_v54  ;;  %v10260_v0 = vsel %vm10218_vm0, 1.0, %v10870_v54  ;;  %4471 = vst [vmem:[%s8882_s29 + $0x10] sm:$0xff] %v6155_v34  ;;  %v5170_v46 = vmul.f32 %v6155_v34, %v5701_v33  ;;  %vm4827_vm15 = vcmp.ge.f32.partialorder %v10094_v25, 1.0 }
 0x321   : > { %vm4868_vm7 = vcmp.le.f32.partialorder %v10094_v25, 16.0  ;;  %v10268_v57 = vsub.f32 %v4581_v4, %v4746_v24  ;;  %v10270_v56 = vfloor.f32 %v4665_v1  ;;  %v5172_v39 = vmul.f32 %v6597_v41, %v11222_v8  ;;  %4472 = vst [vmem:[%s8882_s29 + $0x18] sm:$0xff] %v6158_v62  ;;  %v6598_v4 = vld [vmem:[%s8882_s29 + $0x28] sm:$0xff]  ;;  %v11223_v24 = vld [vmem:[#allocation19_spill] sm:$0xff] }
 0x322   : > { %v5210_v9 = vadd.f32 %v5209_v53, %v5170_v46  ;;  %v5260_v43 = vmul.f32 %v6155_v34, %v5170_v46  ;;  %v5171_v20 = vmul.f32 %v6158_v62, %v5702_v61  ;;  %vm4950_vm10 = vcmp.ge.f32.partialorder %v10242_v16, 1.0  ;;  %vm10294_vm13 = vmand %vm4827_vm15, %vm4868_vm7  ;;  %v11227_v8 = vld [vmem:[#allocation21_spill] sm:$0xff] }
 0x323   : > { %v10276_v55 = vfloor.f32 %v4666_v27  ;;  %v4584_v35 = vcvt.s32.f32 %v10245_v7  ;;  %v5173_v1 = vmul.f32 %v6598_v4, %v11223_v24  ;;  %vm5032_vm4 = vcmp.le.f32.partialorder %v10242_v16, 16.0  ;;  %v11224_v27 = vld [vmem:[#allocation20_spill] sm:$0xff]  ;;  %vm4991_vm11 = vmand %vm10294_vm13, %vm4950_vm10 }
 0x324   : > { %v5300_v33 = vadd.f32 %v5299_v14, %v5260_v43  ;;  %v5211_v10 = vadd.f32 %v5210_v9, %v5171_v20  ;;  %v5261_v32 = vmul.f32 %v6158_v62, %v5171_v20  ;;  %vm4828_vm8 = vcmp.ge.f32.partialorder %v10145_v12, 1.0  ;;  %vm10331_vm1 = vmand %vm4991_vm11, %vm5032_vm4 }
 0x325   : > { %vm4869_vm2 = vcmp.le.f32.partialorder %v10145_v12, 16.0  ;;  %v4747_v53 = vmul.f32 18.0, %v10270_v56  ;;  %v5262_v34 = vmul.f32 %v6597_v41, %v5172_v39  ;;  %v5174_v28 = vmul.f32 %v6599_v36, %v11224_v27  ;;  %v6600_v41 = vld [vmem:[%s8882_s29 + $0x38] sm:$0xff]  ;;  %v6603_v12 = vld [vmem:[%s8882_s29 + $0x50] sm:$0xff] }
 0x326   : > { %v5212_v61 = vadd.f32 %v5211_v10, %v5172_v39  ;;  %v5301_v58 = vadd.f32 %v5300_v33, %v5261_v32  ;;  %vm4951_vm3 = vcmp.ge.f32.partialorder %v10268_v57, 1.0  ;;  %v4748_v46 = vmul.f32 18.0, %v10276_v55  ;;  %v6601_v33 = vld [vmem:[%s8882_s29 + $0x40] sm:$0xff]  ;;  %v11228_v10 = vld [vmem:[#allocation22_spill] sm:$0xff]  ;;  %v11229_v27 = vld [vmem:[#allocation23_spill] sm:$0xff] }
 0x327   : > { %v4625_v49 = vadd.f32 0.5, %v4584_v35  ;;  %v4585_v62 = vcvt.s32.f32 %v10280_v21  ;;  %v5263_v26 = vmul.f32 %v6598_v4, %v5173_v1  ;;  %v5175_v39 = vmul.f32 %v6600_v41, %v11227_v8  ;;  %vm4910_vm9 = vmand %vm4828_vm8, %vm4869_vm2 }
 0x328   : > { %v5213_v9 = vadd.f32 %v5212_v61, %v5173_v1  ;;  %v5302_v25 = vadd.f32 %v5301_v58, %v5262_v34  ;;  %v4788_v43 = vsub.f32 %v4582_v31, %v4747_v53  ;;  %vm4829_vm5 = vcmp.ge.f32.partialorder %v10270_v56, 1.0  ;;  %vm10352_vm7 = vmand %vm4910_vm9, %vm4951_vm3 }
 0x329   : > { %vm4870_vm12 = vcmp.le.f32.partialorder %v10270_v56, 16.0  ;;  %v10310_v20 = vadd.s32 272, %v8898_v30  ;;  %v5264_v24 = vmul.f32 %v6599_v36, %v5174_v28  ;;  %v5176_v4 = vmul.f32 %v6601_v33, %v11228_v10  ;;  %v6602_v36 = vld [vmem:[%s8882_s29 + $0x48] sm:$0xff] }
 0x32a   : > { %v5214_v1 = vadd.f32 %v5213_v9, %v5174_v28  ;;  %v5303_v15 = vadd.f32 %v5302_v25, %v5263_v26  ;;  %v4789_v31 = vsub.f32 %v4583_v60, %v4748_v46  ;;  %vm4830_vm6 = vcmp.ge.f32.partialorder %v10276_v55, 1.0  ;;  %vm10346_vm15 = vmand %vm4829_vm5, %vm4870_vm12 }
 0x32b   : > { %v4667_v32 = vmul.f32 0.055555556, %v4625_v49  ;;  %v4626_v53 = vadd.f32 0.5, %v4585_v62  ;;  %v5265_v34 = vmul.f32 %v6600_v41, %v5175_v39  ;;  %v5177_v61 = vmul.f32 %v6602_v36, %v11229_v27  ;;  %v11232_v49 = vld [vmem:[#allocation26_spill] sm:$0xff] }
 0x32c   : > { %v5215_v28 = vadd.f32 %v5214_v1, %v5175_v39  ;;  %v5304_v58 = vadd.f32 %v5303_v15, %v5264_v24  ;;  %vm4952_vm0 = vcmp.ge.f32.partialorder %v4788_v43, 1.0  ;;  %vm4871_vm14 = vcmp.le.f32.partialorder %v10276_v55, 16.0  ;;  %v6604_v24 = vld [vmem:[%s8882_s29 + $0x58] sm:$0xff] }
 0x32d   : > { %v4586_v60 = vcvt.s32.f32 %v10310_v20  ;;  %v10338_v14 = vadd.s32 280, %v8898_v30  ;;  %v5266_v46 = vmul.f32 %v6601_v33, %v5176_v4  ;;  %v5178_v26 = vmul.f32 %v6603_v12, %v11232_v49  ;;  %vm4912_vm8 = vmand %vm4830_vm6, %vm4871_vm14 }
 0x32e   : > { %v5216_v41 = vadd.f32 %v5215_v28, %v5176_v4  ;;  %v5305_v8 = vadd.f32 %v5304_v58, %v5265_v34  ;;  %vm5033_vm10 = vcmp.le.f32.partialorder %v10268_v57, 16.0  ;;  %vm4953_vm4 = vcmp.ge.f32.partialorder %v4789_v31, 1.0  ;;  %vm10373_vm2 = vmand %vm10346_vm15, %vm4952_vm0 }
 0x32f   : > { %v10357_v9 = vfloor.f32 %v4667_v32  ;;  %v4668_v25 = vmul.f32 0.055555556, %v4626_v53  ;;  %v5267_v56 = vmul.f32 %v6602_v36, %v5177_v61  ;;  %v5179_v33 = vmul.f32 %v6604_v24, %v9910_v5  ;;  %v6605_v53 = vld [vmem:[%s8882_s29 + $0x60] sm:$0xff]  ;;  %vm5074_vm3 = vmand %vm10352_vm7, %vm5033_vm10 }
 0x330   : > { %v5217_v10 = vadd.f32 %v5216_v41, %v5177_v61  ;;  %v5306_v4 = vadd.f32 %v5305_v8, %v5266_v46  ;;  %v10368_v1 = vsel %vm10331_vm1, 1.0, %v10870_v54  ;;  %vm5034_vm13 = vcmp.le.f32.partialorder %v4788_v43, 16.0  ;;  %vm10387_vm5 = vmand %vm4912_vm8, %vm4953_vm4 }
 0x331   : > { %v4627_v5 = vadd.f32 0.5, %v4586_v60  ;;  %v4587_v55 = vcvt.s32.f32 %v10338_v14  ;;  %v5268_v32 = vmul.f32 %v6603_v12, %v5178_v26  ;;  %v5180_v34 = vmul.f32 %v6605_v53, %v10005_v37  ;;  %vm5075_vm11 = vmand %vm10373_vm2, %vm5034_vm13 }
 0x332   : > { %v5218_v36 = vadd.f32 %v5217_v10, %v5178_v26  ;;  %v5307_v27 = vadd.f32 %v5306_v4, %v5267_v56  ;;  %vm5035_vm12 = vcmp.le.f32.partialorder %v4789_v31, 16.0  ;;  %v4749_v28 = vmul.f32 18.0, %v10357_v9 }
 0x333   : > { %v10392_v58 = vfloor.f32 %v4668_v25  ;;  %v10395_v37 = vadd.s32 288, %v8898_v30  ;;  %v5269_v57 = vmul.f32 %v6604_v24, %v5179_v33  ;;  %v5181_v46 = vmul.f32 %v6606_v3, %v10023_v45  ;;  %v6607_v25 = vld [vmem:[%s8882_s29 + $0x70] sm:$0xff]  ;;  %vm5076_vm6 = vmand %vm10387_vm5, %vm5035_vm12 }
 0x334   : > { %v5219_v12 = vadd.f32 %v5218_v36, %v5179_v33  ;;  %v5308_v49 = vadd.f32 %v5307_v27, %v5268_v32  ;;  %v10403_v26 = vsel %vm5074_vm3, 1.0, %v10870_v54  ;;  %v4669_v16 = vmul.f32 0.055555556, %v4627_v5  ;;  %v6609_v27 = vld [vmem:[%s8882_s29 + $0x80] sm:$0xff] }
 0x335   : > { %v4628_v41 = vadd.f32 0.5, %v4587_v55  ;;  %v10408_v8 = vadd.s32 296, %v8898_v30  ;;  %v5270_v39 = vmul.f32 %v6605_v53, %v5180_v34  ;;  %v5182_v45 = vmul.f32 %v6607_v25, %v10057_v13  ;;  %v6608_v13 = vld [vmem:[%s8882_s29 + $0x78] sm:$0xff] }
 0x336   : > { %v5220_v43 = vadd.f32 %v5219_v12, %v5180_v34  ;;  %v5309_v56 = vadd.f32 %v5308_v49, %v5269_v57  ;;  %v10416_v24 = vsel %vm5075_vm11, 1.0, %v10870_v54  ;;  %v10420_v33 = vsub.f32 %v4584_v35, %v4749_v28  ;;  %v6610_v49 = vld [vmem:[%s8882_s29 + $0x88] sm:$0xff] }
 0x337   : > { %v4750_v10 = vmul.f32 18.0, %v10392_v58  ;;  %v4588_v4 = vcvt.s32.f32 %v10395_v37  ;;  %v5271_v15 = vmul.f32 %v6606_v3, %v5181_v46  ;;  %v5183_v31 = vmul.f32 %v6608_v13, %v10062_v22 }
 0x338   : > { %v5221_v5 = vadd.f32 %v5220_v43, %v5181_v46  ;;  %v5310_v32 = vadd.f32 %v5309_v56, %v5270_v39  ;;  %v10427_v53 = vsel %vm5076_vm6, 1.0, %v10870_v54  ;;  %v10429_v34 = vfloor.f32 %v4669_v16  ;;  %v6611_v43 = vld [vmem:[%s8882_s29 + $0x90] sm:$0xff] }
 0x339   : > { %v4670_v36 = vmul.f32 0.055555556, %v4628_v41  ;;  %v4589_v7 = vcvt.s32.f32 %v10408_v8  ;;  %v5272_v35 = vmul.f32 %v6607_v25, %v5182_v45  ;;  %v5184_v61 = vmul.f32 %v6609_v27, %v10092_v18 }
 0x33a   : > { %v5222_v28 = vadd.f32 %v5221_v5, %v5182_v45  ;;  %v5311_v57 = vadd.f32 %v5310_v32, %v5271_v15  ;;  %vm4831_vm9 = vcmp.ge.f32.partialorder %v10357_v9, 1.0  ;;  %vm4872_vm1 = vcmp.le.f32.partialorder %v10357_v9, 16.0  ;;  %v6612_v32 = vld [vmem:[%s8882_s29 + $0x98] sm:$0xff] }
 0x33b   : > { %v10438_v22 = vsub.f32 %v4585_v62, %v4750_v10  ;;  %v4629_v3 = vadd.f32 0.5, %v4588_v4  ;;  %v10443_v46 = vadd.s32 304, %v8898_v30  ;;  %v5273_v12 = vmul.f32 %v6608_v13, %v5183_v31  ;;  %vm4913_vm3 = vmand %vm4831_vm9, %vm4872_vm1 }
 0x33c   : > { %v5185_v18 = vmul.f32 %v6610_v49, %v10127_v51  ;;  %v5223_v16 = vadd.f32 %v5222_v28, %v5183_v31  ;;  %v5312_v41 = vadd.f32 %v5311_v57, %v5272_v35  ;;  %vm4832_vm0 = vcmp.ge.f32.partialorder %v10392_v58, 1.0  ;;  %v6613_v57 = vld [vmem:[%s8882_s29 + $0xa0] sm:$0xff] }
 0x33d   : > { %vm4873_vm14 = vcmp.le.f32.partialorder %v10392_v58, 16.0  ;;  %v4751_v21 = vmul.f32 18.0, %v10429_v34  ;;  %v10450_v62 = vfloor.f32 %v4670_v36  ;;  %v4630_v39 = vadd.f32 0.5, %v4589_v7 }
 0x33e   : > { %v10455_v25 = vadd.s32 320, %v8898_v30  ;;  %v5274_v45 = vmul.f32 %v6609_v27, %v5184_v61  ;;  %v5186_v51 = vmul.f32 %v6611_v43, %v10143_v19  ;;  %vm4954_vm15 = vcmp.ge.f32.partialorder %v10420_v33, 1.0  ;;  %vm4914_vm12 = vmand %vm4832_vm0, %vm4873_vm14 }
 0x33f   : > { %v5224_v56 = vadd.f32 %v5223_v16, %v5184_v61  ;;  %v5313_v10 = vadd.f32 %v5312_v41, %v5273_v12  ;;  %vm4833_vm7 = vcmp.ge.f32.partialorder %v10429_v34, 1.0  ;;  %v4671_v15 = vmul.f32 0.055555556, %v4629_v3  ;;  %vm10513_vm11 = vmand %vm4913_vm3, %vm4954_vm15 }
 0x340   : > { %v4590_v13 = vcvt.s32.f32 %v10443_v46  ;;  %v10463_v31 = vadd.s32 312, %v8898_v30  ;;  %v5275_v5 = vmul.f32 %v6610_v49, %v5185_v18  ;;  %v5187_v36 = vmul.f32 %v6612_v32, %v10163_v44 }
 0x341   : > { %vm4955_vm10 = vcmp.ge.f32.partialorder %v10438_v22, 1.0  ;;  %v5225_v19 = vadd.f32 %v5224_v56, %v5185_v18  ;;  %v5314_v35 = vadd.f32 %v5313_v10, %v5274_v45  ;;  %vm5036_vm4 = vcmp.le.f32.partialorder %v10420_v33, 16.0  ;;  %v6614_v45 = vld [vmem:[%s8882_s29 + $0xa8] sm:$0xff]  ;;  %v6615_v10 = vld [vmem:[%s8882_s29 + $0xb0] sm:$0xff] }
 0x342   : > { %vm4874_vm8 = vcmp.le.f32.partialorder %v10429_v34, 16.0  ;;  %v4752_v27 = vmul.f32 18.0, %v10450_v62  ;;  %v4672_v61 = vmul.f32 0.055555556, %v4630_v39  ;;  %v4592_v28 = vcvt.s32.f32 %v10455_v25  ;;  %vm10528_vm0 = vmand %vm4914_vm12, %vm4955_vm10 }
 0x343   : > { %v5276_v30 = vmul.f32 %v6611_v43, %v5186_v51  ;;  %v5188_v3 = vmul.f32 %v6613_v57, %v10168_v17  ;;  %v5226_v12 = vadd.f32 %v5225_v19, %v5186_v51  ;;  %v5315_v44 = vadd.f32 %v5314_v35, %v5275_v5  ;;  %v6616_v19 = vld [vmem:[%s8882_s29 + $0xb8] sm:$0xff]  ;;  %vm4915_vm1 = vmand %vm4833_vm7, %vm4874_vm8 }
 0x344   : > { %vm5037_vm2 = vcmp.le.f32.partialorder %v10438_v22, 16.0  ;;  %v10477_v49 = vsub.f32 %v4586_v60, %v4751_v21  ;;  %v10479_v18 = vfloor.f32 %v4671_v15  ;;  %v4631_v16 = vadd.f32 0.5, %v4590_v13  ;;  %vm10545_vm15 = vmand %vm10513_vm11, %vm5036_vm4 }
 0x345   : > { %v4591_v41 = vcvt.s32.f32 %v10463_v31  ;;  %v5277_v39 = vmul.f32 %v6612_v32, %v5187_v36  ;;  %v5189_v17 = vmul.f32 %v6614_v45, %v10183_v6  ;;  %v5227_v43 = vadd.f32 %v5226_v12, %v5187_v36  ;;  %vm10569_vm4 = vmand %vm10528_vm0, %vm5037_vm2 }
 0x346   : > { %v5316_v51 = vadd.f32 %v5315_v44, %v5276_v30  ;;  %v10488_v56 = vsub.f32 %v4587_v55, %v4752_v27  ;;  %vm4834_vm13 = vcmp.ge.f32.partialorder %v10450_v62, 1.0  ;;  %v10491_v20 = vfloor.f32 %v4672_v61 }
 0x347   : > { %v4633_v60 = vadd.f32 0.5, %v4592_v28  ;;  %v5278_v21 = vmul.f32 %v6613_v57, %v5188_v3  ;;  %v5190_v15 = vmul.f32 %v6615_v10, %v10188_v38  ;;  %v5228_v6 = vadd.f32 %v5227_v43, %v5188_v3  ;;  %v6617_v57 = vld [vmem:[%s8882_s29 + $0xc0] sm:$0xff] }
 0x348   : > { %v5317_v14 = vadd.f32 %v5316_v51, %v5277_v39  ;;  %vm4875_vm5 = vcmp.le.f32.partialorder %v10450_v62, 16.0  ;;  %v4753_v55 = vmul.f32 18.0, %v10479_v18  ;;  %v4673_v5 = vmul.f32 0.055555556, %v4631_v16 }
 0x349   : > { %v4632_v32 = vadd.f32 0.5, %v4591_v41  ;;  %v5279_v36 = vmul.f32 %v6614_v45, %v5189_v17  ;;  %v5191_v38 = vmul.f32 %v6616_v19, %v10204_v40  ;;  %v5229_v9 = vadd.f32 %v5228_v6, %v5189_v17  ;;  %v6618_v45 = vld [vmem:[%s8882_s29 + $0xc8] sm:$0xff]  ;;  %vm10577_vm3 = vmand %vm4834_vm13, %vm4875_vm5 }
 0x34a   : > { %v5318_v35 = vadd.f32 %v5317_v14, %v5278_v21  ;;  %vm4956_vm6 = vcmp.ge.f32.partialorder %v10477_v49, 1.0  ;;  %vm5038_vm9 = vcmp.le.f32.partialorder %v10477_v49, 16.0  ;;  %v4754_v40 = vmul.f32 18.0, %v10491_v20  ;;  %v6619_v21 = vld [vmem:[%s8882_s29 + $0xd0] sm:$0xff] }
 0x34b   : > { %v4675_v61 = vmul.f32 0.055555556, %v4633_v60  ;;  %v5280_v30 = vmul.f32 %v6615_v10, %v5190_v15  ;;  %v5192_v58 = vmul.f32 %v6617_v57, %v10232_v63  ;;  %v5230_v3 = vadd.f32 %v5229_v9, %v5190_v15  ;;  %vm10551_vm7 = vmand %vm4915_vm1, %vm4956_vm6  ;;  %v6621_v9 = vld [vmem:[%s8882_s29 + $0xe0] sm:$0xff] }
 0x34c   : > { %v5319_v12 = vadd.f32 %v5318_v35, %v5279_v36  ;;  %vm4957_vm14 = vcmp.ge.f32.partialorder %v10488_v56, 1.0  ;;  %v10535_v16 = vsub.f32 %v4588_v4, %v4753_v55  ;;  %v10537_v63 = vfloor.f32 %v4673_v5  ;;  %v6620_v55 = vld [vmem:[%s8882_s29 + $0xd8] sm:$0xff]  ;;  %vm10592_vm2 = vmand %vm10551_vm7, %vm5038_vm9 }
 0x34d   : > { %v4674_v39 = vmul.f32 0.055555556, %v4632_v32  ;;  %v5281_v34 = vmul.f32 %v6616_v19, %v5191_v38  ;;  %v5193_v17 = vmul.f32 %v6618_v45, %v10237_v47  ;;  %v5231_v51 = vadd.f32 %v5230_v3, %v5191_v38  ;;  %vm4998_vm9 = vmand %vm10577_vm3, %vm4957_vm14 }
 0x34e   : > { %v5320_v37 = vadd.f32 %v5319_v12, %v5280_v30  ;;  %vm4835_vm10 = vcmp.ge.f32.partialorder %v10479_v18, 1.0  ;;  %vm4876_vm8 = vcmp.le.f32.partialorder %v10479_v18, 16.0  ;;  %v10559_v47 = vsub.f32 %v4589_v7, %v4754_v40 }
 0x34f   : > { %v10561_v33 = vfloor.f32 %v4675_v61  ;;  %v5282_v60 = vmul.f32 %v6617_v57, %v5192_v58  ;;  %v5194_v10 = vmul.f32 %v6619_v21, %v10255_v42  ;;  %v5232_v14 = vadd.f32 %v5231_v51, %v5192_v58  ;;  %vm10604_vm5 = vmand %vm4835_vm10, %vm4876_vm8  ;;  %v6622_v57 = vld [vmem:[%s8882_s29 + $0xe8] sm:$0xff] }
 0x350   : > { %v5321_v6 = vadd.f32 %v5320_v37, %v5281_v34  ;;  %vm4836_vm12 = vcmp.ge.f32.partialorder %v10491_v20, 1.0  ;;  %vm4877_vm11 = vcmp.le.f32.partialorder %v10491_v20, 16.0  ;;  %v4755_v42 = vmul.f32 18.0, %v10537_v63 }
 0x351   : > { %v10584_v7 = vfloor.f32 %v4674_v39  ;;  %v5283_v22 = vmul.f32 %v6618_v45, %v5193_v17  ;;  %v5195_v5 = vmul.f32 %v6620_v55, %v10260_v0  ;;  %v5233_v32 = vadd.f32 %v5232_v14, %v5193_v17  ;;  %vm10621_vm0 = vmand %vm4836_vm12, %vm4877_vm11 }
 0x352   : > { %v5322_v36 = vadd.f32 %v5321_v6, %v5282_v60  ;;  %v5731_v19 = vsel %vm10545_vm15, 1.0, %v10870_v54  ;;  %vm5039_vm13 = vcmp.le.f32.partialorder %v10488_v56, 16.0  ;;  %vm4958_vm6 = vcmp.ge.f32.partialorder %v10535_v16, 1.0  ;;  %v6625_v6 = vld [vmem:[%s8882_s29 + $0x100] sm:$0xff] }
 0x353   : > { %v4757_v49 = vmul.f32 18.0, %v10561_v33  ;;  %v5284_v38 = vmul.f32 %v6619_v21, %v5194_v10  ;;  %v5196_v35 = vmul.f32 %v6621_v9, %v10368_v1  ;;  %v5234_v27 = vadd.f32 %v5233_v32, %v5194_v10  ;;  %vm4999_vm14 = vmand %vm10604_vm5, %vm4958_vm6 }
 0x354   : > { %v5323_v18 = vadd.f32 %v5322_v36, %v5283_v22  ;;  %vm5040_vm1 = vcmp.le.f32.partialorder %v10535_v16, 16.0  ;;  %vm4959_vm15 = vcmp.ge.f32.partialorder %v10559_v47, 1.0  ;;  %v4796_v1 = vsub.f32 %v4590_v13, %v4755_v42  ;;  %vm10637_vm7 = vmand %vm4998_vm9, %vm5039_vm13  ;;  %v6623_v13 = vld [vmem:[%s8882_s29 + $0xf0] sm:$0xff] }
 0x355   : > { %v4756_v61 = vmul.f32 18.0, %v10584_v7  ;;  %v5285_v30 = vmul.f32 %v6620_v55, %v5195_v5  ;;  %v5197_v58 = vmul.f32 %v6622_v57, %v10403_v26  ;;  %v5235_v20 = vadd.f32 %v5234_v27, %v5195_v5  ;;  %vm10652_vm12 = vmand %vm10621_vm0, %vm4959_vm15 }
 0x356   : > { %v5324_v3 = vadd.f32 %v5323_v18, %v5284_v38  ;;  %vm5041_vm10 = vcmp.le.f32.partialorder %v10559_v47, 16.0  ;;  %vm4837_vm8 = vcmp.ge.f32.partialorder %v10537_v63, 1.0  ;;  %vm4878_vm3 = vcmp.le.f32.partialorder %v10537_v63, 16.0  ;;  %vm10658_vm11 = vmand %vm4999_vm14, %vm5040_vm1  ;;  %v11267_v63 = vld [vmem:[#allocation25_spill] sm:$0xff] }
 0x357   : > { %v4798_v26 = vsub.f32 %v4592_v28, %v4757_v49  ;;  %v5286_v46 = vmul.f32 %v6621_v9, %v5196_v35  ;;  %v5198_v44 = vmul.f32 %v6623_v13, %v10416_v24  ;;  %v5236_v39 = vadd.f32 %v5235_v20, %v5196_v35  ;;  %v6624_v28 = vld [vmem:[%s8882_s29 + $0xf8] sm:$0xff]  ;;  %vm4919_vm9 = vmand %vm4837_vm8, %vm4878_vm3 }
 0x358   : > { %v5325_v34 = vadd.f32 %v5324_v3, %v5285_v30  ;;  %vm4960_vm13 = vcmp.ge.f32.partialorder %v4796_v1, 1.0  ;;  %v4797_v24 = vsub.f32 %v4591_v41, %v4756_v61  ;;  %vm4839_vm5 = vcmp.ge.f32.partialorder %v10561_v33, 1.0  ;;  %vm10679_vm1 = vmand %vm10652_vm12, %vm5041_vm10 }
 0x359   : > { %vm4880_vm6 = vcmp.le.f32.partialorder %v10561_v33, 16.0  ;;  %v5287_v25 = vmul.f32 %v6622_v57, %v5197_v58  ;;  %v5199_v17 = vmul.f32 %v6624_v28, %v10427_v53  ;;  %v5237_v16 = vadd.f32 %v5236_v39, %v5197_v58  ;;  %vm5001_vm10 = vmand %vm4919_vm9, %vm4960_vm13 }
 0x35a   : > { %v5326_v43 = vadd.f32 %v5325_v34, %v5286_v46  ;;  %v5732_v31 = vsel %vm10569_vm4, 1.0, %v10870_v54  ;;  %vm4838_vm0 = vcmp.ge.f32.partialorder %v10584_v7, 1.0  ;;  %vm4879_vm15 = vcmp.le.f32.partialorder %v10584_v7, 16.0  ;;  %vm4921_vm4 = vmand %vm4839_vm5, %vm4880_vm6 }
 0x35b   : > { %vm4962_vm14 = vcmp.ge.f32.partialorder %v4798_v26, 1.0  ;;  %v5288_v53 = vmul.f32 %v6623_v13, %v5198_v44  ;;  %v5200_v51 = vmul.f32 %v11267_v63, %v5731_v19  ;;  %v5238_v37 = vadd.f32 %v5237_v16, %v5198_v44  ;;  %vm4920_vm12 = vmand %vm4838_vm0, %vm4879_vm15 }
 0x35c   : > { %v5327_v4 = vadd.f32 %v5326_v43, %v5287_v25  ;;  %v5733_v47 = vsel %vm10592_vm2, 1.0, %v10870_v54  ;;  %vm5042_vm8 = vcmp.le.f32.partialorder %v4796_v1, 16.0  ;;  %vm4961_vm3 = vcmp.ge.f32.partialorder %v4797_v24, 1.0  ;;  %vm5003_vm5 = vmand %vm4921_vm4, %vm4962_vm14 }
 0x35d   : > { %v5289_v60 = vmul.f32 %v6624_v28, %v5199_v17  ;;  %v5201_v21 = vmul.f32 %v9576_v59, %v5732_v31  ;;  %v5239_v10 = vadd.f32 %v5238_v37, %v5199_v17  ;;  %v5734_v33 = vsel %vm10637_vm7, 1.0, %v10870_v54  ;;  %vm10699_vm2 = vmand %vm5001_vm10, %vm5042_vm8 }
 0x35e   : > { %v5328_v15 = vadd.f32 %v5327_v4, %v5288_v53  ;;  %vm5044_vm6 = vcmp.le.f32.partialorder %v4798_v26, 16.0  ;;  %v5290_v14 = vmul.f32 %v6625_v6, %v5200_v51  ;;  %v5202_v8 = vmul.f32 %v9717_v50, %v5733_v47  ;;  %vm5002_vm13 = vmand %vm4920_vm12, %vm4961_vm3 }
 0x35f   : > { %v5240_v7 = vadd.f32 %v5239_v10, %v5200_v51  ;;  %v5735_v55 = vsel %vm10658_vm11, 1.0, %v10870_v54  ;;  %vm5043_vm7 = vcmp.le.f32.partialorder %v4797_v24, 16.0  ;;  %v5291_v5 = vmul.f32 %v9576_v59, %v5201_v21  ;;  %vm5085_vm9 = vmand %vm5003_vm5, %vm5044_vm6 }
 0x360   : > { %v5329_v22 = vadd.f32 %v5328_v15, %v5289_v60  ;;  %v5203_v62 = vmul.f32 %v9758_v29, %v5734_v33  ;;  %v5736_v19 = vsel %vm10679_vm1, 1.0, %v10870_v54  ;;  %v5292_v0 = vmul.f32 %v9717_v50, %v5202_v8  ;;  %vm5084_vm0 = vmand %vm5002_vm13, %vm5043_vm7 }
 0x361   : > { %v5241_v32 = vadd.f32 %v5240_v7, %v5201_v21  ;;  %v5204_v49 = vmul.f32 %v9876_v48, %v5735_v55  ;;  %v5737_v59 = vsel %vm10699_vm2, 1.0, %v10870_v54  ;;  %v5739_v35 = vsel %vm5085_vm9, 1.0, %v10870_v54 }
 0x362   : > { %v5330_v36 = vadd.f32 %v5329_v22, %v5290_v14  ;;  %v5293_v27 = vmul.f32 %v9758_v29, %v5203_v62  ;;  %v5205_v18 = vmul.f32 %v9932_v2, %v5736_v19  ;;  %v5738_v61 = vsel %vm5084_vm0, 1.0, %v10870_v54 }
 0x363   : > { %v5242_v38 = vadd.f32 %v5241_v32, %v5202_v8  ;;  %v5294_v50 = vmul.f32 %v9876_v48, %v5204_v49  ;;  %v5206_v30 = vmul.f32 %v10087_v23, %v5737_v59  ;;  %v5208_v20 = vmul.f32 %v10227_v52, %v5739_v35 }
 0x364   : > { %v5331_v9 = vadd.f32 %v5330_v36, %v5291_v5  ;;  %v5295_v3 = vmul.f32 %v9932_v2, %v5205_v18  ;;  %v5207_v12 = vmul.f32 %v10113_v11, %v5738_v61  ;;  %vm5248_vm11 = vcmask 1043456  }
 0x365   : > { %v5243_v40 = vadd.f32 %v5242_v38, %v5203_v62  ;;  %v5296_v46 = vmul.f32 %v10087_v23, %v5206_v30  ;;  %v5298_v48 = vmul.f32 %v10227_v52, %v5208_v20  ;;  %v5249_v34 = vsel %vm5248_vm11, %v5208_v20, 0.0 }
 0x366   : > { %v5332_v1 = vadd.f32 %v5331_v9, %v5292_v0  ;;  %v5297_v44 = vmul.f32 %v10113_v11, %v5207_v12 }
 0x367   : > { %v5244_v57 = vadd.f32 %v5243_v40, %v5204_v49  ;;  %v5338_v24 = vsel %vm5248_vm11, %v5298_v48, 0.0 }
 0x368   : > { %v5333_v58 = vadd.f32 %v5332_v1, %v5293_v27 }
 0x369   : > { %v5245_v29 = vadd.f32 %v5244_v57, %v5205_v18 }
 0x36a   : > { %v5334_v26 = vadd.f32 %v5333_v58, %v5294_v50 }
 0x36b   : > { %v5246_v13 = vadd.f32 %v5245_v29, %v5206_v30 }
 0x36c   : > { %v5335_v54 = vadd.f32 %v5334_v26, %v5295_v3 }
 0x36d   : > { %v5247_v56 = vadd.f32 %v5246_v13, %v5207_v12 }
 0x36e   : > { %v5336_v39 = vadd.f32 %v5335_v54, %v5296_v46 }
 0x36f   : > { %v5250_v45 = vadd.f32 %v5249_v34, %v5247_v56 }
 0x370   : > { %v5337_v2 = vadd.f32 %v5336_v39, %v5297_v44 }
 0x371   : > { %v5251_v25 = vrot.slane %v5250_v45, 4 }
 0x372   : > { %v5339_v28 = vadd.f32 %v5338_v24, %v5337_v2 }
 0x373   : > { %v5252_v17 = vadd.f32 %v5251_v25, %v5250_v45 }
 0x374   : > { %v5340_v16 = vrot.slane %v5339_v28, 4 }
 0x375   : > { %v5253_v23 = vrot.slane %v5252_v17, 2 }
 0x376   : > { %v5341_v43 = vadd.f32 %v5340_v16, %v5339_v28 }
 0x377   : > { %v5254_v31 = vadd.f32 %v5253_v23, %v5252_v17 }
 0x378   : > { %v5342_v41 = vrot.slane %v5341_v43, 2 }
 0x379   : > { %v5255_v52 = vrot.slane %v5254_v31, 1 }
 0x37a   : > { %v5343_v11 = vadd.f32 %v5342_v41, %v5341_v43 }
 0x37b   : > { %v5256_v53 = vadd.f32 %v5255_v52, %v5254_v31 }
 0x37c   : > { %v5344_v63 = vrot.slane %v5343_v11, 1 }
 0x37d   : > { %5257 = vst [vmem:[%s171_s6] sm:$0x1] %v5256_v53 }
 0x37e   : > { %v5345_v51 = vadd.f32 %v5344_v63, %v5343_v11 }
 0x380   : > { %5346 = vst [vmem:[%s171_s6 + $0x1] sm:$0x1] %v5345_v51 }
 0x381   : > { %6639 = shalt.err (!%p6636_p3)
}
 0x382   : > { %s6640_s24 = scalar_lea.hbm %s10734_s10, 32  ;;  %s6644_s27 = scalar_lea.hbm %s10779_s3, 64 }
 0x383   : > { %p6641_p4 = scmp.ne.s32.totalorder %s10734_s10, %s6640_s24  ;;  %p6645_p9 = scmp.lt.u32.totalorder %s10734_s10, %s10779_s3 }
 0x384   : > { %p6646_p10 = scmp.lt.u32.totalorder %s6644_s27, %s6640_s24  ;;  %p6648_p12 = scmp.lt.u32.totalorder %s6640_s24, %s10734_s10 }
 0x385   : > { %p6642_p7 = pnand %p6641_p4, %p6752_p5 }
 0x386   : > { %p6647_p11 = por %p6646_p10, %p6645_p9 }
 0x387   : > { %p6643_p8 = pneg %p6642_p7 }
 0x388   : > { %p6649_p13 = por %p6648_p12, %p6647_p11 }
 0x38a   : > { %p6650_p0 = pnand %p6649_p13, %p6643_p8 }
 0x38c   : > { %6653 = shalt.err (!%p6650_p0)
}
 0x38d   : > { %6401 = dma.vmem_to_hbm [thread:$0]  (%p6752_p5), %s10736_s7, 32, %s10734_s10, %s5353_s11  }
 0x38e PF: > { %p6407_p1 = scmp.ge.s32.totalorder %s6688_s15, 2  ;;  %s5389_s5 = sand.u32 1, %s6676_s12  }
 0x38f   : > { %s5390_s30 = scalar_lea.sflag [#allocation3], %s5389_s5 }
 0x390   : > { %p6404_p2 = pnand %p6407_p1, %p6756_p6 }
 0x392   : > { %6671 = dma.done.wait (!%p6404_p2), %s5390_s30, 32  }
 0x393   : > { %6673 = vsyncadd (!%p6404_p2), %s5390_s30, 4294967264  ;;  %p14_p3 = scmp.ge.s32.totalorder %s6739_s18, 4   ;;  %s11270_s12 = smov %s6680_s13 }
 0x394   : > { %s11271_s13 = smov %s6684_s14  ;;  %s11272_s14 = smov %s6750_s21 }
 0x395   : > { %s11273_s15 = smov %s6739_s18  ;;  %16 = sbr.rel (!%p14_p3) target bundleno = 3 (0x3), region = 77 }
 0x39c   :  { %5395 = vsyncpa [#allocation3], 1 }
 0x39d   :  { %5397 = vsyncpa [#allocation3 + $0x1], 1 }

</bundles_post_ra>
